<compile_context>
chip_gen: v7x
topology: tpu7x:2x2x1
jax: 0.10.0
libtpu: 0.0.40
codegen_flags: <defaults>
</compile_context>

<pallas_src>
import jax
import jax.numpy as jnp
import numpy as np
from jax import lax
from jax.experimental import pallas as pl
from jax.experimental.pallas import tpu as pltpu

_EPS = 1e-5
_LANE = 128


def _down_block_kernel(x_ref, w1_ref, s1_ref, b1_ref, w2_ref, s2_ref, b2_ref,
                       down_ref, skip_ref, xpad_scr, ypad_scr, rowmax_scr):
    # x_ref       : (H, W, Cin)        unpadded input tile (one batch element)
    # w*_ref      : (3, 3, C, Cp)      HWIO conv weights, bf16, Cp = channels padded to 128
    # s*/b*_ref   : (1, Cp)            fused conv-bias + BN scale / bias (f32)
    # down_ref    : (H//2, W//2, Cp),  skip_ref : (H, W, Cp)
    # xpad_scr    : (H+2, W+2, Cin)    f32 scratch holding the haloed input
    # ypad_scr    : (H+2, W+2, Cp)     f32 scratch holding the haloed conv1 output
    # rowmax_scr  : (H//2, W, Cp)      f32 scratch for the row-pooled skip
    H, W, Cin = x_ref.shape
    Cp = w1_ref.shape[-1]

    # Zero only the 1-pixel borders of the padded scratches; interiors are
    # fully overwritten below.  Done every step (cheap: 4 thin strips) so the
    # kernel stays correct even when the batch axis is sharded across cores.
    def _zero_border(scr):
        Hs, Ws, Cs = scr.shape
        scr[0:1, :, :] = jnp.zeros((1, Ws, Cs), scr.dtype)
        scr[Hs - 1:Hs, :, :] = jnp.zeros((1, Ws, Cs), scr.dtype)
        scr[:, 0:1, :] = jnp.zeros((Hs, 1, Cs), scr.dtype)
        scr[:, Ws - 1:Ws, :] = jnp.zeros((Hs, 1, Cs), scr.dtype)

    _zero_border(xpad_scr)
    _zero_border(ypad_scr)

    # Stage the (unpadded) input tile into the interior of the halo scratch.
    xpad_scr[1:H + 1, 1:W + 1, :] = x_ref[...]

    # 3x3 conv as 9 shifted MXU matmuls: (H*W, C) x (C, Cp); bf16 operands,
    # f32 accumulation.
    def tap(scr, w_ref, dy, dx, c):
        patch = scr[dy:dy + H, dx:dx + W, :].reshape(H * W, c)
        return jnp.dot(patch.astype(jnp.bfloat16), w_ref[dy, dx],
                       preferred_element_type=jnp.float32)

    # ---- conv1 + fused bias / BN(eval) / ReLU ----
    acc1 = tap(xpad_scr, w1_ref, 0, 0, Cin)
    for dy in range(3):
        for dx in range(3):
            if dy == 0 and dx == 0:
                continue
            acc1 = acc1 + tap(xpad_scr, w1_ref, dy, dx, Cin)
    y1 = jnp.maximum(acc1 * s1_ref[0] + b1_ref[0], 0.0)            # (H*W, Cp) f32

    ypad_scr[1:H + 1, 1:W + 1, :] = y1.reshape(H, W, Cp)

    # ---- conv2 + fused bias / BN(eval) / ReLU ----
    acc2 = tap(ypad_scr, w2_ref, 0, 0, Cp)
    for dy in range(3):
        for dx in range(3):
            if dy == 0 and dx == 0:
                continue
            acc2 = acc2 + tap(ypad_scr, w2_ref, dy, dx, Cp)
    skip = jnp.maximum(acc2 * s2_ref[0] + b2_ref[0], 0.0).reshape(H, W, Cp)
    skip_ref[...] = skip                                            # lane-dense store

    # ---- 2x2 max pool, stride 2 ----
    # Row pairs reduced in registers (leading-dim-only reshape), column pairs
    # via one stride-2 read of a small scratch — skip_ref and down_ref writes
    # stay independent (no read-back of the output ref).
    skip4 = skip.reshape(H // 2, 2, W, Cp)
    rowmax_scr[...] = jnp.maximum(skip4[:, 0], skip4[:, 1])
    down_ref[...] = jnp.maximum(rowmax_scr[:, pl.ds(0, W // 2, 2), :],
                                rowmax_scr[:, pl.ds(1, W // 2, 2), :])


def down_block_pallas(x_nchw, params):
    """DownBlock forward. Returns (down_out, skip_out) in NCHW like PyTorch."""
    N, Cin, H, W = x_nchw.shape
    Cout = params["w1"].shape[0]
    assert H % 2 == 0 and W % 2 == 0, "MaxPool2d(2) expects even spatial dims"

    Cp = ((Cout + _LANE - 1) // _LANE) * _LANE       # channels padded to lane width
    pad_c = Cp - Cout

    x = jnp.transpose(x_nchw, (0, 2, 3, 1)).astype(jnp.float32)     # NHWC

    # OIHW -> HWIO, zero-pad output (and conv2 input) channels to Cp, bf16 for MXU.
    w1 = jnp.pad(jnp.transpose(params["w1"], (2, 3, 1, 0)),
                 ((0, 0), (0, 0), (0, 0), (0, pad_c))).astype(jnp.bfloat16)
    w2 = jnp.pad(jnp.transpose(params["w2"], (2, 3, 1, 0)),
                 ((0, 0), (0, 0), (0, pad_c), (0, pad_c))).astype(jnp.bfloat16)

    # Fold conv bias + eval-mode BatchNorm (running_mean=0, running_var=1) into
    # per-channel scale / bias applied after the conv matmuls.  Padded channels
    # get scale = bias = 0, so they stay identically zero through both ReLUs.
    inv1 = params["g1"] / jnp.sqrt(1.0 + _EPS)
    inv2 = params["g2"] / jnp.sqrt(1.0 + _EPS)

    def _pad_vec(v):
        return jnp.pad(v.astype(jnp.float32), (0, pad_c)).reshape(1, Cp)

    s1 = _pad_vec(inv1)
    b1 = _pad_vec(params["b1"] * inv1 + params["beta1"])
    s2 = _pad_vec(inv2)
    b2 = _pad_vec(params["b2"] * inv2 + params["beta2"])

    down_p, skip_p = pl.pallas_call(
        _down_block_kernel,
        out_shape=(
            jax.ShapeDtypeStruct((N, H // 2, W // 2, Cp), jnp.float32),
            jax.ShapeDtypeStruct((N, H, W, Cp), jnp.float32),
        ),
        grid_spec=pltpu.PrefetchScalarGridSpec(
            num_scalar_prefetch=0,
            grid=(N,),
            in_specs=[
                pl.BlockSpec((pl.Squeezed(), H, W, Cin), lambda n: (n, 0, 0, 0)),
                pl.BlockSpec((3, 3, Cin, Cp), lambda n: (0, 0, 0, 0)),
                pl.BlockSpec((1, Cp), lambda n: (0, 0)),
                pl.BlockSpec((1, Cp), lambda n: (0, 0)),
                pl.BlockSpec((3, 3, Cp, Cp), lambda n: (0, 0, 0, 0)),
                pl.BlockSpec((1, Cp), lambda n: (0, 0)),
                pl.BlockSpec((1, Cp), lambda n: (0, 0)),
            ],
            out_specs=[
                pl.BlockSpec((pl.Squeezed(), H // 2, W // 2, Cp),
                             lambda n: (n, 0, 0, 0)),
                pl.BlockSpec((pl.Squeezed(), H, W, Cp),
                             lambda n: (n, 0, 0, 0)),
            ],
            scratch_shapes=[
                pltpu.VMEM((H + 2, W + 2, Cin), jnp.float32),   # haloed input
                pltpu.VMEM((H + 2, W + 2, Cp), jnp.float32),    # haloed conv1 out
                pltpu.VMEM((H // 2, W, Cp), jnp.float32),       # row-pooled skip
            ],
        ),
        compiler_params=pltpu.CompilerParams(
            dimension_semantics=("parallel",),      # batch elements independent
            vmem_limit_bytes=32 * 1024 * 1024,
        ),
    )(x, w1, s1, b1, w2, s2, b2)

    # drop channel padding, back to PyTorch NCHW convention
    down = jnp.transpose(down_p[..., :Cout], (0, 3, 1, 2))
    skip = jnp.transpose(skip_p[..., :Cout], (0, 3, 1, 2))
    return down, skip


def _reference_forward(x_nchw, params):
    """Pure-JAX reference (lax.conv / reduce_window) using the same bf16
    operand / f32 accumulation quantization as the kernel."""
    x = jnp.transpose(x_nchw, (0, 2, 3, 1)).astype(jnp.float32)

    def conv_bn_relu(inp, w_oihw, b, g, beta):
        w = jnp.transpose(w_oihw, (2, 3, 1, 0)).astype(jnp.bfloat16)
        y = lax.conv_general_dilated(
            inp.astype(jnp.bfloat16), w, window_strides=(1, 1), padding="SAME",
            dimension_numbers=("NHWC", "HWIO", "NHWC"),
            preferred_element_type=jnp.float32) + b
        y = y / jnp.sqrt(1.0 + _EPS) * g + beta     # BN eval, mean=0, var=1
        return jnp.maximum(y, 0.0)

    s = conv_bn_relu(x, params["w1"], params["b1"], params["g1"], params["beta1"])
    s = conv_bn_relu(s, params["w2"], params["b2"], params["g2"], params["beta2"])
    d = lax.reduce_window(s, -jnp.inf, lax.max,
                          (1, 2, 2, 1), (1, 2, 2, 1), "VALID")
    return (jnp.transpose(d, (0, 3, 1, 2)), jnp.transpose(s, (0, 3, 1, 2)))


def _init_params(key, in_channels, out_channels):
    ks = jax.random.split(key, 8)
    return {
        "w1": 0.1 * jax.random.normal(ks[0], (out_channels, in_channels, 3, 3), jnp.float32),
        "b1": 0.1 * jax.random.normal(ks[1], (out_channels,), jnp.float32),
        "g1": 1.0 + 0.1 * jax.random.normal(ks[2], (out_channels,), jnp.float32),
        "beta1": 0.1 * jax.random.normal(ks[3], (out_channels,), jnp.float32),
        "w2": 0.1 * jax.random.normal(ks[4], (out_channels, out_channels, 3, 3), jnp.float32),
        "b2": 0.1 * jax.random.normal(ks[5], (out_channels,), jnp.float32),
        "g2": 1.0 + 0.1 * jax.random.normal(ks[6], (out_channels,), jnp.float32),
        "beta2": 0.1 * jax.random.normal(ks[7], (out_channels,), jnp.float32),
    }


if __name__ == "__main__":
    key = jax.random.PRNGKey(0)
    k_x, k_p = jax.random.split(key)

    N, Cin, H, W = 2, 4, 16, 16
    Cout = 8
    x = jax.random.normal(k_x, (N, Cin, H, W), jnp.float32)
    params = _init_params(k_p, Cin, Cout)

    down, skip = down_block_pallas(x, params)
    jax.block_until_ready((down, skip))

    down_ref, skip_ref = _reference_forward(x, params)
    np.testing.assert_allclose(np.asarray(skip), np.asarray(skip_ref),
                               rtol=2e-3, atol=2e-3)
    np.testing.assert_allclose(np.asarray(down), np.asarray(down_ref),
                               rtol=2e-3, atol=2e-3)

    assert down.shape == (N, Cout, H // 2, W // 2)
    assert skip.shape == (N, Cout, H, W)
    print("KERNEL_OK")
</pallas_src>

<mosaic_0001>
module attributes {stable_mosaic.version = 11 : i64} {
  func.func @_down_block_kernel(%arg0: i32, %arg1: memref<1x16x16x4xf32, #tpu.memory_space<vmem>>, %arg2: memref<3x3x4x128xbf16, #tpu.memory_space<vmem>>, %arg3: memref<1x128xf32, #tpu.memory_space<vmem>>, %arg4: memref<1x128xf32, #tpu.memory_space<vmem>>, %arg5: memref<3x3x128x128xbf16, #tpu.memory_space<vmem>>, %arg6: memref<1x128xf32, #tpu.memory_space<vmem>>, %arg7: memref<1x128xf32, #tpu.memory_space<vmem>>, %arg8: memref<1x8x8x128xf32, #tpu.memory_space<vmem>>, %arg9: memref<1x16x16x128xf32, #tpu.memory_space<vmem>>, %arg10: memref<18x18x4xf32, #tpu.memory_space<vmem>>, %arg11: memref<18x18x128xf32, #tpu.memory_space<vmem>>, %arg12: memref<8x16x128xf32, #tpu.memory_space<vmem>>) attributes {dimension_semantics = [#tpu.dimension_semantics<parallel>], iteration_bounds = array<i64: 2>, scalar_prefetch = 0 : i64, scratch_operands = 3 : i64, tpu.core_type = #tpu.core_type<tc>, window_params = [{transform_indices = @transform_0, window_bounds = array<i64: 1, 16, 16, 4>}, {pipeline_mode = #tpu.pipeline_mode<synchronous>, transform_indices = @transform_1, window_bounds = array<i64: 3, 3, 4, 128>}, {pipeline_mode = #tpu.pipeline_mode<synchronous>, transform_indices = @transform_2, window_bounds = array<i64: 1, 128>}, {pipeline_mode = #tpu.pipeline_mode<synchronous>, transform_indices = @transform_3, window_bounds = array<i64: 1, 128>}, {pipeline_mode = #tpu.pipeline_mode<synchronous>, transform_indices = @transform_4, window_bounds = array<i64: 3, 3, 128, 128>}, {pipeline_mode = #tpu.pipeline_mode<synchronous>, transform_indices = @transform_5, window_bounds = array<i64: 1, 128>}, {pipeline_mode = #tpu.pipeline_mode<synchronous>, transform_indices = @transform_6, window_bounds = array<i64: 1, 128>}, {transform_indices = @transform_7, window_bounds = array<i64: 1, 8, 8, 128>}, {transform_indices = @transform_8, window_bounds = array<i64: 1, 16, 16, 128>}]} {
    %cst = arith.constant 0.000000e+00 : f32
    %0 = vector.broadcast %cst : f32 to vector<1x18x4xf32>
    %c0 = arith.constant 0 : index
    %c0_0 = arith.constant 0 : index
    %c0_1 = arith.constant 0 : index
    %1 = vector.load %arg10[%c0, %c0_0, %c0_1] : memref<18x18x4xf32, #tpu.memory_space<vmem>>, vector<1x18x4xf32>
    tpu.vector_store %arg10[%c0, %c0_0, %c0_1], %0 {strides = array<i32>} : memref<18x18x4xf32, #tpu.memory_space<vmem>>, vector<1x18x4xf32>,
    %cst_2 = arith.constant 0.000000e+00 : f32
    %2 = vector.broadcast %cst_2 : f32 to vector<1x18x4xf32>
    %c17 = arith.constant 17 : index
    %c0_3 = arith.constant 0 : index
    %c0_4 = arith.constant 0 : index
    %3 = vector.load %arg10[%c17, %c0_3, %c0_4] : memref<18x18x4xf32, #tpu.memory_space<vmem>>, vector<1x18x4xf32>
    tpu.vector_store %arg10[%c17, %c0_3, %c0_4], %2 {strides = array<i32>} : memref<18x18x4xf32, #tpu.memory_space<vmem>>, vector<1x18x4xf32>,
    %cst_5 = arith.constant 0.000000e+00 : f32
    %4 = vector.broadcast %cst_5 : f32 to vector<18x1x4xf32>
    %c0_6 = arith.constant 0 : index
    %c0_7 = arith.constant 0 : index
    %c0_8 = arith.constant 0 : index
    %5 = vector.load %arg10[%c0_6, %c0_7, %c0_8] : memref<18x18x4xf32, #tpu.memory_space<vmem>>, vector<18x1x4xf32>
    tpu.vector_store %arg10[%c0_6, %c0_7, %c0_8], %4 {strides = array<i32>} : memref<18x18x4xf32, #tpu.memory_space<vmem>>, vector<18x1x4xf32>,
    %cst_9 = arith.constant 0.000000e+00 : f32
    %6 = vector.broadcast %cst_9 : f32 to vector<18x1x4xf32>
    %c0_10 = arith.constant 0 : index
    %c17_11 = arith.constant 17 : index
    %c0_12 = arith.constant 0 : index
    %7 = vector.load %arg10[%c0_10, %c17_11, %c0_12] : memref<18x18x4xf32, #tpu.memory_space<vmem>>, vector<18x1x4xf32>
    tpu.vector_store %arg10[%c0_10, %c17_11, %c0_12], %6 {strides = array<i32>} : memref<18x18x4xf32, #tpu.memory_space<vmem>>, vector<18x1x4xf32>,
    %cst_13 = arith.constant 0.000000e+00 : f32
    %8 = vector.broadcast %cst_13 : f32 to vector<1x18x128xf32>
    %c0_14 = arith.constant 0 : index
    %c0_15 = arith.constant 0 : index
    %c0_16 = arith.constant 0 : index
    %9 = vector.load %arg11[%c0_14, %c0_15, %c0_16] : memref<18x18x128xf32, #tpu.memory_space<vmem>>, vector<1x18x128xf32>
    tpu.vector_store %arg11[%c0_14, %c0_15, %c0_16], %8 {strides = array<i32>} : memref<18x18x128xf32, #tpu.memory_space<vmem>>, vector<1x18x128xf32>,
    %cst_17 = arith.constant 0.000000e+00 : f32
    %10 = vector.broadcast %cst_17 : f32 to vector<1x18x128xf32>
    %c17_18 = arith.constant 17 : index
    %c0_19 = arith.constant 0 : index
    %c0_20 = arith.constant 0 : index
    %11 = vector.load %arg11[%c17_18, %c0_19, %c0_20] : memref<18x18x128xf32, #tpu.memory_space<vmem>>, vector<1x18x128xf32>
    tpu.vector_store %arg11[%c17_18, %c0_19, %c0_20], %10 {strides = array<i32>} : memref<18x18x128xf32, #tpu.memory_space<vmem>>, vector<1x18x128xf32>,
    %cst_21 = arith.constant 0.000000e+00 : f32
    %12 = vector.broadcast %cst_21 : f32 to vector<18x1x128xf32>
    %c0_22 = arith.constant 0 : index
    %c0_23 = arith.constant 0 : index
    %c0_24 = arith.constant 0 : index
    %13 = vector.load %arg11[%c0_22, %c0_23, %c0_24] : memref<18x18x128xf32, #tpu.memory_space<vmem>>, vector<18x1x128xf32>
    tpu.vector_store %arg11[%c0_22, %c0_23, %c0_24], %12 {strides = array<i32>} : memref<18x18x128xf32, #tpu.memory_space<vmem>>, vector<18x1x128xf32>,
    %cst_25 = arith.constant 0.000000e+00 : f32
    %14 = vector.broadcast %cst_25 : f32 to vector<18x1x128xf32>
    %c0_26 = arith.constant 0 : index
    %c17_27 = arith.constant 17 : index
    %c0_28 = arith.constant 0 : index
    %15 = vector.load %arg11[%c0_26, %c17_27, %c0_28] : memref<18x18x128xf32, #tpu.memory_space<vmem>>, vector<18x1x128xf32>
    tpu.vector_store %arg11[%c0_26, %c17_27, %c0_28], %14 {strides = array<i32>} : memref<18x18x128xf32, #tpu.memory_space<vmem>>, vector<18x1x128xf32>,
    %c0_29 = arith.constant 0 : index
    %c0_30 = arith.constant 0 : index
    %c0_31 = arith.constant 0 : index
    %c0_32 = arith.constant 0 : index
    %16 = vector.load %arg1[%c0_29, %c0_30, %c0_31, %c0_32] : memref<1x16x16x4xf32, #tpu.memory_space<vmem>>, vector<1x16x16x4xf32>
    %17 = vector.shape_cast %16 : vector<1x16x16x4xf32> to vector<16x16x4xf32>
    %c1 = arith.constant 1 : index
    %c1_33 = arith.constant 1 : index
    %c0_34 = arith.constant 0 : index
    %18 = vector.load %arg10[%c1, %c1_33, %c0_34] : memref<18x18x4xf32, #tpu.memory_space<vmem>>, vector<16x16x4xf32>
    tpu.vector_store %arg10[%c1, %c1_33, %c0_34], %17 {strides = array<i32>} : memref<18x18x4xf32, #tpu.memory_space<vmem>>, vector<16x16x4xf32>,
    %c0_35 = arith.constant 0 : index
    %c0_36 = arith.constant 0 : index
    %c0_37 = arith.constant 0 : index
    %19 = vector.load %arg10[%c0_35, %c0_36, %c0_37] : memref<18x18x4xf32, #tpu.memory_space<vmem>>, vector<16x16x4xf32>
    %20 = vector.shape_cast %19 : vector<16x16x4xf32> to vector<256x4xf32>
    %21 = arith.truncf %20 : vector<256x4xf32> to vector<256x4xbf16>
    %c0_38 = arith.constant 0 : index
    %c0_39 = arith.constant 0 : index
    %c0_40 = arith.constant 0 : index
    %c0_41 = arith.constant 0 : index
    %22 = vector.load %arg2[%c0_38, %c0_39, %c0_40, %c0_41] : memref<3x3x4x128xbf16, #tpu.memory_space<vmem>>, vector<1x1x4x128xbf16>
    %23 = vector.shape_cast %22 : vector<1x1x4x128xbf16> to vector<4x128xbf16>
    %cst_42 = arith.constant dense<0.000000e+00> : vector<256x128xf32>
    %24 = tpu.matmul %21, %23, %cst_42 {dimension_numbers = #tpu.dot_dimension_numbers<[1], [0], [0], [1], [0, 0, 1, 1], [], []>} : vector<256x4xbf16>, vector<4x128xbf16>, vector<256x128xf32> -> vector<256x128xf32>
    %c0_43 = arith.constant 0 : index
    %c1_44 = arith.constant 1 : index
    %c0_45 = arith.constant 0 : index
    %25 = vector.load %arg10[%c0_43, %c1_44, %c0_45] : memref<18x18x4xf32, #tpu.memory_space<vmem>>, vector<16x16x4xf32>
    %26 = vector.shape_cast %25 : vector<16x16x4xf32> to vector<256x4xf32>
    %27 = arith.truncf %26 : vector<256x4xf32> to vector<256x4xbf16>
    %c0_46 = arith.constant 0 : index
    %c1_47 = arith.constant 1 : index
    %c0_48 = arith.constant 0 : index
    %c0_49 = arith.constant 0 : index
    %28 = vector.load %arg2[%c0_46, %c1_47, %c0_48, %c0_49] : memref<3x3x4x128xbf16, #tpu.memory_space<vmem>>, vector<1x1x4x128xbf16>
    %29 = vector.shape_cast %28 : vector<1x1x4x128xbf16> to vector<4x128xbf16>
    %cst_50 = arith.constant dense<0.000000e+00> : vector<256x128xf32>
    %30 = tpu.matmul %27, %29, %cst_50 {dimension_numbers = #tpu.dot_dimension_numbers<[1], [0], [0], [1], [0, 0, 1, 1], [], []>} : vector<256x4xbf16>, vector<4x128xbf16>, vector<256x128xf32> -> vector<256x128xf32>
    %31 = arith.addf %24, %30 : vector<256x128xf32>
    %c0_51 = arith.constant 0 : index
    %c2 = arith.constant 2 : index
    %c0_52 = arith.constant 0 : index
    %32 = vector.load %arg10[%c0_51, %c2, %c0_52] : memref<18x18x4xf32, #tpu.memory_space<vmem>>, vector<16x16x4xf32>
    %33 = vector.shape_cast %32 : vector<16x16x4xf32> to vector<256x4xf32>
    %34 = arith.truncf %33 : vector<256x4xf32> to vector<256x4xbf16>
    %c0_53 = arith.constant 0 : index
    %c2_54 = arith.constant 2 : index
    %c0_55 = arith.constant 0 : index
    %c0_56 = arith.constant 0 : index
    %35 = vector.load %arg2[%c0_53, %c2_54, %c0_55, %c0_56] : memref<3x3x4x128xbf16, #tpu.memory_space<vmem>>, vector<1x1x4x128xbf16>
    %36 = vector.shape_cast %35 : vector<1x1x4x128xbf16> to vector<4x128xbf16>
    %cst_57 = arith.constant dense<0.000000e+00> : vector<256x128xf32>
    %37 = tpu.matmul %34, %36, %cst_57 {dimension_numbers = #tpu.dot_dimension_numbers<[1], [0], [0], [1], [0, 0, 1, 1], [], []>} : vector<256x4xbf16>, vector<4x128xbf16>, vector<256x128xf32> -> vector<256x128xf32>
    %38 = arith.addf %31, %37 : vector<256x128xf32>
    %c1_58 = arith.constant 1 : index
    %c0_59 = arith.constant 0 : index
    %c0_60 = arith.constant 0 : index
    %39 = vector.load %arg10[%c1_58, %c0_59, %c0_60] : memref<18x18x4xf32, #tpu.memory_space<vmem>>, vector<16x16x4xf32>
    %40 = vector.shape_cast %39 : vector<16x16x4xf32> to vector<256x4xf32>
    %41 = arith.truncf %40 : vector<256x4xf32> to vector<256x4xbf16>
    %c1_61 = arith.constant 1 : index
    %c0_62 = arith.constant 0 : index
    %c0_63 = arith.constant 0 : index
    %c0_64 = arith.constant 0 : index
    %42 = vector.load %arg2[%c1_61, %c0_62, %c0_63, %c0_64] : memref<3x3x4x128xbf16, #tpu.memory_space<vmem>>, vector<1x1x4x128xbf16>
    %43 = vector.shape_cast %42 : vector<1x1x4x128xbf16> to vector<4x128xbf16>
    %cst_65 = arith.constant dense<0.000000e+00> : vector<256x128xf32>
    %44 = tpu.matmul %41, %43, %cst_65 {dimension_numbers = #tpu.dot_dimension_numbers<[1], [0], [0], [1], [0, 0, 1, 1], [], []>} : vector<256x4xbf16>, vector<4x128xbf16>, vector<256x128xf32> -> vector<256x128xf32>
    %45 = arith.addf %38, %44 : vector<256x128xf32>
    %c1_66 = arith.constant 1 : index
    %c1_67 = arith.constant 1 : index
    %c0_68 = arith.constant 0 : index
    %46 = vector.load %arg10[%c1_66, %c1_67, %c0_68] : memref<18x18x4xf32, #tpu.memory_space<vmem>>, vector<16x16x4xf32>
    %47 = vector.shape_cast %46 : vector<16x16x4xf32> to vector<256x4xf32>
    %48 = arith.truncf %47 : vector<256x4xf32> to vector<256x4xbf16>
    %c1_69 = arith.constant 1 : index
    %c1_70 = arith.constant 1 : index
    %c0_71 = arith.constant 0 : index
    %c0_72 = arith.constant 0 : index
    %49 = vector.load %arg2[%c1_69, %c1_70, %c0_71, %c0_72] : memref<3x3x4x128xbf16, #tpu.memory_space<vmem>>, vector<1x1x4x128xbf16>
    %50 = vector.shape_cast %49 : vector<1x1x4x128xbf16> to vector<4x128xbf16>
    %cst_73 = arith.constant dense<0.000000e+00> : vector<256x128xf32>
    %51 = tpu.matmul %48, %50, %cst_73 {dimension_numbers = #tpu.dot_dimension_numbers<[1], [0], [0], [1], [0, 0, 1, 1], [], []>} : vector<256x4xbf16>, vector<4x128xbf16>, vector<256x128xf32> -> vector<256x128xf32>
    %52 = arith.addf %45, %51 : vector<256x128xf32>
    %c1_74 = arith.constant 1 : index
    %c2_75 = arith.constant 2 : index
    %c0_76 = arith.constant 0 : index
    %53 = vector.load %arg10[%c1_74, %c2_75, %c0_76] : memref<18x18x4xf32, #tpu.memory_space<vmem>>, vector<16x16x4xf32>
    %54 = vector.shape_cast %53 : vector<16x16x4xf32> to vector<256x4xf32>
    %55 = arith.truncf %54 : vector<256x4xf32> to vector<256x4xbf16>
    %c1_77 = arith.constant 1 : index
    %c2_78 = arith.constant 2 : index
    %c0_79 = arith.constant 0 : index
    %c0_80 = arith.constant 0 : index
    %56 = vector.load %arg2[%c1_77, %c2_78, %c0_79, %c0_80] : memref<3x3x4x128xbf16, #tpu.memory_space<vmem>>, vector<1x1x4x128xbf16>
    %57 = vector.shape_cast %56 : vector<1x1x4x128xbf16> to vector<4x128xbf16>
    %cst_81 = arith.constant dense<0.000000e+00> : vector<256x128xf32>
    %58 = tpu.matmul %55, %57, %cst_81 {dimension_numbers = #tpu.dot_dimension_numbers<[1], [0], [0], [1], [0, 0, 1, 1], [], []>} : vector<256x4xbf16>, vector<4x128xbf16>, vector<256x128xf32> -> vector<256x128xf32>
    %59 = arith.addf %52, %58 : vector<256x128xf32>
    %c2_82 = arith.constant 2 : index
    %c0_83 = arith.constant 0 : index
    %c0_84 = arith.constant 0 : index
    %60 = vector.load %arg10[%c2_82, %c0_83, %c0_84] : memref<18x18x4xf32, #tpu.memory_space<vmem>>, vector<16x16x4xf32>
    %61 = vector.shape_cast %60 : vector<16x16x4xf32> to vector<256x4xf32>
    %62 = arith.truncf %61 : vector<256x4xf32> to vector<256x4xbf16>
    %c2_85 = arith.constant 2 : index
    %c0_86 = arith.constant 0 : index
    %c0_87 = arith.constant 0 : index
    %c0_88 = arith.constant 0 : index
    %63 = vector.load %arg2[%c2_85, %c0_86, %c0_87, %c0_88] : memref<3x3x4x128xbf16, #tpu.memory_space<vmem>>, vector<1x1x4x128xbf16>
    %64 = vector.shape_cast %63 : vector<1x1x4x128xbf16> to vector<4x128xbf16>
    %cst_89 = arith.constant dense<0.000000e+00> : vector<256x128xf32>
    %65 = tpu.matmul %62, %64, %cst_89 {dimension_numbers = #tpu.dot_dimension_numbers<[1], [0], [0], [1], [0, 0, 1, 1], [], []>} : vector<256x4xbf16>, vector<4x128xbf16>, vector<256x128xf32> -> vector<256x128xf32>
    %66 = arith.addf %59, %65 : vector<256x128xf32>
    %c2_90 = arith.constant 2 : index
    %c1_91 = arith.constant 1 : index
    %c0_92 = arith.constant 0 : index
    %67 = vector.load %arg10[%c2_90, %c1_91, %c0_92] : memref<18x18x4xf32, #tpu.memory_space<vmem>>, vector<16x16x4xf32>
    %68 = vector.shape_cast %67 : vector<16x16x4xf32> to vector<256x4xf32>
    %69 = arith.truncf %68 : vector<256x4xf32> to vector<256x4xbf16>
    %c2_93 = arith.constant 2 : index
    %c1_94 = arith.constant 1 : index
    %c0_95 = arith.constant 0 : index
    %c0_96 = arith.constant 0 : index
    %70 = vector.load %arg2[%c2_93, %c1_94, %c0_95, %c0_96] : memref<3x3x4x128xbf16, #tpu.memory_space<vmem>>, vector<1x1x4x128xbf16>
    %71 = vector.shape_cast %70 : vector<1x1x4x128xbf16> to vector<4x128xbf16>
    %cst_97 = arith.constant dense<0.000000e+00> : vector<256x128xf32>
    %72 = tpu.matmul %69, %71, %cst_97 {dimension_numbers = #tpu.dot_dimension_numbers<[1], [0], [0], [1], [0, 0, 1, 1], [], []>} : vector<256x4xbf16>, vector<4x128xbf16>, vector<256x128xf32> -> vector<256x128xf32>
    %73 = arith.addf %66, %72 : vector<256x128xf32>
    %c2_98 = arith.constant 2 : index
    %c2_99 = arith.constant 2 : index
    %c0_100 = arith.constant 0 : index
    %74 = vector.load %arg10[%c2_98, %c2_99, %c0_100] : memref<18x18x4xf32, #tpu.memory_space<vmem>>, vector<16x16x4xf32>
    %75 = vector.shape_cast %74 : vector<16x16x4xf32> to vector<256x4xf32>
    %76 = arith.truncf %75 : vector<256x4xf32> to vector<256x4xbf16>
    %c2_101 = arith.constant 2 : index
    %c2_102 = arith.constant 2 : index
    %c0_103 = arith.constant 0 : index
    %c0_104 = arith.constant 0 : index
    %77 = vector.load %arg2[%c2_101, %c2_102, %c0_103, %c0_104] : memref<3x3x4x128xbf16, #tpu.memory_space<vmem>>, vector<1x1x4x128xbf16>
    %78 = vector.shape_cast %77 : vector<1x1x4x128xbf16> to vector<4x128xbf16>
    %cst_105 = arith.constant dense<0.000000e+00> : vector<256x128xf32>
    %79 = tpu.matmul %76, %78, %cst_105 {dimension_numbers = #tpu.dot_dimension_numbers<[1], [0], [0], [1], [0, 0, 1, 1], [], []>} : vector<256x4xbf16>, vector<4x128xbf16>, vector<256x128xf32> -> vector<256x128xf32>
    %80 = arith.addf %73, %79 : vector<256x128xf32>
    %c0_106 = arith.constant 0 : index
    %c0_107 = arith.constant 0 : index
    %81 = vector.load %arg3[%c0_106, %c0_107] : memref<1x128xf32, #tpu.memory_space<vmem>>, vector<1x128xf32>
    %82 = vector.shape_cast %81 : vector<1x128xf32> to vector<128xf32>
    %83 = vector.shape_cast %82 : vector<128xf32> to vector<1x128xf32>
    %84 = vector.broadcast %83 : vector<1x128xf32> to vector<256x128xf32>
    %85 = arith.mulf %80, %84 : vector<256x128xf32>
    %c0_108 = arith.constant 0 : index
    %c0_109 = arith.constant 0 : index
    %86 = vector.load %arg4[%c0_108, %c0_109] : memref<1x128xf32, #tpu.memory_space<vmem>>, vector<1x128xf32>
    %87 = vector.shape_cast %86 : vector<1x128xf32> to vector<128xf32>
    %88 = vector.shape_cast %87 : vector<128xf32> to vector<1x128xf32>
    %89 = vector.broadcast %88 : vector<1x128xf32> to vector<256x128xf32>
    %90 = arith.addf %85, %89 : vector<256x128xf32>
    %cst_110 = arith.constant 0.000000e+00 : f32
    %91 = vector.broadcast %cst_110 : f32 to vector<256x128xf32>
    %92 = arith.maximumf %90, %91 : vector<256x128xf32>
    %93 = vector.shape_cast %92 : vector<256x128xf32> to vector<16x16x128xf32>
    %c1_111 = arith.constant 1 : index
    %c1_112 = arith.constant 1 : index
    %c0_113 = arith.constant 0 : index
    %94 = vector.load %arg11[%c1_111, %c1_112, %c0_113] : memref<18x18x128xf32, #tpu.memory_space<vmem>>, vector<16x16x128xf32>
    tpu.vector_store %arg11[%c1_111, %c1_112, %c0_113], %93 {strides = array<i32>} : memref<18x18x128xf32, #tpu.memory_space<vmem>>, vector<16x16x128xf32>,
    %c0_114 = arith.constant 0 : index
    %c0_115 = arith.constant 0 : index
    %c0_116 = arith.constant 0 : index
    %95 = vector.load %arg11[%c0_114, %c0_115, %c0_116] : memref<18x18x128xf32, #tpu.memory_space<vmem>>, vector<16x16x128xf32>
    %96 = vector.shape_cast %95 : vector<16x16x128xf32> to vector<256x128xf32>
    %97 = arith.truncf %96 : vector<256x128xf32> to vector<256x128xbf16>
    %c0_117 = arith.constant 0 : index
    %c0_118 = arith.constant 0 : index
    %c0_119 = arith.constant 0 : index
    %c0_120 = arith.constant 0 : index
    %98 = vector.load %arg5[%c0_117, %c0_118, %c0_119, %c0_120] : memref<3x3x128x128xbf16, #tpu.memory_space<vmem>>, vector<1x1x128x128xbf16>
    %99 = vector.shape_cast %98 : vector<1x1x128x128xbf16> to vector<128x128xbf16>
    %cst_121 = arith.constant dense<0.000000e+00> : vector<256x128xf32>
    %100 = tpu.matmul %97, %99, %cst_121 {dimension_numbers = #tpu.dot_dimension_numbers<[1], [0], [0], [1], [0, 0, 1, 1], [], []>} : vector<256x128xbf16>, vector<128x128xbf16>, vector<256x128xf32> -> vector<256x128xf32>
    %c0_122 = arith.constant 0 : index
    %c1_123 = arith.constant 1 : index
    %c0_124 = arith.constant 0 : index
    %101 = vector.load %arg11[%c0_122, %c1_123, %c0_124] : memref<18x18x128xf32, #tpu.memory_space<vmem>>, vector<16x16x128xf32>
    %102 = vector.shape_cast %101 : vector<16x16x128xf32> to vector<256x128xf32>
    %103 = arith.truncf %102 : vector<256x128xf32> to vector<256x128xbf16>
    %c0_125 = arith.constant 0 : index
    %c1_126 = arith.constant 1 : index
    %c0_127 = arith.constant 0 : index
    %c0_128 = arith.constant 0 : index
    %104 = vector.load %arg5[%c0_125, %c1_126, %c0_127, %c0_128] : memref<3x3x128x128xbf16, #tpu.memory_space<vmem>>, vector<1x1x128x128xbf16>
    %105 = vector.shape_cast %104 : vector<1x1x128x128xbf16> to vector<128x128xbf16>
    %cst_129 = arith.constant dense<0.000000e+00> : vector<256x128xf32>
    %106 = tpu.matmul %103, %105, %cst_129 {dimension_numbers = #tpu.dot_dimension_numbers<[1], [0], [0], [1], [0, 0, 1, 1], [], []>} : vector<256x128xbf16>, vector<128x128xbf16>, vector<256x128xf32> -> vector<256x128xf32>
    %107 = arith.addf %100, %106 : vector<256x128xf32>
    %c0_130 = arith.constant 0 : index
    %c2_131 = arith.constant 2 : index
    %c0_132 = arith.constant 0 : index
    %108 = vector.load %arg11[%c0_130, %c2_131, %c0_132] : memref<18x18x128xf32, #tpu.memory_space<vmem>>, vector<16x16x128xf32>
    %109 = vector.shape_cast %108 : vector<16x16x128xf32> to vector<256x128xf32>
    %110 = arith.truncf %109 : vector<256x128xf32> to vector<256x128xbf16>
    %c0_133 = arith.constant 0 : index
    %c2_134 = arith.constant 2 : index
    %c0_135 = arith.constant 0 : index
    %c0_136 = arith.constant 0 : index
    %111 = vector.load %arg5[%c0_133, %c2_134, %c0_135, %c0_136] : memref<3x3x128x128xbf16, #tpu.memory_space<vmem>>, vector<1x1x128x128xbf16>
    %112 = vector.shape_cast %111 : vector<1x1x128x128xbf16> to vector<128x128xbf16>
    %cst_137 = arith.constant dense<0.000000e+00> : vector<256x128xf32>
    %113 = tpu.matmul %110, %112, %cst_137 {dimension_numbers = #tpu.dot_dimension_numbers<[1], [0], [0], [1], [0, 0, 1, 1], [], []>} : vector<256x128xbf16>, vector<128x128xbf16>, vector<256x128xf32> -> vector<256x128xf32>
    %114 = arith.addf %107, %113 : vector<256x128xf32>
    %c1_138 = arith.constant 1 : index
    %c0_139 = arith.constant 0 : index
    %c0_140 = arith.constant 0 : index
    %115 = vector.load %arg11[%c1_138, %c0_139, %c0_140] : memref<18x18x128xf32, #tpu.memory_space<vmem>>, vector<16x16x128xf32>
    %116 = vector.shape_cast %115 : vector<16x16x128xf32> to vector<256x128xf32>
    %117 = arith.truncf %116 : vector<256x128xf32> to vector<256x128xbf16>
    %c1_141 = arith.constant 1 : index
    %c0_142 = arith.constant 0 : index
    %c0_143 = arith.constant 0 : index
    %c0_144 = arith.constant 0 : index
    %118 = vector.load %arg5[%c1_141, %c0_142, %c0_143, %c0_144] : memref<3x3x128x128xbf16, #tpu.memory_space<vmem>>, vector<1x1x128x128xbf16>
    %119 = vector.shape_cast %118 : vector<1x1x128x128xbf16> to vector<128x128xbf16>
    %cst_145 = arith.constant dense<0.000000e+00> : vector<256x128xf32>
    %120 = tpu.matmul %117, %119, %cst_145 {dimension_numbers = #tpu.dot_dimension_numbers<[1], [0], [0], [1], [0, 0, 1, 1], [], []>} : vector<256x128xbf16>, vector<128x128xbf16>, vector<256x128xf32> -> vector<256x128xf32>
    %121 = arith.addf %114, %120 : vector<256x128xf32>
    %c1_146 = arith.constant 1 : index
    %c1_147 = arith.constant 1 : index
    %c0_148 = arith.constant 0 : index
    %122 = vector.load %arg11[%c1_146, %c1_147, %c0_148] : memref<18x18x128xf32, #tpu.memory_space<vmem>>, vector<16x16x128xf32>
    %123 = vector.shape_cast %122 : vector<16x16x128xf32> to vector<256x128xf32>
    %124 = arith.truncf %123 : vector<256x128xf32> to vector<256x128xbf16>
    %c1_149 = arith.constant 1 : index
    %c1_150 = arith.constant 1 : index
    %c0_151 = arith.constant 0 : index
    %c0_152 = arith.constant 0 : index
    %125 = vector.load %arg5[%c1_149, %c1_150, %c0_151, %c0_152] : memref<3x3x128x128xbf16, #tpu.memory_space<vmem>>, vector<1x1x128x128xbf16>
    %126 = vector.shape_cast %125 : vector<1x1x128x128xbf16> to vector<128x128xbf16>
    %cst_153 = arith.constant dense<0.000000e+00> : vector<256x128xf32>
    %127 = tpu.matmul %124, %126, %cst_153 {dimension_numbers = #tpu.dot_dimension_numbers<[1], [0], [0], [1], [0, 0, 1, 1], [], []>} : vector<256x128xbf16>, vector<128x128xbf16>, vector<256x128xf32> -> vector<256x128xf32>
    %128 = arith.addf %121, %127 : vector<256x128xf32>
    %c1_154 = arith.constant 1 : index
    %c2_155 = arith.constant 2 : index
    %c0_156 = arith.constant 0 : index
    %129 = vector.load %arg11[%c1_154, %c2_155, %c0_156] : memref<18x18x128xf32, #tpu.memory_space<vmem>>, vector<16x16x128xf32>
    %130 = vector.shape_cast %129 : vector<16x16x128xf32> to vector<256x128xf32>
    %131 = arith.truncf %130 : vector<256x128xf32> to vector<256x128xbf16>
    %c1_157 = arith.constant 1 : index
    %c2_158 = arith.constant 2 : index
    %c0_159 = arith.constant 0 : index
    %c0_160 = arith.constant 0 : index
    %132 = vector.load %arg5[%c1_157, %c2_158, %c0_159, %c0_160] : memref<3x3x128x128xbf16, #tpu.memory_space<vmem>>, vector<1x1x128x128xbf16>
    %133 = vector.shape_cast %132 : vector<1x1x128x128xbf16> to vector<128x128xbf16>
    %cst_161 = arith.constant dense<0.000000e+00> : vector<256x128xf32>
    %134 = tpu.matmul %131, %133, %cst_161 {dimension_numbers = #tpu.dot_dimension_numbers<[1], [0], [0], [1], [0, 0, 1, 1], [], []>} : vector<256x128xbf16>, vector<128x128xbf16>, vector<256x128xf32> -> vector<256x128xf32>
    %135 = arith.addf %128, %134 : vector<256x128xf32>
    %c2_162 = arith.constant 2 : index
    %c0_163 = arith.constant 0 : index
    %c0_164 = arith.constant 0 : index
    %136 = vector.load %arg11[%c2_162, %c0_163, %c0_164] : memref<18x18x128xf32, #tpu.memory_space<vmem>>, vector<16x16x128xf32>
    %137 = vector.shape_cast %136 : vector<16x16x128xf32> to vector<256x128xf32>
    %138 = arith.truncf %137 : vector<256x128xf32> to vector<256x128xbf16>
    %c2_165 = arith.constant 2 : index
    %c0_166 = arith.constant 0 : index
    %c0_167 = arith.constant 0 : index
    %c0_168 = arith.constant 0 : index
    %139 = vector.load %arg5[%c2_165, %c0_166, %c0_167, %c0_168] : memref<3x3x128x128xbf16, #tpu.memory_space<vmem>>, vector<1x1x128x128xbf16>
    %140 = vector.shape_cast %139 : vector<1x1x128x128xbf16> to vector<128x128xbf16>
    %cst_169 = arith.constant dense<0.000000e+00> : vector<256x128xf32>
    %141 = tpu.matmul %138, %140, %cst_169 {dimension_numbers = #tpu.dot_dimension_numbers<[1], [0], [0], [1], [0, 0, 1, 1], [], []>} : vector<256x128xbf16>, vector<128x128xbf16>, vector<256x128xf32> -> vector<256x128xf32>
    %142 = arith.addf %135, %141 : vector<256x128xf32>
    %c2_170 = arith.constant 2 : index
    %c1_171 = arith.constant 1 : index
    %c0_172 = arith.constant 0 : index
    %143 = vector.load %arg11[%c2_170, %c1_171, %c0_172] : memref<18x18x128xf32, #tpu.memory_space<vmem>>, vector<16x16x128xf32>
    %144 = vector.shape_cast %143 : vector<16x16x128xf32> to vector<256x128xf32>
    %145 = arith.truncf %144 : vector<256x128xf32> to vector<256x128xbf16>
    %c2_173 = arith.constant 2 : index
    %c1_174 = arith.constant 1 : index
    %c0_175 = arith.constant 0 : index
    %c0_176 = arith.constant 0 : index
    %146 = vector.load %arg5[%c2_173, %c1_174, %c0_175, %c0_176] : memref<3x3x128x128xbf16, #tpu.memory_space<vmem>>, vector<1x1x128x128xbf16>
    %147 = vector.shape_cast %146 : vector<1x1x128x128xbf16> to vector<128x128xbf16>
    %cst_177 = arith.constant dense<0.000000e+00> : vector<256x128xf32>
    %148 = tpu.matmul %145, %147, %cst_177 {dimension_numbers = #tpu.dot_dimension_numbers<[1], [0], [0], [1], [0, 0, 1, 1], [], []>} : vector<256x128xbf16>, vector<128x128xbf16>, vector<256x128xf32> -> vector<256x128xf32>
    %149 = arith.addf %142, %148 : vector<256x128xf32>
    %c2_178 = arith.constant 2 : index
    %c2_179 = arith.constant 2 : index
    %c0_180 = arith.constant 0 : index
    %150 = vector.load %arg11[%c2_178, %c2_179, %c0_180] : memref<18x18x128xf32, #tpu.memory_space<vmem>>, vector<16x16x128xf32>
    %151 = vector.shape_cast %150 : vector<16x16x128xf32> to vector<256x128xf32>
    %152 = arith.truncf %151 : vector<256x128xf32> to vector<256x128xbf16>
    %c2_181 = arith.constant 2 : index
    %c2_182 = arith.constant 2 : index
    %c0_183 = arith.constant 0 : index
    %c0_184 = arith.constant 0 : index
    %153 = vector.load %arg5[%c2_181, %c2_182, %c0_183, %c0_184] : memref<3x3x128x128xbf16, #tpu.memory_space<vmem>>, vector<1x1x128x128xbf16>
    %154 = vector.shape_cast %153 : vector<1x1x128x128xbf16> to vector<128x128xbf16>
    %cst_185 = arith.constant dense<0.000000e+00> : vector<256x128xf32>
    %155 = tpu.matmul %152, %154, %cst_185 {dimension_numbers = #tpu.dot_dimension_numbers<[1], [0], [0], [1], [0, 0, 1, 1], [], []>} : vector<256x128xbf16>, vector<128x128xbf16>, vector<256x128xf32> -> vector<256x128xf32>
    %156 = arith.addf %149, %155 : vector<256x128xf32>
    %c0_186 = arith.constant 0 : index
    %c0_187 = arith.constant 0 : index
    %157 = vector.load %arg6[%c0_186, %c0_187] : memref<1x128xf32, #tpu.memory_space<vmem>>, vector<1x128xf32>
    %158 = vector.shape_cast %157 : vector<1x128xf32> to vector<128xf32>
    %159 = vector.shape_cast %158 : vector<128xf32> to vector<1x128xf32>
    %160 = vector.broadcast %159 : vector<1x128xf32> to vector<256x128xf32>
    %161 = arith.mulf %156, %160 : vector<256x128xf32>
    %c0_188 = arith.constant 0 : index
    %c0_189 = arith.constant 0 : index
    %162 = vector.load %arg7[%c0_188, %c0_189] : memref<1x128xf32, #tpu.memory_space<vmem>>, vector<1x128xf32>
    %163 = vector.shape_cast %162 : vector<1x128xf32> to vector<128xf32>
    %164 = vector.shape_cast %163 : vector<128xf32> to vector<1x128xf32>
    %165 = vector.broadcast %164 : vector<1x128xf32> to vector<256x128xf32>
    %166 = arith.addf %161, %165 : vector<256x128xf32>
    %cst_190 = arith.constant 0.000000e+00 : f32
    %167 = vector.broadcast %cst_190 : f32 to vector<256x128xf32>
    %168 = arith.maximumf %166, %167 : vector<256x128xf32>
    %169 = vector.shape_cast %168 : vector<256x128xf32> to vector<16x16x128xf32>
    %c0_191 = arith.constant 0 : index
    %c0_192 = arith.constant 0 : index
    %c0_193 = arith.constant 0 : index
    %c0_194 = arith.constant 0 : index
    %170 = vector.load %arg9[%c0_191, %c0_192, %c0_193, %c0_194] : memref<1x16x16x128xf32, #tpu.memory_space<vmem>>, vector<1x16x16x128xf32>
    %171 = vector.shape_cast %170 : vector<1x16x16x128xf32> to vector<16x16x128xf32>
    %172 = vector.shape_cast %169 : vector<16x16x128xf32> to vector<1x16x16x128xf32>
    tpu.vector_store %arg9[%c0_191, %c0_192, %c0_193, %c0_194], %172 {strides = array<i32>} : memref<1x16x16x128xf32, #tpu.memory_space<vmem>>, vector<1x16x16x128xf32>,
    %173 = vector.shape_cast %169 : vector<16x16x128xf32> to vector<8x2x16x128xf32>
    %174 = vector.extract_strided_slice %173 {offsets = [0, 0, 0, 0], sizes = [8, 1, 16, 128], strides = [1, 1, 1, 1]} : vector<8x2x16x128xf32> to vector<8x1x16x128xf32>
    %175 = vector.shape_cast %174 : vector<8x1x16x128xf32> to vector<8x16x128xf32>
    %176 = vector.extract_strided_slice %173 {offsets = [0, 1, 0, 0], sizes = [8, 1, 16, 128], strides = [1, 1, 1, 1]} : vector<8x2x16x128xf32> to vector<8x1x16x128xf32>
    %177 = vector.shape_cast %176 : vector<8x1x16x128xf32> to vector<8x16x128xf32>
    %178 = arith.maximumf %175, %177 : vector<8x16x128xf32>
    %c0_195 = arith.constant 0 : index
    %c0_196 = arith.constant 0 : index
    %c0_197 = arith.constant 0 : index
    %179 = vector.load %arg12[%c0_195, %c0_196, %c0_197] : memref<8x16x128xf32, #tpu.memory_space<vmem>>, vector<8x16x128xf32>
    tpu.vector_store %arg12[%c0_195, %c0_196, %c0_197], %178 {strides = array<i32>} : memref<8x16x128xf32, #tpu.memory_space<vmem>>, vector<8x16x128xf32>,
    %c0_198 = arith.constant 0 : index
    %c0_199 = arith.constant 0 : index
    %c0_200 = arith.constant 0 : index
    %180 = tpu.strided_load %arg12[%c0_198, %c0_199, %c0_200] {strides = array<i32: 1, 2, 1>} : memref<8x16x128xf32, #tpu.memory_space<vmem>>, vector<8x8x128xf32>
    %c0_201 = arith.constant 0 : index
    %c1_202 = arith.constant 1 : index
    %c0_203 = arith.constant 0 : index
    %181 = tpu.strided_load %arg12[%c0_201, %c1_202, %c0_203] {strides = array<i32: 1, 2, 1>} : memref<8x16x128xf32, #tpu.memory_space<vmem>>, vector<8x8x128xf32>
    %182 = arith.maximumf %180, %181 : vector<8x8x128xf32>
    %c0_204 = arith.constant 0 : index
    %c0_205 = arith.constant 0 : index
    %c0_206 = arith.constant 0 : index
    %c0_207 = arith.constant 0 : index
    %183 = vector.load %arg8[%c0_204, %c0_205, %c0_206, %c0_207] : memref<1x8x8x128xf32, #tpu.memory_space<vmem>>, vector<1x8x8x128xf32>
    %184 = vector.shape_cast %183 : vector<1x8x8x128xf32> to vector<8x8x128xf32>
    %185 = vector.shape_cast %182 : vector<8x8x128xf32> to vector<1x8x8x128xf32>
    tpu.vector_store %arg8[%c0_204, %c0_205, %c0_206, %c0_207], %185 {strides = array<i32>} : memref<1x8x8x128xf32, #tpu.memory_space<vmem>>, vector<1x8x8x128xf32>,
    return
  }
  func.func @transform_0(%arg0: i32) -> (i32, i32, i32, i32) {
    %c0_i32 = arith.constant 0 : i32
    %c0_i32_0 = arith.constant 0 : i32
    %c0_i32_1 = arith.constant 0 : i32
    %c0_i32_2 = arith.constant 0 : i32
    return %arg0, %c0_i32, %c0_i32_0, %c0_i32_1 : i32, i32, i32, i32
  }
  func.func @transform_1(%arg0: i32) -> (i32, i32, i32, i32) {
    %c0_i32 = arith.constant 0 : i32
    %c0_i32_0 = arith.constant 0 : i32
    %c0_i32_1 = arith.constant 0 : i32
    %c0_i32_2 = arith.constant 0 : i32
    %c0_i32_3 = arith.constant 0 : i32
    return %c0_i32, %c0_i32_0, %c0_i32_1, %c0_i32_2 : i32, i32, i32, i32
  }
  func.func @transform_2(%arg0: i32) -> (i32, i32) {
    %c0_i32 = arith.constant 0 : i32
    %c0_i32_0 = arith.constant 0 : i32
    %c0_i32_1 = arith.constant 0 : i32
    return %c0_i32, %c0_i32_0 : i32, i32
  }
  func.func @transform_3(%arg0: i32) -> (i32, i32) {
    %c0_i32 = arith.constant 0 : i32
    %c0_i32_0 = arith.constant 0 : i32
    %c0_i32_1 = arith.constant 0 : i32
    return %c0_i32, %c0_i32_0 : i32, i32
  }
  func.func @transform_4(%arg0: i32) -> (i32, i32, i32, i32) {
    %c0_i32 = arith.constant 0 : i32
    %c0_i32_0 = arith.constant 0 : i32
    %c0_i32_1 = arith.constant 0 : i32
    %c0_i32_2 = arith.constant 0 : i32
    %c0_i32_3 = arith.constant 0 : i32
    return %c0_i32, %c0_i32_0, %c0_i32_1, %c0_i32_2 : i32, i32, i32, i32
  }
  func.func @transform_5(%arg0: i32) -> (i32, i32) {
    %c0_i32 = arith.constant 0 : i32
    %c0_i32_0 = arith.constant 0 : i32
    %c0_i32_1 = arith.constant 0 : i32
    return %c0_i32, %c0_i32_0 : i32, i32
  }
  func.func @transform_6(%arg0: i32) -> (i32, i32) {
    %c0_i32 = arith.constant 0 : i32
    %c0_i32_0 = arith.constant 0 : i32
    %c0_i32_1 = arith.constant 0 : i32
    return %c0_i32, %c0_i32_0 : i32, i32
  }
  func.func @transform_7(%arg0: i32) -> (i32, i32, i32, i32) {
    %c0_i32 = arith.constant 0 : i32
    %c0_i32_0 = arith.constant 0 : i32
    %c0_i32_1 = arith.constant 0 : i32
    %c0_i32_2 = arith.constant 0 : i32
    return %arg0, %c0_i32, %c0_i32_0, %c0_i32_1 : i32, i32, i32, i32
  }
  func.func @transform_8(%arg0: i32) -> (i32, i32, i32, i32) {
    %c0_i32 = arith.constant 0 : i32
    %c0_i32_0 = arith.constant 0 : i32
    %c0_i32_1 = arith.constant 0 : i32
    %c0_i32_2 = arith.constant 0 : i32
    return %arg0, %c0_i32, %c0_i32_0, %c0_i32_1 : i32, i32, i32, i32
  }
}

</mosaic_0001>

<bundles_post_ra>
// kernel: tpu_custom_call.1
= control target key start
LH: loop header
LB: loop body
LE: loop exit
PB: predicated region body
PF: predicated region fallthrough
CT: control target
= control target key end

     0   :  { %14 = vsyncpa [#allocation6], 0  ;;  %s9930_s0 = inlined_call_operand.vmem [shape: f32[2,16,16,4], index: 0, kind: input, shape index: {}]   ;;  %s9931_s1 = inlined_call_operand.vmem [shape: bf16[3,3,4,128], index: 1, kind: input, shape index: {}]   ;;  %s9932_s2 = inlined_call_operand.vmem [shape: f32[1,128], index: 2, kind: input, shape index: {}]   ;;  %s9933_s3 = inlined_call_operand.vmem [shape: f32[1,128], index: 3, kind: input, shape index: {}]   ;;  %s9934_s4 = inlined_call_operand.vmem [shape: bf16[3,3,128,128], index: 4, kind: input, shape index: {}]   ;;  %s9935_s5 = inlined_call_operand.vmem [shape: f32[1,128], index: 5, kind: input, shape index: {}]   ;;  %s9936_s6 = inlined_call_operand.vmem [shape: f32[1,128], index: 6, kind: input, shape index: {}]   ;;  %s9937_s7 = inlined_call_operand.hbm [shape: f32[2,8,8,128], index: 7, kind: output, shape index: {0}]   ;;  %s9938_s8 = inlined_call_operand.hbm [shape: f32[2,16,16,128], index: 8, kind: output, shape index: {1}]  }
   0x1   :  { %16 = vsyncpa [#allocation6 + $0x1], 0 }
   0x2   :  { %17 = vsyncpa [#allocation8], 0 }
   0x3   :  { %19 = vsyncpa [#allocation8 + $0x1], 0  ;;  %s8521_s27 = smov 0   ;;  %s8523_s28 = smov 0  }
   0x4   :  { %s8525_s29 = smov 0   ;;  %s8527_s30 = smov 0  }
   0x5 LB: > { %s8542_s9 = sadd.s32 4294967295, %s8469_s30   ;;  %s6236_s10 = sadd.s32 4294967294, %s8469_s30   ;;  %s8469_s30 = sphi %s8527_s30, %s9944_s30   ;;  %s8465_s29 = sphi %s8525_s29, %s9943_s29   ;;  %s8461_s28 = sphi %s8523_s28, %s9942_s28   ;;  %s8457_s27 = sphi %s8521_s27, %s9941_s27  }
   0x6   : > { %s8546_s11 = sadd.s32 1, %s8469_s30   ;;  %s184_s12 = sadd.s32 1, %s8465_s29 }
   0x7   : > { %s181_s13 = ssub.s32 %s8469_s30, %s8546_s11  ;;  %p194_p0 = scmp.ne.s32.totalorder %s8465_s29, %s8461_s28 }
   0x8   : > { %p182_p1 = scmp.eq.s32.totalorder %s181_s13, 0  ;;  %p195_p2 = scmp.eq.s32.totalorder %s8542_s9, 1 }
   0x9   : > { %p200_p3 = scmp.ne.s32.totalorder %s8461_s28, %s8457_s27  ;;  %p201_p4 = scmp.eq.s32.totalorder %s6236_s10, 1 }
   0xa   : > { %s8557_s14 = scalar_select %p182_p1, %s8465_s29, %s184_s12  }
   0xb   : > { %p8559_p5 = por %p195_p2, %p194_p0  ;;  %p8563_p6 = por %p201_p4, %p200_p3 }
   0xc   : > { %p6239_p7 = scmp.ge.s32.totalorder %s8469_s30, 1  ;;  %p271_p8 = scmp.lt.s32.totalorder %s8469_s30, 3 }
   0xe   : > { %p272_p9 = pnand %p6239_p7, %p271_p8 }
   0xf   : > { %v6244_v0 = vld [vmem:[%s9931_s1 + $0x2] sm:$0x3] (!%p272_p9)  ;;  %vm617_vm0 = vcmask (!%p272_p9), 1041408   ;;  %vm316_vm1 = vcmask (!%p272_p9), 31744   ;;  %vm319_vm2 = vcmask (!%p272_p9), 25600   ;;  %v8471_v2 = vmov (!%p272_p9), 0.0  }
  0x10   : > { %275 = sbr.rel (%p272_p9) target bundleno = 1632 (0x660), region = 48  ;;  %8246 = vmatprep.subr.msk.bf16.mxu0 (!%p272_p9), %vm617_vm0, %v6244_v0  ;;  %v619_v1 = vsel (!%p272_p9), %vm617_vm0, %v6244_v0, 0  ;;  %317 = vst.msk [vmem:[#allocation2] sm:$0xff] (!%p272_p9), %vm316_vm1, %v8471_v2  ;;  %318 = vst.msk [vmem:[#allocation2 + $0x8] sm:$0xff] (!%p272_p9), %vm316_vm1, %v8471_v2  ;;  %vm325_vm3 = vcmask (!%p272_p9), 24576   ;;  %p310_p10 = scmp.lt.s32.totalorder (!%p272_p9), %s8542_s9, 1 }
  0x11   : > { %320 = vst.msk [vmem:[#allocation2 + $0x10] sm:$0x3] (!%p272_p9), %vm319_vm2, %v8471_v2  ;;  %324 = vst.msk [vmem:[#allocation2 + $0x1a8] sm:$0x3] (!%p272_p9), %vm319_vm2, %v8471_v2  ;;  %v8625_v3 = vld [vmem:[%s9931_s1] sm:$0x3] (!%p272_p9)  ;;  %6981 = vmatpush3.bf16.msra.mxu0 (!%p272_p9), %v619_v1 }
  0x12   : > { %322 = vst.msk [vmem:[#allocation2 + $0x198] sm:$0xff] (!%p272_p9), %vm316_vm1, %v8471_v2  ;;  %323 = vst.msk [vmem:[#allocation2 + $0x1a0] sm:$0xff] (!%p272_p9), %vm316_vm1, %v8471_v2  ;;  %8247 = vmatprep.subr.msk.bf16.mxu0 (!%p272_p9), %vm617_vm0, %v8625_v3  ;;  %v831_v33 = vsel (!%p272_p9), %vm617_vm0, %v8625_v3, 0  ;;  %v8772_v38 = vld [vmem:[%s9931_s1 + $0x4] sm:$0x3] (!%p272_p9)  ;;  %s9715_s19 = sand.u32 (!%p272_p9), 1, %s8461_s28  }
  0x13   : > { %362 = vst [vmem:[#allocation3] sm:$0xff] (!%p272_p9), %v8471_v2  ;;  %363 = vst [vmem:[#allocation3 + $0x8] sm:$0xff] (!%p272_p9), %v8471_v2  ;;  %s6241_s24 = sshll.u32 (!%p272_p9), %s9715_s19, 8  ;;  %s6240_s26 = sshll.u32 (!%p272_p9), %s9715_s19, 6 }
  0x14   : > { %364 = vst [vmem:[#allocation3 + $0x10] sm:$0x3] (!%p272_p9), %v8471_v2  ;;  %366 = vst [vmem:[#allocation3 + $0x198] sm:$0xff] (!%p272_p9), %v8471_v2  ;;  %s9768_s10 = scalar_lea.vmem (!%p272_p9), [#allocation5], %s6240_s26  ;;  %s6610_s12 = sshll.u32 (!%p272_p9), %s8542_s9, 12 }
  0x15   : > { %367 = vst [vmem:[#allocation3 + $0x1a0] sm:$0xff] (!%p272_p9), %v8471_v2  ;;  %368 = vst [vmem:[#allocation3 + $0x1a8] sm:$0x3] (!%p272_p9), %v8471_v2  ;;  %s9842_s20 = scalar_lea.hbm (!%p272_p9), %s9938_s8, %s6610_s12  ;;  %s8472_s23 = smov (!%p272_p9), [#allocation7]  }
  0x16   : > { %370 = vst [vmem:[#allocation3 + $0x18] sm:$0x1] (!%p272_p9), %v8471_v2  ;;  %371 = vst [vmem:[#allocation3 + $0x30] sm:$0x1] (!%p272_p9), %v8471_v2 }
  0x17   : > { %372 = vst [vmem:[#allocation3 + $0x48] sm:$0x1] %v8471_v2  ;;  %373 = vst [vmem:[#allocation3 + $0x60] sm:$0x1] %v8471_v2  ;;  %s311_s21 = scalar_select %p310_p10, %s8542_s9, 1  ;;  %v519_v7 = vld [vmem:[#allocation2 + $0x1] sm:$0xff] }
  0x18   : > { %374 = vst [vmem:[#allocation3 + $0x78] sm:$0x1] %v8471_v2  ;;  %375 = vst [vmem:[#allocation3 + $0x90] sm:$0x1] %v8471_v2  ;;  %v520_v8 = vld [vmem:[#allocation2 + $0x9] sm:$0xff] }
  0x19   : > { %376 = vst [vmem:[#allocation3 + $0xa8] sm:$0x1] %v8471_v2  ;;  %377 = vst [vmem:[#allocation3 + $0xc0] sm:$0x1] %v8471_v2  ;;  %s6608_s22 = sshll.u32 %s311_s21, 8  ;;  %v551_v10 = vpack.c.bf16 %v520_v8, %v519_v7  ;;  %s6113_s21 = scalar_lea.sflag [#allocation8], %s9715_s19 }
  0x1a   : > { %378 = vst [vmem:[#allocation3 + $0xd8] sm:$0x1] %v8471_v2  ;;  %379 = vst [vmem:[#allocation3 + $0xf0] sm:$0x1] %v8471_v2  ;;  %s8712_s25 = scalar_lea.vmem %s9930_s0, %s6608_s22 }
  0x1b   : > { %380 = vst [vmem:[#allocation3 + $0x108] sm:$0x1] %v8471_v2  ;;  %381 = vst [vmem:[#allocation3 + $0x120] sm:$0x1] %v8471_v2  ;;  %v405_v4 = vld [vmem:[%s8712_s25] sm:$0xff]  ;;  %v406_v5 = vld [vmem:[%s8712_s25 + $0x8] sm:$0xff]  ;;  %6982 = vmatprep.mubr.msk.bf16.mxu0 %vm316_vm1, %v551_v10 }
  0x1c   : > { %382 = vst [vmem:[#allocation3 + $0x138] sm:$0x1] %v8471_v2  ;;  %383 = vst [vmem:[#allocation3 + $0x150] sm:$0x1] %v8471_v2  ;;  %v407_v6 = vld [vmem:[%s8712_s25 + $0x10] sm:$0xff]  ;;  %v408_v9 = vld [vmem:[%s8712_s25 + $0x18] sm:$0xff] }
  0x1d   : > { %384 = vst [vmem:[#allocation3 + $0x168] sm:$0x1] %v8471_v2  ;;  %385 = vst [vmem:[#allocation3 + $0x180] sm:$0x1] %v8471_v2  ;;  %v409_v11 = vld [vmem:[%s8712_s25 + $0x20] sm:$0xff]  ;;  %v410_v12 = vld [vmem:[%s8712_s25 + $0x28] sm:$0xff] }
  0x1e   : > { %388 = vst [vmem:[#allocation3 + $0x29] sm:$0x1] %v8471_v2  ;;  %389 = vst [vmem:[#allocation3 + $0x41] sm:$0x1] %v8471_v2  ;;  %v411_v13 = vld [vmem:[%s8712_s25 + $0x30] sm:$0xff]  ;;  %v412_v14 = vld [vmem:[%s8712_s25 + $0x38] sm:$0xff] }
  0x1f   : > { %390 = vst [vmem:[#allocation3 + $0x59] sm:$0x1] %v8471_v2  ;;  %391 = vst [vmem:[#allocation3 + $0x71] sm:$0x1] %v8471_v2  ;;  %v413_v15 = vld [vmem:[%s8712_s25 + $0x40] sm:$0xff]  ;;  %v414_v16 = vld [vmem:[%s8712_s25 + $0x48] sm:$0xff] }
  0x20   : > { %392 = vst [vmem:[#allocation3 + $0x89] sm:$0x1] %v8471_v2  ;;  %393 = vst [vmem:[#allocation3 + $0xa1] sm:$0x1] %v8471_v2  ;;  %v415_v17 = vld [vmem:[%s8712_s25 + $0x50] sm:$0xff]  ;;  %v416_v18 = vld [vmem:[%s8712_s25 + $0x58] sm:$0xff] }
  0x21   : > { %394 = vst [vmem:[#allocation3 + $0xb9] sm:$0x1] %v8471_v2  ;;  %395 = vst [vmem:[#allocation3 + $0xd1] sm:$0x1] %v8471_v2  ;;  %v417_v19 = vld [vmem:[%s8712_s25 + $0x60] sm:$0xff]  ;;  %v418_v20 = vld [vmem:[%s8712_s25 + $0x68] sm:$0xff] }
  0x22   : > { %396 = vst [vmem:[#allocation3 + $0xe9] sm:$0x1] %v8471_v2  ;;  %397 = vst [vmem:[#allocation3 + $0x101] sm:$0x1] %v8471_v2  ;;  %v419_v21 = vld [vmem:[%s8712_s25 + $0x70] sm:$0xff]  ;;  %v420_v22 = vld [vmem:[%s8712_s25 + $0x78] sm:$0xff] }
  0x23   : > { %398 = vst [vmem:[#allocation3 + $0x119] sm:$0x1] %v8471_v2  ;;  %399 = vst [vmem:[#allocation3 + $0x131] sm:$0x1] %v8471_v2  ;;  %v421_v23 = vld [vmem:[%s8712_s25 + $0x80] sm:$0xff]  ;;  %v422_v24 = vld [vmem:[%s8712_s25 + $0x88] sm:$0xff] }
  0x24   : > { %400 = vst [vmem:[#allocation3 + $0x149] sm:$0x1] %v8471_v2  ;;  %401 = vst [vmem:[#allocation3 + $0x161] sm:$0x1] %v8471_v2  ;;  %v423_v25 = vld [vmem:[%s8712_s25 + $0x90] sm:$0xff]  ;;  %v424_v26 = vld [vmem:[%s8712_s25 + $0x98] sm:$0xff] }
  0x25   : > { %402 = vst [vmem:[#allocation3 + $0x179] sm:$0x1] %v8471_v2  ;;  %403 = vst [vmem:[#allocation3 + $0x191] sm:$0x1] %v8471_v2  ;;  %v425_v27 = vld [vmem:[%s8712_s25 + $0xa0] sm:$0xff]  ;;  %v426_v28 = vld [vmem:[%s8712_s25 + $0xa8] sm:$0xff] }
  0x26   : > { %326 = vst.msk [vmem:[#allocation2] sm:$0x1] %vm325_vm3, %v8471_v2  ;;  %344 = vst.msk [vmem:[#allocation2 + $0x11] sm:$0x1] %vm325_vm3, %v8471_v2  ;;  %v427_v35 = vld [vmem:[%s8712_s25 + $0xb0] sm:$0xff]  ;;  %v428_v36 = vld [vmem:[%s8712_s25 + $0xb8] sm:$0xff] }
  0x27   : > { %361 = vst.msk [vmem:[#allocation2 + $0x1a9] sm:$0x1] %vm325_vm3, %v8471_v2  ;;  %327 = vst.msk [vmem:[#allocation2 + $0x18] sm:$0x1] %vm325_vm3, %v8471_v2  ;;  %v429_v45 = vld [vmem:[%s8712_s25 + $0xc0] sm:$0xff]  ;;  %v430_v46 = vld [vmem:[%s8712_s25 + $0xc8] sm:$0xff] }
  0x28   : > { %328 = vst.msk [vmem:[#allocation2 + $0x30] sm:$0x1] %vm325_vm3, %v8471_v2  ;;  %329 = vst.msk [vmem:[#allocation2 + $0x48] sm:$0x1] %vm325_vm3, %v8471_v2  ;;  %v431_v47 = vld [vmem:[%s8712_s25 + $0xd0] sm:$0xff]  ;;  %v432_v48 = vld [vmem:[%s8712_s25 + $0xd8] sm:$0xff] }
  0x29   : > { %330 = vst.msk [vmem:[#allocation2 + $0x60] sm:$0x1] %vm325_vm3, %v8471_v2  ;;  %331 = vst.msk [vmem:[#allocation2 + $0x78] sm:$0x1] %vm325_vm3, %v8471_v2  ;;  %v433_v49 = vld [vmem:[%s8712_s25 + $0xe0] sm:$0xff]  ;;  %v434_v50 = vld [vmem:[%s8712_s25 + $0xe8] sm:$0xff] }
  0x2a   : > { %332 = vst.msk [vmem:[#allocation2 + $0x90] sm:$0x1] %vm325_vm3, %v8471_v2  ;;  %333 = vst.msk [vmem:[#allocation2 + $0xa8] sm:$0x1] %vm325_vm3, %v8471_v2 }
  0x2b   : > { %334 = vst.msk [vmem:[#allocation2 + $0xc0] sm:$0x1] %vm325_vm3, %v8471_v2  ;;  %335 = vst.msk [vmem:[#allocation2 + $0xd8] sm:$0x1] %vm325_vm3, %v8471_v2 }
  0x2c   : > { %336 = vst.msk [vmem:[#allocation2 + $0xf0] sm:$0x1] %vm325_vm3, %v8471_v2  ;;  %337 = vst.msk [vmem:[#allocation2 + $0x108] sm:$0x1] %vm325_vm3, %v8471_v2 }
  0x2d   : > { %338 = vst.msk [vmem:[#allocation2 + $0x120] sm:$0x1] %vm325_vm3, %v8471_v2  ;;  %339 = vst.msk [vmem:[#allocation2 + $0x138] sm:$0x1] %vm325_vm3, %v8471_v2 }
  0x2e   : > { %340 = vst.msk [vmem:[#allocation2 + $0x150] sm:$0x1] %vm325_vm3, %v8471_v2  ;;  %341 = vst.msk [vmem:[#allocation2 + $0x168] sm:$0x1] %vm325_vm3, %v8471_v2 }
  0x2f   : > { %342 = vst.msk [vmem:[#allocation2 + $0x180] sm:$0x1] %vm325_vm3, %v8471_v2  ;;  %345 = vst.msk [vmem:[#allocation2 + $0x29] sm:$0x1] %vm325_vm3, %v8471_v2 }
  0x30   : > { %346 = vst.msk [vmem:[#allocation2 + $0x41] sm:$0x1] %vm325_vm3, %v8471_v2  ;;  %347 = vst.msk [vmem:[#allocation2 + $0x59] sm:$0x1] %vm325_vm3, %v8471_v2 }
  0x31   : > { %348 = vst.msk [vmem:[#allocation2 + $0x71] sm:$0x1] %vm325_vm3, %v8471_v2  ;;  %349 = vst.msk [vmem:[#allocation2 + $0x89] sm:$0x1] %vm325_vm3, %v8471_v2 }
  0x32   : > { %350 = vst.msk [vmem:[#allocation2 + $0xa1] sm:$0x1] %vm325_vm3, %v8471_v2  ;;  %351 = vst.msk [vmem:[#allocation2 + $0xb9] sm:$0x1] %vm325_vm3, %v8471_v2 }
  0x33   : > { %352 = vst.msk [vmem:[#allocation2 + $0xd1] sm:$0x1] %vm325_vm3, %v8471_v2  ;;  %353 = vst.msk [vmem:[#allocation2 + $0xe9] sm:$0x1] %vm325_vm3, %v8471_v2 }
  0x34   : > { %354 = vst.msk [vmem:[#allocation2 + $0x101] sm:$0x1] %vm325_vm3, %v8471_v2  ;;  %355 = vst.msk [vmem:[#allocation2 + $0x119] sm:$0x1] %vm325_vm3, %v8471_v2 }
  0x35   : > { %356 = vst.msk [vmem:[#allocation2 + $0x131] sm:$0x1] %vm325_vm3, %v8471_v2  ;;  %357 = vst.msk [vmem:[#allocation2 + $0x149] sm:$0x1] %vm325_vm3, %v8471_v2 }
  0x36   : > { %358 = vst.msk [vmem:[#allocation2 + $0x161] sm:$0x1] %vm325_vm3, %v8471_v2  ;;  %359 = vst.msk [vmem:[#allocation2 + $0x179] sm:$0x1] %vm325_vm3, %v8471_v2 }
  0x37   : > { %360 = vst.msk [vmem:[#allocation2 + $0x191] sm:$0x1] %vm325_vm3, %v8471_v2  ;;  %343 = vst.msk [vmem:[#allocation2 + $0x198] sm:$0x1] %vm325_vm3, %v8471_v2 }
  0x38   : > { %369 = vst [vmem:[#allocation3] sm:$0x1] %v8471_v2  ;;  %386 = vst [vmem:[#allocation3 + $0x198] sm:$0x1] %v8471_v2 }
  0x39   : > { %387 = vst [vmem:[#allocation3 + $0x11] sm:$0x1] %v8471_v2  ;;  %404 = vst [vmem:[#allocation3 + $0x1a9] sm:$0x1] %v8471_v2 }
  0x3a   : > { %438 = vst.msk [vmem:[#allocation2 + $0x19] sm:$0xff] %vm316_vm1, %v405_v4  ;;  %439 = vst.msk [vmem:[#allocation2 + $0x21] sm:$0xff] %vm316_vm1, %v406_v5 }
  0x3b   : > { %440 = vst.msk [vmem:[#allocation2 + $0x31] sm:$0xff] %vm316_vm1, %v407_v6  ;;  %441 = vst.msk [vmem:[#allocation2 + $0x39] sm:$0xff] %vm316_vm1, %v408_v9 }
  0x3c   : > { %442 = vst.msk [vmem:[#allocation2 + $0x49] sm:$0xff] %vm316_vm1, %v409_v11  ;;  %443 = vst.msk [vmem:[#allocation2 + $0x51] sm:$0xff] %vm316_vm1, %v410_v12 }
  0x3d   : > { %444 = vst.msk [vmem:[#allocation2 + $0x61] sm:$0xff] %vm316_vm1, %v411_v13  ;;  %445 = vst.msk [vmem:[#allocation2 + $0x69] sm:$0xff] %vm316_vm1, %v412_v14 }
  0x3e   : > { %446 = vst.msk [vmem:[#allocation2 + $0x79] sm:$0xff] %vm316_vm1, %v413_v15  ;;  %447 = vst.msk [vmem:[#allocation2 + $0x81] sm:$0xff] %vm316_vm1, %v414_v16 }
  0x3f   : > { %448 = vst.msk [vmem:[#allocation2 + $0x91] sm:$0xff] %vm316_vm1, %v415_v17  ;;  %449 = vst.msk [vmem:[#allocation2 + $0x99] sm:$0xff] %vm316_vm1, %v416_v18  ;;  %v470_v17 = vld [vmem:[#allocation2] sm:$0xff]  ;;  %v471_v18 = vld [vmem:[#allocation2 + $0x8] sm:$0xff] }
  0x40   : > { %450 = vst.msk [vmem:[#allocation2 + $0xa9] sm:$0xff] %vm316_vm1, %v417_v19  ;;  %451 = vst.msk [vmem:[#allocation2 + $0xb1] sm:$0xff] %vm316_vm1, %v418_v20 }
  0x41   : > { %452 = vst.msk [vmem:[#allocation2 + $0xc1] sm:$0xff] %vm316_vm1, %v419_v21  ;;  %453 = vst.msk [vmem:[#allocation2 + $0xc9] sm:$0xff] %vm316_vm1, %v420_v22  ;;  %v521_v29 = vld [vmem:[#allocation2 + $0x19] sm:$0xff]  ;;  %v522_v30 = vld [vmem:[#allocation2 + $0x21] sm:$0xff]  ;;  %v502_v22 = vpack.c.bf16 %v471_v18, %v470_v17 }
  0x42   : > { %454 = vst.msk [vmem:[#allocation2 + $0xd9] sm:$0xff] %vm316_vm1, %v421_v23  ;;  %455 = vst.msk [vmem:[#allocation2 + $0xe1] sm:$0xff] %vm316_vm1, %v422_v24  ;;  %v523_v31 = vld [vmem:[#allocation2 + $0x31] sm:$0xff]  ;;  %v8759_v32 = vpack.c.bf16 %v522_v30, %v521_v29  ;;  %v524_v34 = vld [vmem:[#allocation2 + $0x39] sm:$0xff] }
  0x43   : > { %456 = vst.msk [vmem:[#allocation2 + $0xf1] sm:$0xff] %vm316_vm1, %v423_v25  ;;  %457 = vst.msk [vmem:[#allocation2 + $0xf9] sm:$0xff] %vm316_vm1, %v424_v26  ;;  %v8765_v37 = vpack.c.bf16 %v524_v34, %v523_v31  ;;  %v525_v39 = vld [vmem:[#allocation2 + $0x49] sm:$0xff]  ;;  %v526_v40 = vld [vmem:[#allocation2 + $0x51] sm:$0xff]  ;;  %v1093_v26 = vsel %vm617_vm0, %v8772_v38, 0 }
  0x44   : > { %458 = vst.msk [vmem:[#allocation2 + $0x109] sm:$0xff] %vm316_vm1, %v425_v27  ;;  %459 = vst.msk [vmem:[#allocation2 + $0x111] sm:$0xff] %vm316_vm1, %v426_v28  ;;  %6983 = vmatmul.mubr.msk.bf16.vlgmr.msra.gmra.mrb[0].mxu0 %vm316_vm1, %v8759_v32  ;;  %v527_v41 = vld [vmem:[#allocation2 + $0x61] sm:$0xff]  ;;  %v528_v42 = vld [vmem:[#allocation2 + $0x69] sm:$0xff]  ;;  %v8780_v43 = vpack.c.bf16 %v526_v40, %v525_v39 }
  0x45   : > { %460 = vst.msk [vmem:[#allocation2 + $0x121] sm:$0xff] %vm316_vm1, %v427_v35  ;;  %461 = vst.msk [vmem:[#allocation2 + $0x129] sm:$0xff] %vm316_vm1, %v428_v36  ;;  %7015 = vmatpush3.bf16.msra.mxu0 %v831_v33  ;;  %6986 = vmatprep.mubr.msk.bf16.mxu0 %vm316_vm1, %v8765_v37  ;;  %v8782_v44 = vpack.c.bf16 %v528_v42, %v527_v41  ;;  %v529_v51 = vld [vmem:[#allocation2 + $0x79] sm:$0xff]  ;;  %v530_v52 = vld [vmem:[#allocation2 + $0x81] sm:$0xff] }
  0x46   : > { %8248 = vmatprep.subr.msk.bf16.mxu0 %vm617_vm0, %v8772_v38  ;;  %462 = vst.msk [vmem:[#allocation2 + $0x139] sm:$0xff] %vm316_vm1, %v429_v45  ;;  %463 = vst.msk [vmem:[#allocation2 + $0x141] sm:$0xff] %vm316_vm1, %v430_v46  ;;  %v531_v53 = vld [vmem:[#allocation2 + $0x91] sm:$0xff]  ;;  %v532_v54 = vld [vmem:[#allocation2 + $0x99] sm:$0xff]  ;;  %v8800_v55 = vpack.c.bf16 %v530_v52, %v529_v51 }
  0x47   : > { %464 = vst.msk [vmem:[#allocation2 + $0x151] sm:$0xff] %vm316_vm1, %v431_v47  ;;  %465 = vst.msk [vmem:[#allocation2 + $0x159] sm:$0xff] %vm316_vm1, %v432_v48  ;;  %v8802_v56 = vpack.c.bf16 %v532_v54, %v531_v53  ;;  %v533_v57 = vld [vmem:[#allocation2 + $0xa9] sm:$0xff]  ;;  %v534_v58 = vld [vmem:[#allocation2 + $0xb1] sm:$0xff] }
  0x48   : > { %466 = vst.msk [vmem:[#allocation2 + $0x169] sm:$0xff] %vm316_vm1, %v433_v49  ;;  %467 = vst.msk [vmem:[#allocation2 + $0x171] sm:$0xff] %vm316_vm1, %v434_v50  ;;  %v535_v59 = vld [vmem:[#allocation2 + $0xc1] sm:$0xff]  ;;  %v536_v60 = vld [vmem:[#allocation2 + $0xc9] sm:$0xff]  ;;  %v8808_v61 = vpack.c.bf16 %v534_v58, %v533_v57 }
  0x49   : > { %v8810_v62 = vpack.c.bf16 %v536_v60, %v535_v59  ;;  %v537_v63 = vld [vmem:[#allocation2 + $0xd9] sm:$0xff]  ;;  %v538_v0 = vld [vmem:[#allocation2 + $0xe1] sm:$0xff]  ;;  %v474_v25 = vld [vmem:[#allocation2 + $0x30] sm:$0xff] }
  0x4a   : > { %v539_v1 = vld [vmem:[#allocation2 + $0xf1] sm:$0xff]  ;;  %v540_v2 = vld [vmem:[#allocation2 + $0xf9] sm:$0xff]  ;;  %v8816_v3 = vpack.c.bf16 %v538_v0, %v537_v63  ;;  %v8854_v30 = vld [vmem:[%s9931_s1 + $0x6] sm:$0x3] }
  0x4b   : > { %v8818_v4 = vpack.c.bf16 %v540_v2, %v539_v1  ;;  %v541_v5 = vld [vmem:[#allocation2 + $0x109] sm:$0xff]  ;;  %v542_v6 = vld [vmem:[#allocation2 + $0x111] sm:$0xff]  ;;  %v473_v24 = vld [vmem:[#allocation2 + $0x20] sm:$0xff] }
  0x4c   : > { %6987 = vmatmul.mubr.msk.bf16.gmra.mrb[4].mxu0 %vm316_vm1, %v8780_v43  ;;  %v543_v7 = vld [vmem:[#allocation2 + $0x121] sm:$0xff]  ;;  %v544_v8 = vld [vmem:[#allocation2 + $0x129] sm:$0xff]  ;;  %v8824_v9 = vpack.c.bf16 %v542_v6, %v541_v5  ;;  %v472_v23 = vld [vmem:[#allocation2 + $0x18] sm:$0xff] }
  0x4d   : > { %6990 = vmatprep.mubr.msk.bf16.mxu0 %vm316_vm1, %v8782_v44  ;;  %v8826_v10 = vpack.c.bf16 %v544_v8, %v543_v7  ;;  %v545_v11 = vld [vmem:[#allocation2 + $0x139] sm:$0xff]  ;;  %v546_v12 = vld [vmem:[#allocation2 + $0x141] sm:$0xff]  ;;  %v8847_v28 = vpack.c.bf16 %v473_v24, %v472_v23  ;;  %v477_v33 = vld [vmem:[#allocation2 + $0x50] sm:$0xff] }
  0x4e   : > { %v547_v13 = vld [vmem:[#allocation2 + $0x151] sm:$0xff]  ;;  %v548_v14 = vld [vmem:[#allocation2 + $0x159] sm:$0xff]  ;;  %v8832_v15 = vpack.c.bf16 %v546_v12, %v545_v11  ;;  %v476_v31 = vld [vmem:[#allocation2 + $0x48] sm:$0xff] }
  0x4f   : > { %v8834_v16 = vpack.c.bf16 %v548_v14, %v547_v13  ;;  %v549_v19 = vld [vmem:[#allocation2 + $0x169] sm:$0xff]  ;;  %v550_v20 = vld [vmem:[#allocation2 + $0x171] sm:$0xff]  ;;  %v478_v34 = vld [vmem:[#allocation2 + $0x60] sm:$0xff]  ;;  %v8862_v36 = vpack.c.bf16 %v477_v33, %v476_v31 }
  0x50   : > { %v8840_v21 = vpack.c.bf16 %v550_v20, %v549_v19  ;;  %v475_v27 = vld [vmem:[#allocation2 + $0x38] sm:$0xff]  ;;  %v479_v35 = vld [vmem:[#allocation2 + $0x68] sm:$0xff]  ;;  %v481_v40 = vld [vmem:[#allocation2 + $0x80] sm:$0xff] }
  0x51   : > { %v8849_v29 = vpack.c.bf16 %v475_v27, %v474_v25  ;;  %v8864_v38 = vpack.c.bf16 %v479_v35, %v478_v34  ;;  %v480_v39 = vld [vmem:[#allocation2 + $0x78] sm:$0xff]  ;;  %v482_v41 = vld [vmem:[#allocation2 + $0x90] sm:$0xff]  ;;  %v484_v47 = vld [vmem:[#allocation2 + $0xa8] sm:$0xff] }
  0x52   : > { %v483_v42 = vld [vmem:[#allocation2 + $0x98] sm:$0xff]  ;;  %v8870_v45 = vpack.c.bf16 %v481_v40, %v480_v39  ;;  %v485_v48 = vld [vmem:[#allocation2 + $0xb0] sm:$0xff]  ;;  %v486_v49 = vld [vmem:[#allocation2 + $0xc0] sm:$0xff]  ;;  %v1387_v39 = vsel %vm617_vm0, %v8854_v30, 0 }
  0x53   : > { %v8872_v46 = vpack.c.bf16 %v483_v42, %v482_v41  ;;  %v487_v50 = vld [vmem:[#allocation2 + $0xc8] sm:$0xff]  ;;  %v8878_v51 = vpack.c.bf16 %v485_v48, %v484_v47  ;;  %v488_v53 = vld [vmem:[#allocation2 + $0xd8] sm:$0xff]  ;;  %v489_v54 = vld [vmem:[#allocation2 + $0xe0] sm:$0xff] }
  0x54   : > { %6991 = vmatmul.mubr.msk.bf16.gmra.mrb[8].mxu0 %vm316_vm1, %v8800_v55  ;;  %v8880_v52 = vpack.c.bf16 %v487_v50, %v486_v49  ;;  %v490_v57 = vld [vmem:[#allocation2 + $0xf0] sm:$0xff]  ;;  %v491_v58 = vld [vmem:[#allocation2 + $0xf8] sm:$0xff]  ;;  %v8886_v59 = vpack.c.bf16 %v489_v54, %v488_v53  ;;  %v492_v63 = vld [vmem:[#allocation2 + $0x108] sm:$0xff] }
  0x55   : > { %6994 = vmatprep.mubr.msk.bf16.mxu0 %vm316_vm1, %v8802_v56  ;;  %v8888_v60 = vpack.c.bf16 %v491_v58, %v490_v57  ;;  %v493_v0 = vld [vmem:[#allocation2 + $0x110] sm:$0xff]  ;;  %v494_v1 = vld [vmem:[#allocation2 + $0x120] sm:$0xff]  ;;  %v495_v2 = vld [vmem:[#allocation2 + $0x128] sm:$0xff] }
  0x56   : > { %v8894_v5 = vpack.c.bf16 %v493_v0, %v492_v63  ;;  %v8896_v6 = vpack.c.bf16 %v495_v2, %v494_v1  ;;  %v496_v7 = vld [vmem:[#allocation2 + $0x138] sm:$0xff]  ;;  %v497_v8 = vld [vmem:[#allocation2 + $0x140] sm:$0xff]  ;;  %v498_v11 = vld [vmem:[#allocation2 + $0x150] sm:$0xff] }
  0x57   : > { %v499_v12 = vld [vmem:[#allocation2 + $0x158] sm:$0xff]  ;;  %v8902_v13 = vpack.c.bf16 %v497_v8, %v496_v7  ;;  %v435_v17 = vld [vmem:[%s8712_s25 + $0xf0] sm:$0xff]  ;;  %v500_v19 = vld [vmem:[#allocation2 + $0x168] sm:$0xff] }
  0x58   : > { %v8904_v14 = vpack.c.bf16 %v499_v12, %v498_v11  ;;  %v436_v18 = vld [vmem:[%s8712_s25 + $0xf8] sm:$0xff]  ;;  %468 = vst.msk [vmem:[#allocation2 + $0x181] sm:$0xff] %vm316_vm1, %v435_v17  ;;  %v501_v20 = vld [vmem:[#allocation2 + $0x170] sm:$0xff]  ;;  %v997_v27 = vld [vmem:[#allocation2 + $0x22] sm:$0xff]  ;;  %s9740_s25 = scalar_lea.vmem [#allocation7], %s6241_s24  ;;  %s8379_s24 = sshll.u32 %s8472_s23, 4  ;;  %s8380_s24 = int_to_ptr.vmem [resolvable:$false] %s8379_s24 }
  0x59   : > { %469 = vst.msk [vmem:[#allocation2 + $0x189] sm:$0xff] %vm316_vm1, %v436_v18  ;;  %v995_v23 = vld [vmem:[#allocation2 + $0xa] sm:$0xff]  ;;  %v8914_v24 = vpack.c.bf16 %v501_v20, %v500_v19  ;;  %v998_v31 = vld [vmem:[#allocation2 + $0x32] sm:$0xff]  ;;  %v999_v33 = vld [vmem:[#allocation2 + $0x3a] sm:$0xff]  ;;  %s6142_s13 = sshll.u32 %s9740_s25, 4  ;;  %s8381_s26 = scalar_lea.vmem %s8380_s24, 8192  ;;  %s9844_s13 = int_to_ptr.vmem [resolvable:$true] %s6142_s13 }
  0x5a   : > { %v8921_v35 = vpack.c.bf16 %v999_v33, %v998_v31  ;;  %v6311_v40 = vld [vmem:[%s9931_s1 + $0x8] sm:$0x3]  ;;  %v1000_v41 = vld [vmem:[#allocation2 + $0x4a] sm:$0xff]  ;;  %v1001_v42 = vld [vmem:[#allocation2 + $0x52] sm:$0xff]  ;;  %s8375_s22 = scalar_lea.vmem %s9844_s13, 4096  ;;  %p8382_p0 = scmp.lt.s32.totalorder %s9844_s13, %s8380_s24 }
  0x5b   : > { %v1002_v47 = vld [vmem:[#allocation2 + $0x62] sm:$0xff]  ;;  %v1003_v48 = vld [vmem:[#allocation2 + $0x6a] sm:$0xff]  ;;  %v8933_v49 = vpack.c.bf16 %v1001_v42, %v1000_v41  ;;  %v1004_v50 = vld [vmem:[#allocation2 + $0x7a] sm:$0xff]  ;;  %p8376_p11 = scmp.ne.s32.totalorder %s9844_s13, %s8375_s22  ;;  %p8383_p1 = scmp.lt.s32.totalorder %s8381_s26, %s8375_s22 }
  0x5c   : > { %6995 = vmatmul.mubr.msk.bf16.gmra.mrb[12].mxu0 %vm316_vm1, %v8808_v61  ;;  %v1005_v53 = vld [vmem:[#allocation2 + $0x82] sm:$0xff]  ;;  %v1006_v54 = vld [vmem:[#allocation2 + $0x92] sm:$0xff]  ;;  %v1007_v57 = vld [vmem:[#allocation2 + $0x9a] sm:$0xff] }
  0x5d   : > { %6998 = vmatprep.mubr.msk.bf16.mxu0 %vm316_vm1, %v8810_v62  ;;  %v8941_v58 = vpack.c.bf16 %v1005_v53, %v1004_v50  ;;  %v8943_v63 = vpack.c.bf16 %v1007_v57, %v1006_v54  ;;  %v1008_v0 = vld [vmem:[#allocation2 + $0xaa] sm:$0xff]  ;;  %v1009_v1 = vld [vmem:[#allocation2 + $0xb2] sm:$0xff]  ;;  %v1010_v2 = vld [vmem:[#allocation2 + $0xc2] sm:$0xff]  ;;  %p8377_p12 = pnand %p8376_p11, %p8559_p5  ;;  %p8384_p2 = por %p8383_p1, %p8382_p0 }
  0x5e   : > { %v1011_v7 = vld [vmem:[#allocation2 + $0xca] sm:$0xff]  ;;  %v8949_v8 = vpack.c.bf16 %v1009_v1, %v1008_v0  ;;  %v1012_v12 = vld [vmem:[#allocation2 + $0xda] sm:$0xff]  ;;  %v1013_v17 = vld [vmem:[#allocation2 + $0xe2] sm:$0xff]  ;;  %v1681_v0 = vsel %vm617_vm0, %v6311_v40, 0 }
  0x5f   : > { %v8951_v11 = vpack.c.bf16 %v1011_v7, %v1010_v2  ;;  %v1014_v18 = vld [vmem:[#allocation2 + $0xf2] sm:$0xff]  ;;  %v1015_v19 = vld [vmem:[#allocation2 + $0xfa] sm:$0xff]  ;;  %v8957_v20 = vpack.c.bf16 %v1013_v17, %v1012_v12  ;;  %v1021_v41 = vld [vmem:[#allocation2 + $0x142] sm:$0xff]  ;;  %p8378_p13 = pneg %p8377_p12 }
  0x60   : > { %v1022_v42 = vld [vmem:[#allocation2 + $0x152] sm:$0xff]  ;;  %v1024_v53 = vld [vmem:[#allocation2 + $0x16a] sm:$0xff] }
  0x61   : > { %v1025_v54 = vld [vmem:[#allocation2 + $0x172] sm:$0xff]  ;;  %v6328_v1 = vld [vmem:[%s9931_s1 + $0xa] sm:$0x3]  ;;  %v6345_v12 = vld [vmem:[%s9931_s1 + $0xc] sm:$0x3]  ;;  %p8385_p3 = pnand %p8384_p2, %p8378_p13 }
  0x62   : > { %v8981_v57 = vpack.c.bf16 %v1025_v54, %v1024_v53  ;;  %v1975_v7 = vsel %vm617_vm0, %v6328_v1, 0  ;;  %v6362_v17 = vld [vmem:[%s9931_s1 + $0xe] sm:$0x3] }
  0x64   : > { %6999 = vmatmul.mubr.msk.bf16.gmra.mrb[16].mxu0 %vm316_vm1, %v8816_v3 }
  0x65   : > { %7002 = vmatprep.mubr.msk.bf16.mxu0 %vm316_vm1, %v8818_v4 }
  0x6c   : > { %7003 = vmatmul.mubr.msk.bf16.gmra.mrb[20].mxu0 %vm316_vm1, %v8824_v9 }
  0x6d   : > { %7006 = vmatprep.mubr.msk.bf16.mxu0 %vm316_vm1, %v8826_v10 }
  0x74   : > { %7007 = vmatmul.mubr.msk.bf16.gmra.mrb[24].mxu0 %vm316_vm1, %v8832_v15 }
  0x75   : > { %7010 = vmatprep.mubr.msk.bf16.mxu0 %vm316_vm1, %v8834_v16 }
  0x7c   : > { %7011 = vmatmul.mubr.msk.bf16.gmra.mrb[28].mxu0 %vm316_vm1, %v8840_v21 }
  0x7d   : > { %7016 = vmatprep.mubr.msk.bf16.mxu0 %vm316_vm1, %v502_v22  ;;  %v994_v22 = vld [vmem:[#allocation2 + $0x2] sm:$0xff] }
  0x7e   : > { %v1026_v25 = vpack.c.bf16 %v995_v23, %v994_v22  ;;  %v8959_v22 = vpack.c.bf16 %v1015_v19, %v1014_v18  ;;  %v1016_v23 = vld [vmem:[#allocation2 + $0x10a] sm:$0xff] }
  0x7f   : > { %v1907_v18 = vld [vmem:[#allocation2 + $0x18a] sm:$0xff] }
  0x84   : > { %7017 = vmatmul.mubr.msk.bf16.vlgmr.msra.gmra.mrb[0].mxu0 %vm316_vm1, %v8847_v28 }
  0x85   : > { %7049 = vmatpush3.bf16.msra.mxu0 %v1093_v26  ;;  %7020 = vmatprep.mubr.msk.bf16.mxu0 %vm316_vm1, %v8849_v29  ;;  %v996_v26 = vld [vmem:[#allocation2 + $0x1a] sm:$0xff] }
  0x86   : > { %8249 = vmatprep.subr.msk.bf16.mxu0 %vm617_vm0, %v8854_v30  ;;  %v8919_v34 = vpack.c.bf16 %v997_v27, %v996_v26  ;;  %v8935_v30 = vpack.c.bf16 %v1003_v48, %v1002_v47  ;;  %v1018_v26 = vld [vmem:[#allocation2 + $0x122] sm:$0xff]  ;;  %v1019_v27 = vld [vmem:[#allocation2 + $0x12a] sm:$0xff]  ;;  %v1023_v47 = vld [vmem:[#allocation2 + $0x15a] sm:$0xff] }
  0x87   : > { %v8967_v33 = vpack.c.bf16 %v1019_v27, %v1018_v26  ;;  %v8975_v50 = vpack.c.bf16 %v1023_v47, %v1022_v42  ;;  %v8304_v27 = vld [vmem:[%s9934_s4 + $0x50] sm:$0xff]  }
  0x8c   : > { %7021 = vmatmul.mubr.msk.bf16.gmra.mrb[4].mxu0 %vm316_vm1, %v8862_v36 }
  0x8d   : > { %7024 = vmatprep.mubr.msk.bf16.mxu0 %vm316_vm1, %v8864_v38 }
  0x94   : > { %7025 = vmatmul.mubr.msk.bf16.gmra.mrb[8].mxu0 %vm316_vm1, %v8870_v45 }
  0x95   : > { %7028 = vmatprep.mubr.msk.bf16.mxu0 %vm316_vm1, %v8872_v46 }
  0x9c   : > { %7029 = vmatmul.mubr.msk.bf16.gmra.mrb[12].mxu0 %vm316_vm1, %v8878_v51 }
  0x9d   : > { %7032 = vmatprep.mubr.msk.bf16.mxu0 %vm316_vm1, %v8880_v52 }
  0xa4   : > { %7033 = vmatmul.mubr.msk.bf16.gmra.mrb[16].mxu0 %vm316_vm1, %v8886_v59 }
  0xa5   : > { %7036 = vmatprep.mubr.msk.bf16.mxu0 %vm316_vm1, %v8888_v60 }
  0xac   : > { %7037 = vmatmul.mubr.msk.bf16.gmra.mrb[20].mxu0 %vm316_vm1, %v8894_v5 }
  0xad   : > { %7040 = vmatprep.mubr.msk.bf16.mxu0 %vm316_vm1, %v8896_v6 }
  0xb4   : > { %7041 = vmatmul.mubr.msk.bf16.gmra.mrb[24].mxu0 %vm316_vm1, %v8902_v13 }
  0xb5   : > { %7044 = vmatprep.mubr.msk.bf16.mxu0 %vm316_vm1, %v8904_v14 }
  0xbc   : > { %7045 = vmatmul.mubr.msk.bf16.gmra.mrb[28].mxu0 %vm316_vm1, %v8914_v24 }
  0xbd   : > { %7050 = vmatprep.mubr.msk.bf16.mxu0 %vm316_vm1, %v1026_v25  ;;  %v1017_v25 = vld [vmem:[#allocation2 + $0x112] sm:$0xff] }
  0xbe   : > { %v8965_v31 = vpack.c.bf16 %v1017_v25, %v1016_v23  ;;  %v2564_v23 = vsel %vm617_vm0, %v6362_v17, 0  ;;  %v6379_v25 = vld [vmem:[%s9931_s1 + $0x10] sm:$0x3] }
  0xbf   : > { %v2858_v26 = vsel %vm617_vm0, %v6379_v25, 0 }
  0xc4   : > { %7051 = vmatmul.mubr.msk.bf16.vlgmr.msra.gmra.mrb[0].mxu0 %vm316_vm1, %v8919_v34 }
  0xc5   : > { %7083 = vmatpush3.bf16.msra.mxu0 %v1387_v39  ;;  %7054 = vmatprep.mubr.msk.bf16.mxu0 %vm316_vm1, %v8921_v35  ;;  %v1020_v39 = vld [vmem:[#allocation2 + $0x13a] sm:$0xff] }
  0xc6   : > { %8250 = vmatprep.subr.msk.bf16.mxu0 %vm617_vm0, %v6311_v40  ;;  %v8973_v48 = vpack.c.bf16 %v1021_v41, %v1020_v39  ;;  %v1319_v40 = vld [vmem:[#allocation2 + $0x188] sm:$0xff] }
  0xcc   : > { %7055 = vmatmul.mubr.msk.bf16.gmra.mrb[4].mxu0 %vm316_vm1, %v8933_v49 }
  0xcd   : > { %7058 = vmatprep.mubr.msk.bf16.mxu0 %vm316_vm1, %v8935_v30 }
  0xd4   : > { %7059 = vmatmul.mubr.msk.bf16.gmra.mrb[8].mxu0 %vm316_vm1, %v8941_v58 }
  0xd5   : > { %7062 = vmatprep.mubr.msk.bf16.mxu0 %vm316_vm1, %v8943_v63 }
  0xdc   : > { %7063 = vmatmul.mubr.msk.bf16.gmra.mrb[12].mxu0 %vm316_vm1, %v8949_v8 }
  0xdd   : > { %7066 = vmatprep.mubr.msk.bf16.mxu0 %vm316_vm1, %v8951_v11 }
  0xe4   : > { %7067 = vmatmul.mubr.msk.bf16.gmra.mrb[16].mxu0 %vm316_vm1, %v8957_v20 }
  0xe5   : > { %7070 = vmatprep.mubr.msk.bf16.mxu0 %vm316_vm1, %v8959_v22 }
  0xec   : > { %7071 = vmatmul.mubr.msk.bf16.gmra.mrb[20].mxu0 %vm316_vm1, %v8965_v31 }
  0xed   : > { %7074 = vmatprep.mubr.msk.bf16.mxu0 %vm316_vm1, %v8967_v33 }
  0xf4   : > { %7075 = vmatmul.mubr.msk.bf16.gmra.mrb[24].mxu0 %vm316_vm1, %v8973_v48 }
  0xf5   : > { %7078 = vmatprep.mubr.msk.bf16.mxu0 %vm316_vm1, %v8975_v50 }
  0xfc   : > { %7079 = vmatmul.mubr.msk.bf16.gmra.mrb[28].mxu0 %vm316_vm1, %v8981_v57 }
  0xfd   : > { %7084 = vmatprep.mubr.msk.bf16.mxu0 %vm316_vm1, %v8847_v28  ;;  %v1318_v28 = vld [vmem:[#allocation2 + $0x180] sm:$0xff] }
  0xfe   : > { %v9020_v2 = vpack.c.bf16 %v1319_v40, %v1318_v28 }
 0x104   : > { %7085 = vmatmul.mubr.msk.bf16.vlgmr.msra.gmra.mrb[0].mxu0 %vm316_vm1, %v8849_v29 }
 0x105   : > { %7117 = vmatpush3.bf16.msra.mxu0 %v1681_v0  ;;  %7088 = vmatprep.mubr.msk.bf16.mxu0 %vm316_vm1, %v8862_v36 }
 0x106   : > { %8251 = vmatprep.subr.msk.bf16.mxu0 %vm617_vm0, %v6328_v1 }
 0x10c   : > { %7089 = vmatmul.mubr.msk.bf16.gmra.mrb[4].mxu0 %vm316_vm1, %v8864_v38 }
 0x10d   : > { %7092 = vmatprep.mubr.msk.bf16.mxu0 %vm316_vm1, %v8870_v45 }
 0x114   : > { %7093 = vmatmul.mubr.msk.bf16.gmra.mrb[8].mxu0 %vm316_vm1, %v8872_v46 }
 0x115   : > { %7096 = vmatprep.mubr.msk.bf16.mxu0 %vm316_vm1, %v8878_v51 }
 0x11c   : > { %7097 = vmatmul.mubr.msk.bf16.gmra.mrb[12].mxu0 %vm316_vm1, %v8880_v52 }
 0x11d   : > { %7100 = vmatprep.mubr.msk.bf16.mxu0 %vm316_vm1, %v8886_v59 }
 0x124   : > { %7101 = vmatmul.mubr.msk.bf16.gmra.mrb[16].mxu0 %vm316_vm1, %v8888_v60 }
 0x125   : > { %7104 = vmatprep.mubr.msk.bf16.mxu0 %vm316_vm1, %v8894_v5 }
 0x12c   : > { %7105 = vmatmul.mubr.msk.bf16.gmra.mrb[20].mxu0 %vm316_vm1, %v8896_v6 }
 0x12d   : > { %7108 = vmatprep.mubr.msk.bf16.mxu0 %vm316_vm1, %v8902_v13 }
 0x134   : > { %7109 = vmatmul.mubr.msk.bf16.gmra.mrb[24].mxu0 %vm316_vm1, %v8904_v14 }
 0x135   : > { %7112 = vmatprep.mubr.msk.bf16.mxu0 %vm316_vm1, %v8914_v24 }
 0x13c   : > { %7113 = vmatmul.mubr.msk.bf16.gmra.mrb[28].mxu0 %vm316_vm1, %v9020_v2 }
 0x13d   : > { %7118 = vmatprep.mubr.msk.bf16.mxu0 %vm316_vm1, %v8759_v32  ;;  %v1612_v32 = vld [vmem:[#allocation2 + $0x181] sm:$0xff] }
 0x144   : > { %7119 = vmatmul.mubr.msk.bf16.vlgmr.msra.gmra.mrb[0].mxu0 %vm316_vm1, %v8765_v37  ;;  %v1613_v37 = vld [vmem:[#allocation2 + $0x189] sm:$0xff] }
 0x145   : > { %7151 = vmatpush3.bf16.msra.mxu0 %v1975_v7  ;;  %7122 = vmatprep.mubr.msk.bf16.mxu0 %vm316_vm1, %v8780_v43  ;;  %v9059_v43 = vpack.c.bf16 %v1613_v37, %v1612_v32 }
 0x146   : > { %8252 = vmatprep.subr.msk.bf16.mxu0 %vm617_vm0, %v6345_v12 }
 0x14c   : > { %7123 = vmatmul.mubr.msk.bf16.gmra.mrb[4].mxu0 %vm316_vm1, %v8782_v44  ;;  %v2270_v44 = vsel %vm617_vm0, %v6345_v12, 0 }
 0x14d   : > { %7126 = vmatprep.mubr.msk.bf16.mxu0 %vm316_vm1, %v8800_v55 }
 0x154   : > { %7127 = vmatmul.mubr.msk.bf16.gmra.mrb[8].mxu0 %vm316_vm1, %v8802_v56 }
 0x155   : > { %7130 = vmatprep.mubr.msk.bf16.mxu0 %vm316_vm1, %v8808_v61 }
 0x15c   : > { %7131 = vmatmul.mubr.msk.bf16.gmra.mrb[12].mxu0 %vm316_vm1, %v8810_v62 }
 0x15d   : > { %7134 = vmatprep.mubr.msk.bf16.mxu0 %vm316_vm1, %v8816_v3 }
 0x164   : > { %7135 = vmatmul.mubr.msk.bf16.gmra.mrb[16].mxu0 %vm316_vm1, %v8818_v4 }
 0x165   : > { %7138 = vmatprep.mubr.msk.bf16.mxu0 %vm316_vm1, %v8824_v9 }
 0x16c   : > { %7139 = vmatmul.mubr.msk.bf16.gmra.mrb[20].mxu0 %vm316_vm1, %v8826_v10 }
 0x16d   : > { %7142 = vmatprep.mubr.msk.bf16.mxu0 %vm316_vm1, %v8832_v15 }
 0x174   : > { %7143 = vmatmul.mubr.msk.bf16.gmra.mrb[24].mxu0 %vm316_vm1, %v8834_v16 }
 0x175   : > { %7146 = vmatprep.mubr.msk.bf16.mxu0 %vm316_vm1, %v8840_v21 }
 0x17c   : > { %7147 = vmatmul.mubr.msk.bf16.gmra.mrb[28].mxu0 %vm316_vm1, %v9059_v43 }
 0x17d   : > { %7152 = vmatprep.mubr.msk.bf16.mxu0 %vm316_vm1, %v8919_v34  ;;  %v1906_v34 = vld [vmem:[#allocation2 + $0x182] sm:$0xff] }
 0x17e   : > { %v9098_v19 = vpack.c.bf16 %v1907_v18, %v1906_v34 }
 0x184   : > { %7153 = vmatmul.mubr.msk.bf16.vlgmr.msra.gmra.mrb[0].mxu0 %vm316_vm1, %v8921_v35 }
 0x185   : > { %7185 = vmatpush3.bf16.msra.mxu0 %v2270_v44  ;;  %7156 = vmatprep.mubr.msk.bf16.mxu0 %vm316_vm1, %v8933_v49 }
 0x186   : > { %8253 = vmatprep.subr.msk.bf16.mxu0 %vm617_vm0, %v6362_v17 }
 0x18c   : > { %7157 = vmatmul.mubr.msk.bf16.gmra.mrb[4].mxu0 %vm316_vm1, %v8935_v30 }
 0x18d   : > { %7160 = vmatprep.mubr.msk.bf16.mxu0 %vm316_vm1, %v8941_v58 }
 0x194   : > { %7161 = vmatmul.mubr.msk.bf16.gmra.mrb[8].mxu0 %vm316_vm1, %v8943_v63 }
 0x195   : > { %7164 = vmatprep.mubr.msk.bf16.mxu0 %vm316_vm1, %v8949_v8 }
 0x19c   : > { %7165 = vmatmul.mubr.msk.bf16.gmra.mrb[12].mxu0 %vm316_vm1, %v8951_v11 }
 0x19d   : > { %7168 = vmatprep.mubr.msk.bf16.mxu0 %vm316_vm1, %v8957_v20 }
 0x1a4   : > { %7169 = vmatmul.mubr.msk.bf16.gmra.mrb[16].mxu0 %vm316_vm1, %v8959_v22 }
 0x1a5   : > { %7172 = vmatprep.mubr.msk.bf16.mxu0 %vm316_vm1, %v8965_v31 }
 0x1ac   : > { %7173 = vmatmul.mubr.msk.bf16.gmra.mrb[20].mxu0 %vm316_vm1, %v8967_v33 }
 0x1ad   : > { %7176 = vmatprep.mubr.msk.bf16.mxu0 %vm316_vm1, %v8973_v48 }
 0x1b4   : > { %7177 = vmatmul.mubr.msk.bf16.gmra.mrb[24].mxu0 %vm316_vm1, %v8975_v50 }
 0x1b5   : > { %7180 = vmatprep.mubr.msk.bf16.mxu0 %vm316_vm1, %v8981_v57 }
 0x1bc   : > { %7181 = vmatmul.mubr.msk.bf16.gmra.mrb[28].mxu0 %vm316_vm1, %v9098_v19 }
 0x1bd   : > { %7186 = vmatprep.mubr.msk.bf16.mxu0 %vm316_vm1, %v8849_v29  ;;  %v2201_v29 = vld [vmem:[#allocation2 + $0x198] sm:$0xff] }
 0x1c4   : > { %7187 = vmatmul.mubr.msk.bf16.vlgmr.msra.gmra.mrb[0].mxu0 %vm316_vm1, %v8862_v36  ;;  %v2202_v36 = vld [vmem:[#allocation2 + $0x1a0] sm:$0xff] }
 0x1c5   : > { %7219 = vmatpush3.bf16.msra.mxu0 %v2564_v23  ;;  %7190 = vmatprep.mubr.msk.bf16.mxu0 %vm316_vm1, %v8864_v38  ;;  %v2465_v38 = vld [vmem:[#allocation2 + $0x31] sm:$0xff] }
 0x1c6   : > { %8254 = vmatprep.subr.msk.bf16.mxu0 %vm617_vm0, %v6379_v25 }
 0x1cc   : > { %7191 = vmatmul.mubr.msk.bf16.gmra.mrb[4].mxu0 %vm316_vm1, %v8870_v45  ;;  %v2466_v45 = vld [vmem:[#allocation2 + $0x39] sm:$0xff] }
 0x1cd   : > { %7194 = vmatprep.mubr.msk.bf16.mxu0 %vm316_vm1, %v8872_v46  ;;  %v2218_v46 = vpack.c.bf16 %v2202_v36, %v2201_v29 }
 0x1d4   : > { %7195 = vmatmul.mubr.msk.bf16.gmra.mrb[8].mxu0 %vm316_vm1, %v8878_v51  ;;  %v2497_v51 = vpack.c.bf16 %v2466_v45, %v2465_v38 }
 0x1d5   : > { %7198 = vmatprep.mubr.msk.bf16.mxu0 %vm316_vm1, %v8880_v52  ;;  %v8302_v52 = vld [vmem:[%s9934_s4 + $0x40] sm:$0xff]  }
 0x1d6   : > { %7718 = vmatprep.subr.bf16.mxu1 %v8302_v52 }
 0x1d7   : > { %7726 = vmatpush3.bf16.msra.mxu1 %v8302_v52 }
 0x1dc   : > { %7199 = vmatmul.mubr.msk.bf16.gmra.mrb[12].mxu0 %vm316_vm1, %v8886_v59  ;;  %v2467_v59 = vld [vmem:[#allocation2 + $0x49] sm:$0xff] }
 0x1dd   : > { %7202 = vmatprep.mubr.msk.bf16.mxu0 %vm316_vm1, %v8888_v60  ;;  %v2468_v60 = vld [vmem:[#allocation2 + $0x51] sm:$0xff] }
 0x1e4   : > { %7203 = vmatmul.mubr.msk.bf16.gmra.mrb[16].mxu0 %vm316_vm1, %v8894_v5  ;;  %v2469_v5 = vld [vmem:[#allocation2 + $0x61] sm:$0xff] }
 0x1e5   : > { %7206 = vmatprep.mubr.msk.bf16.mxu0 %vm316_vm1, %v8896_v6  ;;  %v2470_v6 = vld [vmem:[#allocation2 + $0x69] sm:$0xff] }
 0x1ec   : > { %7207 = vmatmul.mubr.msk.bf16.gmra.mrb[20].mxu0 %vm316_vm1, %v8902_v13  ;;  %v8303_v13 = vld [vmem:[%s9934_s4 + $0x48] sm:$0xff]  }
 0x1ed   : > { %7210 = vmatprep.mubr.msk.bf16.mxu0 %vm316_vm1, %v8904_v14  ;;  %v2498_v14 = vpack.c.bf16 %v2468_v60, %v2467_v59  ;;  %7719 = vmatprep.subr.bf16.mxu1 %v8303_v13 }
 0x1ee   : > { %7727 = vmatpush3.bf16.msra.mxu1 %v8303_v13 }
 0x1ef   : > { %7720 = vmatprep.subr.bf16.mxu1 %v8304_v27 }
 0x1f2   : > { %7728 = vmatpush3.bf16.msra.mxu1 %v8304_v27 }
 0x1f4   : > { %7211 = vmatmul.mubr.msk.bf16.gmra.mrb[24].mxu0 %vm316_vm1, %v8914_v24  ;;  %v2499_v24 = vpack.c.bf16 %v2470_v6, %v2469_v5  ;;  %v8311_v6 = vld [vmem:[%s9934_s4 + $0x8] sm:$0xff]  }
 0x1f5   : > { %7214 = vmatprep.mubr.msk.bf16.mxu0 %vm316_vm1, %v9020_v2 }
 0x1fc   : > { %7215 = vmatmul.mubr.msk.bf16.gmra.mrb[28].mxu0 %vm316_vm1, %v2218_v46 }
 0x1fd   : > { %7220 = vmatprep.mubr.msk.bf16.mxu0 %vm316_vm1, %v2497_v51 }
 0x204   : > { %7221 = vmatmul.mubr.msk.bf16.vlgmr.msra.gmra.mrb[0].mxu0 %vm316_vm1, %v2498_v14 }
 0x205   : > { %7253 = vmatpush3.bf16.msra.mxu0 %v2858_v26  ;;  %7224 = vmatprep.mubr.msk.bf16.mxu0 %vm316_vm1, %v2499_v24 }
 0x206   : > { %7286 = vmatprep.subr.bf16.mxu0 %v8302_v52 }
 0x20c   : > { %7225 = vmatmul.mubr.msk.bf16.gmra.mrb[4].mxu0 %vm316_vm1, %v8800_v55  ;;  %v2495_v55 = vld [vmem:[#allocation2 + $0x199] sm:$0xff] }
 0x20d   : > { %7228 = vmatprep.mubr.msk.bf16.mxu0 %vm316_vm1, %v8802_v56  ;;  %v2496_v56 = vld [vmem:[#allocation2 + $0x1a1] sm:$0xff] }
 0x214   : > { %7229 = vmatmul.mubr.msk.bf16.gmra.mrb[8].mxu0 %vm316_vm1, %v8808_v61  ;;  %v2512_v61 = vpack.c.bf16 %v2496_v56, %v2495_v55 }
 0x215   : > { %7232 = vmatprep.mubr.msk.bf16.mxu0 %vm316_vm1, %v8810_v62  ;;  %v2789_v62 = vld [vmem:[#allocation2 + $0x19a] sm:$0xff] }
 0x21c   : > { %7233 = vmatmul.mubr.msk.bf16.gmra.mrb[12].mxu0 %vm316_vm1, %v8816_v3  ;;  %v2790_v3 = vld [vmem:[#allocation2 + $0x1a2] sm:$0xff] }
 0x21d   : > { %7236 = vmatprep.mubr.msk.bf16.mxu0 %vm316_vm1, %v8818_v4  ;;  %v2806_v4 = vpack.c.bf16 %v2790_v3, %v2789_v62  ;;  %v8312_v3 = vld [vmem:[%s9934_s4 + $0x10] sm:$0xff]  }
 0x224   : > { %7237 = vmatmul.mubr.msk.bf16.gmra.mrb[16].mxu0 %vm316_vm1, %v8824_v9  ;;  %v8305_v9 = vld [vmem:[%s9934_s4 + $0x58] sm:$0xff]  }
 0x225   : > { %7240 = vmatprep.mubr.msk.bf16.mxu0 %vm316_vm1, %v8826_v10  ;;  %7721 = vmatprep.subr.bf16.mxu1 %v8305_v9  ;;  %v8306_v10 = vld [vmem:[%s9934_s4 + $0x60] sm:$0xff]  }
 0x226   : > { %7729 = vmatpush3.bf16.msra.mxu1 %v8305_v9 }
 0x227   : > { %7722 = vmatprep.subr.bf16.mxu1 %v8306_v10 }
 0x22a   : > { %7730 = vmatpush3.bf16.msra.mxu1 %v8306_v10 }
 0x22c   : > { %7241 = vmatmul.mubr.msk.bf16.gmra.mrb[20].mxu0 %vm316_vm1, %v8832_v15  ;;  %v8307_v15 = vld [vmem:[%s9934_s4 + $0x68] sm:$0xff]  }
 0x22d   : > { %7244 = vmatprep.mubr.msk.bf16.mxu0 %vm316_vm1, %v8834_v16  ;;  %7723 = vmatprep.subr.bf16.mxu1 %v8307_v15  ;;  %v8308_v16 = vld [vmem:[%s9934_s4 + $0x70] sm:$0xff]  }
 0x22e   : > { %7731 = vmatpush3.bf16.msra.mxu1 %v8307_v15 }
 0x22f   : > { %7724 = vmatprep.subr.bf16.mxu1 %v8308_v16 }
 0x232   : > { %7732 = vmatpush3.bf16.msra.mxu1 %v8308_v16 }
 0x234   : > { %7245 = vmatmul.mubr.msk.bf16.gmra.mrb[24].mxu0 %vm316_vm1, %v8840_v21  ;;  %v8309_v21 = vld [vmem:[%s9934_s4 + $0x78] sm:$0xff]  }
 0x235   : > { %7248 = vmatprep.mubr.msk.bf16.mxu0 %vm316_vm1, %v9059_v43  ;;  %7725 = vmatprep.subr.bf16.mxu1 %v8309_v21 }
 0x236   : > { %7733 = vmatpush3.bf16.msra.mxu1 %v8309_v21 }
 0x23c   : > { %7249 = vmatmul.mubr.msk.bf16.gmra.mrb[28].mxu0 %vm316_vm1, %v2512_v61 }
 0x23d   : > { %7254 = vmatprep.mubr.msk.bf16.mxu0 %vm316_vm1, %v8921_v35  ;;  %v3260_v35 = vld [vmem:[#allocation3 + $0x1] sm:$0xff] }
 0x244   : > { %7255 = vmatmul.mubr.msk.bf16.vlgmr.msra.gmra.mrb[0].mxu0 %vm316_vm1, %v8933_v49  ;;  %v3261_v49 = vld [vmem:[#allocation3 + $0x9] sm:$0xff] }
 0x245   : > { %7258 = vmatprep.mubr.msk.bf16.mxu0 %vm316_vm1, %v8935_v30  ;;  %7287 = vmatpush3.bf16.msra.mxu0 %v8302_v52  ;;  %v3292_v30 = vpack.c.bf16 %v3261_v49, %v3260_v35 }
 0x246   : > { %7288 = vmatprep.subr.bf16.mxu0 %v8303_v13 }
 0x249   : > { %7289 = vmatpush3.bf16.msra.mxu0 %v8303_v13 }
 0x24a   : > { %7290 = vmatprep.subr.bf16.mxu0 %v8304_v27 }
 0x24c   : > { %7259 = vmatmul.mubr.msk.bf16.gmra.mrb[4].mxu0 %vm316_vm1, %v8941_v58  ;;  %v9225_v58 = vld [vmem:[%s9934_s4] sm:$0xff]  }
 0x24d   : > { %7262 = vmatprep.mubr.msk.bf16.mxu0 %vm316_vm1, %v8943_v63  ;;  %7291 = vmatpush3.bf16.msra.mxu0 %v8304_v27  ;;  %v9231_v63 = vld [vmem:[%s9932_s2] ss:$0 sm:$0xff] }
 0x24e   : > { %7292 = vmatprep.subr.bf16.mxu0 %v8305_v9  ;;  %7334 = vmatprep.subr.bf16.mxu1 %v9225_v58 }
 0x251   : > { %7293 = vmatpush3.bf16.msra.mxu0 %v8305_v9 }
 0x252   : > { %7294 = vmatprep.subr.bf16.mxu0 %v8306_v10 }
 0x254   : > { %7263 = vmatmul.mubr.msk.bf16.gmra.mrb[8].mxu0 %vm316_vm1, %v8949_v8 }
 0x255   : > { %7266 = vmatprep.mubr.msk.bf16.mxu0 %vm316_vm1, %v8951_v11  ;;  %7295 = vmatpush3.bf16.msra.mxu0 %v8306_v10  ;;  %v9236_v11 = vld [vmem:[%s9933_s3] ss:$0 sm:$0xff] }
 0x256   : > { %7296 = vmatprep.subr.bf16.mxu0 %v8307_v15 }
 0x259   : > { %7297 = vmatpush3.bf16.msra.mxu0 %v8307_v15 }
 0x25a   : > { %7298 = vmatprep.subr.bf16.mxu0 %v8308_v16 }
 0x25c   : > { %7267 = vmatmul.mubr.msk.bf16.gmra.mrb[12].mxu0 %vm316_vm1, %v8957_v20 }
 0x25d   : > { %7270 = vmatprep.mubr.msk.bf16.mxu0 %vm316_vm1, %v8959_v22  ;;  %7299 = vmatpush3.bf16.msra.mxu0 %v8308_v16 }
 0x25e   : > { %7300 = vmatprep.subr.bf16.mxu0 %v8309_v21 }
 0x261   : > { %7301 = vmatpush3.bf16.msra.mxu0 %v8309_v21 }
 0x264   : > { %7271 = vmatmul.mubr.msk.bf16.gmra.mrb[16].mxu0 %vm316_vm1, %v8965_v31 }
 0x265   : > { %7274 = vmatprep.mubr.msk.bf16.mxu0 %vm316_vm1, %v8967_v33 }
 0x26c   : > { %7275 = vmatmul.mubr.msk.bf16.gmra.mrb[20].mxu0 %vm316_vm1, %v8973_v48 }
 0x26d   : > { %7278 = vmatprep.mubr.msk.bf16.mxu0 %vm316_vm1, %v8975_v50 }
 0x274   : > { %7279 = vmatmul.mubr.msk.bf16.gmra.mrb[24].mxu0 %vm316_vm1, %v8981_v57 }
 0x275   : > { %7282 = vmatprep.mubr.msk.bf16.mxu0 %vm316_vm1, %v9098_v19 }
 0x27c   : > { %7283 = vmatmul.mubr.msk.bf16.gmra.mrb[28].mxu0 %vm316_vm1, %v2806_v4 }
 0x27d   : > { %7302 = vmatprep.mubr.bf16.mxu0 %v3292_v30 }
 0x317   : > { %v7256_v8 = vpop.f32.mrb[0].mxu0 }
 0x318   : > { %v3062_v20 = vmul.f32 %v7256_v8, %v9231_v63  ;;  %v2894_v22 = vpop.f32.mrb[1].mxu0 }
 0x319   : > { %v3060_v31 = vmul.f32 %v9231_v63, %v2894_v22  ;;  %v7257_v33 = vpop.f32.mrb[2].mxu0 }
 0x31a   : > { %v3101_v39 = vadd.f32 %v9236_v11, %v3062_v20  ;;  %v3063_v41 = vmul.f32 %v7257_v33, %v9231_v63  ;;  %v2897_v42 = vpop.f32.mrb[3].mxu0 }
 0x31b   : > { %v3099_v47 = vadd.f32 %v9236_v11, %v3060_v31  ;;  %v3061_v48 = vmul.f32 %v9231_v63, %v2897_v42 }
 0x31c   : > { %v3133_v50 = vmax.f32 %v3101_v39, 0.0  ;;  %v3102_v53 = vadd.f32 %v9236_v11, %v3063_v41 }
 0x31d   : > { %v3131_v54 = vmax.f32 %v3099_v47, 0.0  ;;  %v3100_v57 = vadd.f32 %v9236_v11, %v3061_v48  ;;  %v8314_v48 = vld [vmem:[%s9934_s4 + $0x20] sm:$0xff]  }
 0x31e   : > { %3166 = vst [vmem:[#allocation3 + $0x31] sm:$0xff] %v3133_v50  ;;  %v3134_v0 = vmax.f32 %v3102_v53, 0.0 }
 0x31f   : > { %3164 = vst [vmem:[#allocation3 + $0x19] sm:$0xff] %v3131_v54  ;;  %v3132_v1 = vmax.f32 %v3100_v57, 0.0  ;;  %v7260_v28 = vpop.f32.mrb[4].mxu0 }
 0x320   : > { %3167 = vst [vmem:[#allocation3 + $0x39] sm:$0xff] %v3134_v0  ;;  %v3066_v40 = vmul.f32 %v7260_v28, %v9231_v63  ;;  %v2910_v2 = vpop.f32.mrb[5].mxu0  ;;  %v3294_v7 = vpack.c.bf16 %v3134_v0, %v3133_v50 }
 0x321   : > { %3165 = vst [vmem:[#allocation3 + $0x21] sm:$0xff] %v3132_v1  ;;  %v3064_v12 = vmul.f32 %v9231_v63, %v2910_v2  ;;  %v7261_v32 = vpop.f32.mrb[6].mxu0  ;;  %v3293_v37 = vpack.c.bf16 %v3132_v1, %v3131_v54 }
 0x322   : > { %v3105_v43 = vadd.f32 %v9236_v11, %v3066_v40  ;;  %v3067_v44 = vmul.f32 %v7261_v32, %v9231_v63  ;;  %v2913_v17 = vpop.f32.mrb[7].mxu0  ;;  %7306 = vmatprep.mubr.bf16.mxu1 %v3294_v7  ;;  %v8315_v7 = vld [vmem:[%s9934_s4 + $0x28] sm:$0xff]  }
 0x323   : > { %v3103_v34 = vadd.f32 %v9236_v11, %v3064_v12  ;;  %v3065_v18 = vmul.f32 %v9231_v63, %v2913_v17  ;;  %7303 = vmatmul.mubr.bf16.vlgmr.msra.gmra.mrb[32].mxu0 %v3293_v37 }
 0x324   : > { %v3137_v19 = vmax.f32 %v3105_v43, 0.0  ;;  %v3106_v23 = vadd.f32 %v9236_v11, %v3067_v44 }
 0x325   : > { %v3135_v25 = vmax.f32 %v3103_v34, 0.0  ;;  %v3104_v29 = vadd.f32 %v9236_v11, %v3065_v18 }
 0x326   : > { %3170 = vst [vmem:[#allocation3 + $0x61] sm:$0xff] %v3137_v19  ;;  %v3138_v36 = vmax.f32 %v3106_v23, 0.0  ;;  %v8316_v23 = vld [vmem:[%s9934_s4 + $0x30] sm:$0xff]  }
 0x327   : > { %3168 = vst [vmem:[#allocation3 + $0x49] sm:$0xff] %v3135_v25  ;;  %v3136_v38 = vmax.f32 %v3104_v29, 0.0  ;;  %v7264_v45 = vpop.f32.mrb[8].mxu0 }
 0x328   : > { %3171 = vst [vmem:[#allocation3 + $0x69] sm:$0xff] %v3138_v36  ;;  %v3070_v46 = vmul.f32 %v7264_v45, %v9231_v63  ;;  %v2926_v51 = vpop.f32.mrb[9].mxu0  ;;  %v3296_v52 = vpack.c.bf16 %v3138_v36, %v3137_v19 }
 0x329   : > { %3169 = vst [vmem:[#allocation3 + $0x51] sm:$0xff] %v3136_v38  ;;  %v3068_v59 = vmul.f32 %v9231_v63, %v2926_v51  ;;  %v7265_v60 = vpop.f32.mrb[10].mxu0  ;;  %v3295_v5 = vpack.c.bf16 %v3136_v38, %v3135_v25 }
 0x32a   : > { %v3109_v13 = vadd.f32 %v9236_v11, %v3070_v46  ;;  %v3071_v14 = vmul.f32 %v7265_v60, %v9231_v63  ;;  %v2929_v24 = vpop.f32.mrb[11].mxu0  ;;  %v8317_v60 = vld [vmem:[%s9934_s4 + $0x38] sm:$0xff]  }
 0x32b   : > { %v3107_v26 = vadd.f32 %v9236_v11, %v3068_v59  ;;  %v3069_v27 = vmul.f32 %v9231_v63, %v2929_v24  ;;  %7307 = vmatmul.mubr.bf16.vlgmr.msra.gmra.mrb[0].mxu1 %v3295_v5 }
 0x32c   : > { %v3141_v55 = vmax.f32 %v3109_v13, 0.0  ;;  %v3110_v56 = vadd.f32 %v9236_v11, %v3071_v14  ;;  %7335 = vmatpush3.bf16.msra.mxu1 %v9225_v58  ;;  %7310 = vmatprep.mubr.bf16.mxu1 %v3296_v52  ;;  %v8313_v58 = vld [vmem:[%s9934_s4 + $0x18] sm:$0xff]  }
 0x32d   : > { %v3139_v61 = vmax.f32 %v3107_v26, 0.0  ;;  %v3108_v62 = vadd.f32 %v9236_v11, %v3069_v27  ;;  %7336 = vmatprep.subr.bf16.mxu1 %v8311_v6 }
 0x32e   : > { %3174 = vst [vmem:[#allocation3 + $0x91] sm:$0xff] %v3141_v55  ;;  %v3142_v4 = vmax.f32 %v3110_v56, 0.0 }
 0x32f   : > { %3172 = vst [vmem:[#allocation3 + $0x79] sm:$0xff] %v3139_v61  ;;  %v3140_v9 = vmax.f32 %v3108_v62, 0.0  ;;  %v7268_v10 = vpop.f32.mrb[12].mxu0 }
 0x330   : > { %3175 = vst [vmem:[#allocation3 + $0x99] sm:$0xff] %v3142_v4  ;;  %v3074_v15 = vmul.f32 %v7268_v10, %v9231_v63  ;;  %v2942_v16 = vpop.f32.mrb[13].mxu0  ;;  %7337 = vmatpush3.bf16.msra.mxu1 %v8311_v6  ;;  %v3298_v21 = vpack.c.bf16 %v3142_v4, %v3141_v55 }
 0x331   : > { %3173 = vst [vmem:[#allocation3 + $0x81] sm:$0xff] %v3140_v9  ;;  %v3072_v35 = vmul.f32 %v9231_v63, %v2942_v16  ;;  %v7269_v49 = vpop.f32.mrb[14].mxu0  ;;  %v3297_v30 = vpack.c.bf16 %v3140_v9, %v3139_v61  ;;  %7338 = vmatprep.subr.bf16.mxu1 %v8312_v3  ;;  %v9315_v61 = vld [vmem:[%s9934_s4 + $0x80] sm:$0xff]  }
 0x332   : > { %v3113_v8 = vadd.f32 %v9236_v11, %v3074_v15  ;;  %v3075_v20 = vmul.f32 %v7269_v49, %v9231_v63  ;;  %v2945_v22 = vpop.f32.mrb[15].mxu0 }
 0x333   : > { %v3111_v31 = vadd.f32 %v9236_v11, %v3072_v35  ;;  %v3073_v33 = vmul.f32 %v9231_v63, %v2945_v22  ;;  %7311 = vmatmul.mubr.bf16.gmra.mrb[4].mxu1 %v3297_v30 }
 0x334   : > { %v3145_v39 = vmax.f32 %v3113_v8, 0.0  ;;  %v3114_v41 = vadd.f32 %v9236_v11, %v3075_v20  ;;  %7314 = vmatprep.mubr.bf16.mxu1 %v3298_v21  ;;  %7339 = vmatpush3.bf16.msra.mxu1 %v8312_v3 }
 0x335   : > { %v3143_v42 = vmax.f32 %v3111_v31, 0.0  ;;  %v3112_v47 = vadd.f32 %v9236_v11, %v3073_v33  ;;  %7340 = vmatprep.subr.bf16.mxu1 %v8313_v58 }
 0x336   : > { %3178 = vst [vmem:[#allocation3 + $0xc1] sm:$0xff] %v3145_v39  ;;  %v3146_v50 = vmax.f32 %v3114_v41, 0.0 }
 0x337   : > { %3176 = vst [vmem:[#allocation3 + $0xa9] sm:$0xff] %v3143_v42  ;;  %v3144_v53 = vmax.f32 %v3112_v47, 0.0  ;;  %v7272_v54 = vpop.f32.mrb[16].mxu0 }
 0x338   : > { %3179 = vst [vmem:[#allocation3 + $0xc9] sm:$0xff] %v3146_v50  ;;  %v3078_v57 = vmul.f32 %v7272_v54, %v9231_v63  ;;  %v2958_v0 = vpop.f32.mrb[17].mxu0  ;;  %v3300_v1 = vpack.c.bf16 %v3146_v50, %v3145_v39  ;;  %7341 = vmatpush3.bf16.msra.mxu1 %v8313_v58 }
 0x339   : > { %3177 = vst [vmem:[#allocation3 + $0xb1] sm:$0xff] %v3144_v53  ;;  %v3076_v28 = vmul.f32 %v9231_v63, %v2958_v0  ;;  %v7273_v40 = vpop.f32.mrb[18].mxu0  ;;  %v3299_v2 = vpack.c.bf16 %v3144_v53, %v3143_v42  ;;  %7342 = vmatprep.subr.bf16.mxu1 %v8314_v48 }
 0x33a   : > { %v3117_v12 = vadd.f32 %v9236_v11, %v3078_v57  ;;  %v3079_v32 = vmul.f32 %v7273_v40, %v9231_v63  ;;  %v2961_v37 = vpop.f32.mrb[19].mxu0 }
 0x33b   : > { %v3115_v43 = vadd.f32 %v9236_v11, %v3076_v28  ;;  %v3077_v44 = vmul.f32 %v9231_v63, %v2961_v37  ;;  %7315 = vmatmul.mubr.bf16.gmra.mrb[8].mxu1 %v3299_v2 }
 0x33c   : > { %v3149_v17 = vmax.f32 %v3117_v12, 0.0  ;;  %v3118_v34 = vadd.f32 %v9236_v11, %v3079_v32  ;;  %7318 = vmatprep.mubr.bf16.mxu1 %v3300_v1  ;;  %7343 = vmatpush3.bf16.msra.mxu1 %v8314_v48 }
 0x33d   : > { %v3147_v18 = vmax.f32 %v3115_v43, 0.0  ;;  %v3116_v19 = vadd.f32 %v9236_v11, %v3077_v44  ;;  %7344 = vmatprep.subr.bf16.mxu1 %v8315_v7  ;;  %v3196_v44 = vld [vmem:[#allocation3] sm:$0xff] }
 0x33e   : > { %3182 = vst [vmem:[#allocation3 + $0xf1] sm:$0xff] %v3149_v17  ;;  %v3150_v25 = vmax.f32 %v3118_v34, 0.0 }
 0x33f   : > { %3180 = vst [vmem:[#allocation3 + $0xd9] sm:$0xff] %v3147_v18  ;;  %v9297_v29 = vmax.f32 %v3116_v19, 0.0  ;;  %v7276_v36 = vpop.f32.mrb[20].mxu0 }
 0x340   : > { %3183 = vst [vmem:[#allocation3 + $0xf9] sm:$0xff] %v3150_v25  ;;  %v3082_v38 = vmul.f32 %v7276_v36, %v9231_v63  ;;  %v2974_v45 = vpop.f32.mrb[21].mxu0  ;;  %v3302_v46 = vpack.c.bf16 %v3150_v25, %v3149_v17  ;;  %7345 = vmatpush3.bf16.msra.mxu1 %v8315_v7  ;;  %v3199_v25 = vld [vmem:[#allocation3 + $0x20] sm:$0xff]  ;;  %v3198_v36 = vld [vmem:[#allocation3 + $0x18] sm:$0xff] }
 0x341   : > { %3181 = vst [vmem:[#allocation3 + $0xe1] sm:$0xff] %v9297_v29  ;;  %v3080_v51 = vmul.f32 %v9231_v63, %v2974_v45  ;;  %v7277_v52 = vpop.f32.mrb[22].mxu0  ;;  %v3301_v59 = vpack.c.bf16 %v9297_v29, %v3147_v18  ;;  %7346 = vmatprep.subr.bf16.mxu1 %v8316_v23  ;;  %v9346_v18 = vld [vmem:[#allocation3 + $0x8] sm:$0xff]  ;;  %v3200_v45 = vld [vmem:[#allocation3 + $0x30] sm:$0xff] }
 0x342   : > { %v3121_v5 = vadd.f32 %v9236_v11, %v3082_v38  ;;  %v3083_v6 = vmul.f32 %v7277_v52, %v9231_v63  ;;  %v2977_v13 = vpop.f32.mrb[23].mxu0  ;;  %v9354_v38 = vpack.c.bf16 %v3199_v25, %v3198_v36  ;;  %v8320_v52 = vld [vmem:[%s9934_s4 + $0x90] sm:$0xff]   ;;  %v3747_v36 = vld [vmem:[#allocation3 + $0x32] sm:$0xff] }
 0x343   : > { %v3119_v14 = vadd.f32 %v9236_v11, %v3080_v51  ;;  %v3081_v24 = vmul.f32 %v9231_v63, %v2977_v13  ;;  %7319 = vmatmul.mubr.bf16.gmra.mrb[12].mxu1 %v3301_v59  ;;  %v3203_v59 = vld [vmem:[#allocation3 + $0x50] sm:$0xff]  ;;  %v3204_v13 = vld [vmem:[#allocation3 + $0x60] sm:$0xff] }
 0x344   : > { %v3153_v26 = vmax.f32 %v3121_v5, 0.0  ;;  %v3122_v27 = vadd.f32 %v9236_v11, %v3083_v6  ;;  %7322 = vmatprep.mubr.bf16.mxu1 %v3302_v46  ;;  %7347 = vmatpush3.bf16.msra.mxu1 %v8316_v23  ;;  %v8319_v46 = vld [vmem:[%s9934_s4 + $0x88] sm:$0xff]   ;;  %v3202_v5 = vld [vmem:[#allocation3 + $0x48] sm:$0xff] }
 0x345   : > { %v3151_v55 = vmax.f32 %v3119_v14, 0.0  ;;  %v3120_v56 = vadd.f32 %v9236_v11, %v3081_v24  ;;  %7348 = vmatprep.subr.bf16.mxu1 %v8317_v60  ;;  %v9367_v6 = vpack.c.bf16 %v3203_v59, %v3202_v5  ;;  %v8321_v14 = vld [vmem:[%s9934_s4 + $0x98] sm:$0xff]   ;;  %v3745_v25 = vld [vmem:[#allocation3 + $0x1a] sm:$0xff] }
 0x346   : > { %3186 = vst [vmem:[#allocation3 + $0x121] sm:$0xff] %v3153_v26  ;;  %v3154_v62 = vmax.f32 %v3122_v27, 0.0  ;;  %v3207_v27 = vld [vmem:[#allocation3 + $0x80] sm:$0xff]  ;;  %v3749_v5 = vld [vmem:[#allocation3 + $0x4a] sm:$0xff] }
 0x347   : > { %3184 = vst [vmem:[#allocation3 + $0x109] sm:$0xff] %v3151_v55  ;;  %v3152_v3 = vmax.f32 %v3120_v56, 0.0  ;;  %v7280_v4 = vpop.f32.mrb[24].mxu0  ;;  %v3206_v56 = vld [vmem:[#allocation3 + $0x78] sm:$0xff] }
 0x348   : > { %3187 = vst [vmem:[#allocation3 + $0x129] sm:$0xff] %v3154_v62  ;;  %v3086_v9 = vmul.f32 %v7280_v4, %v9231_v63  ;;  %v2990_v10 = vpop.f32.mrb[25].mxu0  ;;  %v9318_v15 = vpack.c.bf16 %v3154_v62, %v3153_v26  ;;  %7349 = vmatpush3.bf16.msra.mxu1 %v8317_v60  ;;  %v3205_v60 = vld [vmem:[#allocation3 + $0x68] sm:$0xff]  ;;  %v8322_v26 = vld [vmem:[%s9934_s4 + $0xa0] sm:$0xff]  }
 0x349   : > { %3185 = vst [vmem:[#allocation3 + $0x111] sm:$0xff] %v3152_v3  ;;  %v3084_v16 = vmul.f32 %v9231_v63, %v2990_v10  ;;  %v7281_v21 = vpop.f32.mrb[26].mxu0  ;;  %v9321_v35 = vpack.c.bf16 %v3152_v3, %v3151_v55  ;;  %7382 = vmatprep.subr.bf16.mxu1 %v9315_v61  ;;  %v9372_v24 = vpack.c.bf16 %v3205_v60, %v3204_v13  ;;  %v3209_v55 = vld [vmem:[#allocation3 + $0x98] sm:$0xff]  ;;  %v3208_v62 = vld [vmem:[#allocation3 + $0x90] sm:$0xff]  ;;  %v8328_v60 = vld [vmem:[%s9934_s4 + $0xd0] sm:$0xff]  }
 0x34a   : > { %v3125_v49 = vadd.f32 %v9236_v11, %v3086_v9  ;;  %v3087_v30 = vmul.f32 %v7281_v21, %v9231_v63  ;;  %v2993_v58 = vpop.f32.mrb[27].mxu0  ;;  %v8323_v3 = vld [vmem:[%s9934_s4 + $0xa8] sm:$0xff]   ;;  %v9384_v4 = vpack.c.bf16 %v3209_v55, %v3208_v62  ;;  %v8324_v9 = vld [vmem:[%s9934_s4 + $0xb0] sm:$0xff]   ;;  %v3211_v10 = vld [vmem:[#allocation3 + $0xb0] sm:$0xff] }
 0x34b   : > { %v3123_v8 = vadd.f32 %v9236_v11, %v3084_v16  ;;  %v3085_v20 = vmul.f32 %v9231_v63, %v2993_v58  ;;  %7323 = vmatmul.mubr.bf16.gmra.mrb[16].mxu1 %v9321_v35  ;;  %v3213_v16 = vld [vmem:[#allocation3 + $0xc8] sm:$0xff]  ;;  %v3750_v13 = vld [vmem:[#allocation3 + $0x52] sm:$0xff] }
 0x34c   : > { %v3157_v22 = vmax.f32 %v3125_v49, 0.0  ;;  %v3126_v31 = vadd.f32 %v9236_v11, %v3087_v30  ;;  %7326 = vmatprep.mubr.bf16.mxu1 %v9318_v15  ;;  %v3210_v21 = vld [vmem:[#allocation3 + $0xa8] sm:$0xff]  ;;  %v3212_v30 = vld [vmem:[#allocation3 + $0xc0] sm:$0xff]  ;;  %v8330_v62 = vld [vmem:[%s9934_s4 + $0xe0] sm:$0xff]  }
 0x34d   : > { %v3155_v33 = vmax.f32 %v3123_v8, 0.0  ;;  %v3124_v39 = vadd.f32 %v9236_v11, %v3085_v20  ;;  %v9391_v49 = vpack.c.bf16 %v3211_v10, %v3210_v21  ;;  %v8325_v58 = vld [vmem:[%s9934_s4 + $0xb8] sm:$0xff]   ;;  %v9396_v8 = vpack.c.bf16 %v3213_v16, %v3212_v30  ;;  %v8326_v20 = vld [vmem:[%s9934_s4 + $0xc0] sm:$0xff]   ;;  %v3756_v16 = vld [vmem:[#allocation3 + $0x9a] sm:$0xff] }
 0x34e   : > { %3190 = vst [vmem:[#allocation3 + $0x151] sm:$0xff] %v3157_v22  ;;  %v3158_v41 = vmax.f32 %v3126_v31, 0.0  ;;  %v3217_v31 = vld [vmem:[#allocation3 + $0xf8] sm:$0xff]  ;;  %v8329_v55 = vld [vmem:[%s9934_s4 + $0xd8] sm:$0xff]  }
 0x34f   : > { %3188 = vst [vmem:[#allocation3 + $0x139] sm:$0xff] %v3155_v33  ;;  %v3156_v42 = vmax.f32 %v3124_v39, 0.0  ;;  %v7284_v47 = vpop.f32.mrb[28].mxu0  ;;  %v3755_v10 = vld [vmem:[#allocation3 + $0x92] sm:$0xff] }
 0x350   : > { %3191 = vst [vmem:[#allocation3 + $0x159] sm:$0xff] %v3158_v41  ;;  %v3090_v48 = vmul.f32 %v7284_v47, %v9231_v63  ;;  %v3006_v50 = vpop.f32.mrb[29].mxu0  ;;  %v9333_v53 = vpack.c.bf16 %v3158_v41, %v3157_v22  ;;  %v3215_v22 = vld [vmem:[#allocation3 + $0xe0] sm:$0xff]  ;;  %v3216_v41 = vld [vmem:[#allocation3 + $0xf0] sm:$0xff]  ;;  %v8331_v30 = vld [vmem:[%s9934_s4 + $0xe8] sm:$0xff]  }
 0x351   : > { %3189 = vst [vmem:[#allocation3 + $0x141] sm:$0xff] %v3156_v42  ;;  %v3088_v54 = vmul.f32 %v9231_v63, %v3006_v50  ;;  %v7285_v57 = vpop.f32.mrb[30].mxu0  ;;  %v9336_v0 = vpack.c.bf16 %v3156_v42, %v3155_v33  ;;  %v3214_v33 = vld [vmem:[#allocation3 + $0xd8] sm:$0xff]  ;;  %v9405_v42 = vpack.c.bf16 %v3217_v31, %v3216_v41  ;;  %v3219_v47 = vld [vmem:[#allocation3 + $0x110] sm:$0xff]  ;;  %v3218_v50 = vld [vmem:[#allocation3 + $0x108] sm:$0xff] }
 0x352   : > { %v3129_v1 = vadd.f32 %v9236_v11, %v3090_v48  ;;  %v3091_v28 = vmul.f32 %v7285_v57, %v9231_v63  ;;  %v3009_v40 = vpop.f32.mrb[31].mxu0  ;;  %v9403_v39 = vpack.c.bf16 %v3215_v22, %v3214_v33  ;;  %v3221_v48 = vld [vmem:[#allocation3 + $0x128] sm:$0xff]  ;;  %v3220_v57 = vld [vmem:[#allocation3 + $0x120] sm:$0xff]  ;;  %v3758_v31 = vld [vmem:[#allocation3 + $0xb2] sm:$0xff] }
 0x353   : > { %v3127_v2 = vadd.f32 %v9236_v11, %v3088_v54  ;;  %v3089_v7 = vmul.f32 %v9231_v63, %v3009_v40  ;;  %7327 = vmatmul.mubr.bf16.gmra.mrb[20].mxu1 %v9336_v0  ;;  %v3228_v63 = vpack.c.bf16 %v9346_v18, %v3196_v44  ;;  %v9409_v54 = vpack.c.bf16 %v3219_v47, %v3218_v50  ;;  %v3757_v22 = vld [vmem:[#allocation3 + $0xaa] sm:$0xff]  ;;  %v3759_v33 = vld [vmem:[#allocation3 + $0xc2] sm:$0xff] }
 0x354   : > { %v3161_v12 = vmax.f32 %v3129_v1, 0.0  ;;  %v3130_v32 = vadd.f32 %v9236_v11, %v3091_v28  ;;  %7330 = vmatprep.mubr.bf16.mxu1 %v9333_v53  ;;  %v9411_v1 = vpack.c.bf16 %v3221_v48, %v3220_v57  ;;  %v3760_v41 = vld [vmem:[#allocation3 + $0xca] sm:$0xff]  ;;  %v9460_v47 = vpack.c.bf16 %v3758_v31, %v3757_v22 }
 0x355   : > { %v3159_v37 = vmax.f32 %v3127_v2, 0.0  ;;  %v3128_v43 = vadd.f32 %v9236_v11, %v3089_v7  ;;  %v3201_v11 = vld [vmem:[#allocation3 + $0x38] sm:$0xff]  ;;  %v8333_v48 = vld [vmem:[%s9934_s4 + $0xf8] sm:$0xff]   ;;  %v9465_v50 = vpack.c.bf16 %v3760_v41, %v3759_v33  ;;  %v8334_v57 = vld [vmem:[%s9934_s4 + $0x100] sm:$0xff]  }
 0x356   : > { %3194 = vst [vmem:[#allocation3 + $0x181] sm:$0xff] %v3161_v12  ;;  %v3162_v17 = vmax.f32 %v3130_v32, 0.0  ;;  %v9359_v51 = vpack.c.bf16 %v3201_v11, %v3200_v45  ;;  %v3222_v2 = vld [vmem:[#allocation3 + $0x138] sm:$0xff]  ;;  %v3746_v11 = vld [vmem:[#allocation3 + $0x22] sm:$0xff] }
 0x357   : > { %3192 = vst [vmem:[#allocation3 + $0x169] sm:$0xff] %v3159_v37  ;;  %v3160_v34 = vmax.f32 %v3128_v43, 0.0  ;;  %v3225_v40 = vld [vmem:[#allocation3 + $0x158] sm:$0xff]  ;;  %v3744_v43 = vld [vmem:[#allocation3 + $0xa] sm:$0xff] }
 0x358   : > { %3195 = vst [vmem:[#allocation3 + $0x189] sm:$0xff] %v3162_v17  ;;  %v9349_v19 = vpack.c.bf16 %v3162_v17, %v3161_v12  ;;  %v3223_v28 = vld [vmem:[#allocation3 + $0x140] sm:$0xff]  ;;  %v3224_v12 = vld [vmem:[#allocation3 + $0x150] sm:$0xff]  ;;  %v8341_v41 = vld [vmem:[%s9934_s4 + $0x138] sm:$0xff]  }
 0x359   : > { %3193 = vst [vmem:[#allocation3 + $0x171] sm:$0xff] %v3160_v34  ;;  %v9351_v23 = vpack.c.bf16 %v3160_v34, %v3159_v37  ;;  %v9415_v7 = vpack.c.bf16 %v3223_v28, %v3222_v2  ;;  %v9417_v32 = vpack.c.bf16 %v3225_v40, %v3224_v12  ;;  %v3743_v37 = vld [vmem:[#allocation3 + $0x2] sm:$0xff]  ;;  %v3748_v45 = vld [vmem:[#allocation3 + $0x3a] sm:$0xff]  ;;  %v3763_v2 = vld [vmem:[#allocation3 + $0xf2] sm:$0xff] }
 0x35a   : > { %v3775_v34 = vpack.c.bf16 %v3744_v43, %v3743_v37  ;;  %v9429_v59 = vpack.c.bf16 %v3748_v45, %v3747_v36  ;;  %v3761_v28 = vld [vmem:[#allocation3 + $0xda] sm:$0xff]  ;;  %v3762_v40 = vld [vmem:[#allocation3 + $0xe2] sm:$0xff] }
 0x35b   : > { %7331 = vmatmul.mubr.bf16.gmra.mrb[24].mxu1 %v9351_v23  ;;  %v3764_v12 = vld [vmem:[#allocation3 + $0xfa] sm:$0xff]  ;;  %v9472_v37 = vpack.c.bf16 %v3762_v40, %v3761_v28 }
 0x35c   : > { %7350 = vmatprep.mubr.bf16.mxu1 %v3228_v63  ;;  %v9474_v43 = vpack.c.bf16 %v3764_v12, %v3763_v2  ;;  %v3769_v45 = vld [vmem:[#allocation3 + $0x13a] sm:$0xff] }
 0x35d   : > { %v4356_v28 = vld [vmem:[#allocation3 + $0x21] sm:$0xff]  ;;  %v4355_v12 = vld [vmem:[#allocation3 + $0x19] sm:$0xff] }
 0x35e   : > { %v3226_v17 = vld [vmem:[#allocation3 + $0x168] sm:$0xff]  ;;  %v4079_v40 = vld [vmem:[#allocation3 + $0x180] sm:$0xff] }
 0x360   : > { %v3227_v44 = vld [vmem:[#allocation3 + $0x170] sm:$0xff] }
 0x361   : > { %v9421_v63 = vpack.c.bf16 %v3227_v44, %v3226_v17  ;;  %v3765_v44 = vld [vmem:[#allocation3 + $0x10a] sm:$0xff]  ;;  %v3766_v17 = vld [vmem:[#allocation3 + $0x112] sm:$0xff] }
 0x363   : > { %7351 = vmatmul.mubr.bf16.vlgmr.msra.gmra.mrb[28].mxu1 %v9354_v38 }
 0x364   : > { %7383 = vmatpush3.bf16.msra.mxu1 %v9315_v61  ;;  %7354 = vmatprep.mubr.bf16.mxu1 %v9359_v51  ;;  %v9379_v61 = vpack.c.bf16 %v3207_v27, %v3206_v56  ;;  %v9436_v27 = vpack.c.bf16 %v3750_v13, %v3749_v5  ;;  %v3772_v5 = vld [vmem:[#allocation3 + $0x15a] sm:$0xff] }
 0x365   : > { %7384 = vmatprep.subr.bf16.mxu1 %v8319_v46 }
 0x368   : > { %7385 = vmatpush3.bf16.msra.mxu1 %v8319_v46  ;;  %v9424_v46 = vpack.c.bf16 %v3746_v11, %v3745_v25  ;;  %v3768_v25 = vld [vmem:[#allocation3 + $0x12a] sm:$0xff]  ;;  %v9478_v11 = vpack.c.bf16 %v3766_v17, %v3765_v44  ;;  %v4387_v44 = vpack.c.bf16 %v4356_v28, %v4355_v12  ;;  %v4358_v17 = vld [vmem:[#allocation3 + $0x39] sm:$0xff] }
 0x369   : > { %7386 = vmatprep.subr.bf16.mxu1 %v8320_v52  ;;  %v4365_v28 = vld [vmem:[#allocation3 + $0x91] sm:$0xff]  ;;  %v4367_v12 = vld [vmem:[#allocation3 + $0xa9] sm:$0xff] }
 0x36b   : > { %7355 = vmatmul.mubr.bf16.gmra.mrb[0].mxu1 %v9367_v6 }
 0x36c   : > { %7358 = vmatprep.mubr.bf16.mxu1 %v9372_v24  ;;  %7387 = vmatpush3.bf16.msra.mxu1 %v8320_v52  ;;  %v8327_v52 = vld [vmem:[%s9934_s4 + $0xc8] sm:$0xff]  }
 0x36d   : > { %7388 = vmatprep.subr.bf16.mxu1 %v8321_v14 }
 0x370   : > { %7389 = vmatpush3.bf16.msra.mxu1 %v8321_v14  ;;  %v3751_v14 = vld [vmem:[#allocation3 + $0x62] sm:$0xff] }
 0x371   : > { %7390 = vmatprep.subr.bf16.mxu1 %v8322_v26 }
 0x373   : > { %7359 = vmatmul.mubr.bf16.gmra.mrb[4].mxu1 %v9379_v61 }
 0x374   : > { %7362 = vmatprep.mubr.bf16.mxu1 %v9384_v4  ;;  %7391 = vmatpush3.bf16.msra.mxu1 %v8322_v26  ;;  %v3752_v26 = vld [vmem:[#allocation3 + $0x6a] sm:$0xff] }
 0x375   : > { %7392 = vmatprep.subr.bf16.mxu1 %v8323_v3  ;;  %v9441_v56 = vpack.c.bf16 %v3752_v26, %v3751_v14  ;;  %v3773_v26 = vld [vmem:[#allocation3 + $0x16a] sm:$0xff] }
 0x378   : > { %7393 = vmatpush3.bf16.msra.mxu1 %v8323_v3  ;;  %v3753_v3 = vld [vmem:[#allocation3 + $0x7a] sm:$0xff] }
 0x379   : > { %7394 = vmatprep.subr.bf16.mxu1 %v8324_v9 }
 0x37b   : > { %7363 = vmatmul.mubr.bf16.gmra.mrb[8].mxu1 %v9391_v49 }
 0x37c   : > { %7366 = vmatprep.mubr.bf16.mxu1 %v9396_v8  ;;  %7395 = vmatpush3.bf16.msra.mxu1 %v8324_v9  ;;  %v3754_v9 = vld [vmem:[#allocation3 + $0x82] sm:$0xff] }
 0x37d   : > { %7396 = vmatprep.subr.bf16.mxu1 %v8325_v58  ;;  %v9448_v21 = vpack.c.bf16 %v3754_v9, %v3753_v3  ;;  %v8335_v3 = vld [vmem:[%s9934_s4 + $0x108] sm:$0xff]   ;;  %v8336_v9 = vld [vmem:[%s9934_s4 + $0x110] sm:$0xff]  }
 0x380   : > { %7397 = vmatpush3.bf16.msra.mxu1 %v8325_v58  ;;  %v9453_v58 = vpack.c.bf16 %v3756_v16, %v3755_v10  ;;  %v8338_v10 = vld [vmem:[%s9934_s4 + $0x120] sm:$0xff]   ;;  %v8339_v16 = vld [vmem:[%s9934_s4 + $0x128] sm:$0xff]  }
 0x381   : > { %7430 = vmatprep.subr.bf16.mxu1 %v8326_v20 }
 0x383   : > { %7367 = vmatmul.mubr.bf16.gmra.mrb[12].mxu1 %v9403_v39 }
 0x384   : > { %7370 = vmatprep.mubr.bf16.mxu1 %v9405_v42 }
 0x38b   : > { %7371 = vmatmul.mubr.bf16.gmra.mrb[16].mxu1 %v9409_v54 }
 0x38c   : > { %7374 = vmatprep.mubr.bf16.mxu1 %v9411_v1 }
 0x393   : > { %7375 = vmatmul.mubr.bf16.gmra.mrb[20].mxu1 %v9415_v7 }
 0x394   : > { %7378 = vmatprep.mubr.bf16.mxu1 %v9417_v32 }
 0x39b   : > { %7379 = vmatmul.mubr.bf16.gmra.mrb[24].mxu1 %v9421_v63 }
 0x39c   : > { %7398 = vmatprep.mubr.bf16.mxu1 %v3775_v34  ;;  %v3767_v34 = vld [vmem:[#allocation3 + $0x122] sm:$0xff] }
 0x39d   : > { %v9480_v36 = vpack.c.bf16 %v3768_v25, %v3767_v34  ;;  %v4360_v34 = vld [vmem:[#allocation3 + $0x51] sm:$0xff] }
 0x39e   : > { %v4357_v25 = vld [vmem:[#allocation3 + $0x31] sm:$0xff] }
 0x3a3   : > { %7399 = vmatmul.mubr.bf16.vlgmr.msra.gmra.mrb[28].mxu1 %v9424_v46 }
 0x3a4   : > { %7431 = vmatpush3.bf16.msra.mxu1 %v8326_v20  ;;  %7402 = vmatprep.mubr.bf16.mxu1 %v9429_v59  ;;  %v8332_v20 = vld [vmem:[%s9934_s4 + $0xf0] sm:$0xff]  }
 0x3a5   : > { %7432 = vmatprep.subr.bf16.mxu1 %v8327_v52 }
 0x3a8   : > { %7433 = vmatpush3.bf16.msra.mxu1 %v8327_v52  ;;  %v3770_v52 = vld [vmem:[#allocation3 + $0x142] sm:$0xff] }
 0x3a9   : > { %7434 = vmatprep.subr.bf16.mxu1 %v8328_v60  ;;  %v9484_v13 = vpack.c.bf16 %v3770_v52, %v3769_v45  ;;  %v9543_v45 = vpack.c.bf16 %v4358_v17, %v4357_v25  ;;  %v4359_v52 = vld [vmem:[#allocation3 + $0x49] sm:$0xff] }
 0x3aa   : > { %v4370_v25 = vld [vmem:[#allocation3 + $0xc9] sm:$0xff] }
 0x3ab   : > { %7403 = vmatmul.mubr.bf16.gmra.mrb[0].mxu1 %v9436_v27 }
 0x3ac   : > { %7406 = vmatprep.mubr.bf16.mxu1 %v9441_v56  ;;  %7435 = vmatpush3.bf16.msra.mxu1 %v8328_v60  ;;  %v3771_v60 = vld [vmem:[#allocation3 + $0x152] sm:$0xff] }
 0x3ad   : > { %7436 = vmatprep.subr.bf16.mxu1 %v8329_v55  ;;  %v9486_v14 = vpack.c.bf16 %v3772_v5, %v3771_v60  ;;  %v8343_v60 = vld [vmem:[%s9934_s4 + $0x148] sm:$0xff]   ;;  %v9548_v5 = vpack.c.bf16 %v4360_v34, %v4359_v52  ;;  %v8348_v34 = vld [vmem:[%s9934_s4 + $0x170] sm:$0xff]  }
 0x3ae   : > { %v9579_v52 = vld [vmem:[#allocation3 + $0xd9] sm:$0xff] }
 0x3b0   : > { %7437 = vmatpush3.bf16.msra.mxu1 %v8329_v55  ;;  %v3774_v55 = vld [vmem:[#allocation3 + $0x172] sm:$0xff] }
 0x3b1   : > { %7438 = vmatprep.subr.bf16.mxu1 %v8330_v62 }
 0x3b3   : > { %7407 = vmatmul.mubr.bf16.gmra.mrb[4].mxu1 %v9448_v21 }
 0x3b4   : > { %7410 = vmatprep.mubr.bf16.mxu1 %v9453_v58  ;;  %7439 = vmatpush3.bf16.msra.mxu1 %v8330_v62  ;;  %v9490_v62 = vpack.c.bf16 %v3774_v55, %v3773_v26  ;;  %v8344_v26 = vld [vmem:[%s9934_s4 + $0x150] sm:$0xff]   ;;  %v4362_v55 = vld [vmem:[#allocation3 + $0x69] sm:$0xff] }
 0x3b5   : > { %7440 = vmatprep.subr.bf16.mxu1 %v8331_v30 }
 0x3b8   : > { %7441 = vmatpush3.bf16.msra.mxu1 %v8331_v30  ;;  %v8340_v30 = vld [vmem:[%s9934_s4 + $0x130] sm:$0xff]  }
 0x3b9   : > { %7442 = vmatprep.subr.bf16.mxu1 %v8332_v20 }
 0x3bb   : > { %7411 = vmatmul.mubr.bf16.gmra.mrb[8].mxu1 %v9460_v47 }
 0x3bc   : > { %7414 = vmatprep.mubr.bf16.mxu1 %v9465_v50  ;;  %7443 = vmatpush3.bf16.msra.mxu1 %v8332_v20 }
 0x3bd   : > { %7444 = vmatprep.subr.bf16.mxu1 %v8333_v48 }
 0x3c0   : > { %7445 = vmatpush3.bf16.msra.mxu1 %v8333_v48  ;;  %v8342_v48 = vld [vmem:[%s9934_s4 + $0x140] sm:$0xff]  }
 0x3c1   : > { %7478 = vmatprep.subr.bf16.mxu1 %v8334_v57 }
 0x3c3   : > { %7415 = vmatmul.mubr.bf16.gmra.mrb[12].mxu1 %v9472_v37 }
 0x3c4   : > { %7418 = vmatprep.mubr.bf16.mxu1 %v9474_v43 }
 0x3cb   : > { %7419 = vmatmul.mubr.bf16.gmra.mrb[16].mxu1 %v9478_v11 }
 0x3cc   : > { %7422 = vmatprep.mubr.bf16.mxu1 %v9480_v36 }
 0x3d3   : > { %7423 = vmatmul.mubr.bf16.gmra.mrb[20].mxu1 %v9484_v13 }
 0x3d4   : > { %7426 = vmatprep.mubr.bf16.mxu1 %v9486_v14 }
 0x3db   : > { %7427 = vmatmul.mubr.bf16.gmra.mrb[24].mxu1 %v9490_v62 }
 0x3dc   : > { %7446 = vmatprep.mubr.bf16.mxu1 %v9354_v38  ;;  %v8337_v38 = vld [vmem:[%s9934_s4 + $0x118] sm:$0xff]  }
 0x3e3   : > { %7447 = vmatmul.mubr.bf16.vlgmr.msra.gmra.mrb[28].mxu1 %v9359_v51 }
 0x3e4   : > { %7479 = vmatpush3.bf16.msra.mxu1 %v8334_v57  ;;  %7450 = vmatprep.mubr.bf16.mxu1 %v9367_v6  ;;  %v4080_v57 = vld [vmem:[#allocation3 + $0x188] sm:$0xff] }
 0x3e5   : > { %7480 = vmatprep.subr.bf16.mxu1 %v8335_v3  ;;  %v9540_v2 = vpack.c.bf16 %v4080_v57, %v4079_v40  ;;  %v4368_v57 = vld [vmem:[#allocation3 + $0xb1] sm:$0xff] }
 0x3e6   : > { %v9572_v17 = vpack.c.bf16 %v4368_v57, %v4367_v12  ;;  %v5303_v57 = vld [vmem:[#allocation3 + $0x189] sm:$0xff]  ;;  %v5302_v12 = vld [vmem:[#allocation3 + $0x181] sm:$0xff] }
 0x3e8   : > { %7481 = vmatpush3.bf16.msra.mxu1 %v8335_v3  ;;  %v4364_v3 = vld [vmem:[#allocation3 + $0x81] sm:$0xff] }
 0x3e9   : > { %7482 = vmatprep.subr.bf16.mxu1 %v8336_v9 }
 0x3eb   : > { %7451 = vmatmul.mubr.bf16.gmra.mrb[0].mxu1 %v9372_v24 }
 0x3ec   : > { %7454 = vmatprep.mubr.bf16.mxu1 %v9379_v61  ;;  %7483 = vmatpush3.bf16.msra.mxu1 %v8336_v9  ;;  %v4361_v9 = vld [vmem:[#allocation3 + $0x61] sm:$0xff] }
 0x3ed   : > { %7484 = vmatprep.subr.bf16.mxu1 %v8337_v38 }
 0x3f0   : > { %7485 = vmatpush3.bf16.msra.mxu1 %v8337_v38  ;;  %v9555_v38 = vpack.c.bf16 %v4362_v55, %v4361_v9  ;;  %v8349_v55 = vld [vmem:[%s9934_s4 + $0x178] sm:$0xff]   ;;  %v8350_v9 = vld [vmem:[%s9934_s4 + $0x180] sm:$0xff]  }
 0x3f1   : > { %7486 = vmatprep.subr.bf16.mxu1 %v8338_v10 }
 0x3f3   : > { %7455 = vmatmul.mubr.bf16.gmra.mrb[4].mxu1 %v9384_v4 }
 0x3f4   : > { %7458 = vmatprep.mubr.bf16.mxu1 %v9391_v49  ;;  %7487 = vmatpush3.bf16.msra.mxu1 %v8338_v10  ;;  %v4363_v10 = vld [vmem:[#allocation3 + $0x79] sm:$0xff] }
 0x3f5   : > { %7488 = vmatprep.subr.bf16.mxu1 %v8339_v16 }
 0x3f6   : > { %v9518_v20 = vpop.f32.mrb[32].mxu0 }
 0x3f7   : > { %v9520_v22 = vpop.f32.mrb[33].mxu0 }
 0x3f8   : > { %v9522_v31 = vpop.f32.mrb[34].mxu0  ;;  %7489 = vmatpush3.bf16.msra.mxu1 %v8339_v16  ;;  %v8345_v16 = vld [vmem:[%s9934_s4 + $0x158] sm:$0xff]  }
 0x3f9   : > { %v9524_v33 = vpop.f32.mrb[35].mxu0  ;;  %7490 = vmatprep.subr.bf16.mxu1 %v8340_v30 }
 0x3fb   : > { %7459 = vmatmul.mubr.bf16.gmra.mrb[8].mxu1 %v9396_v8 }
 0x3fc   : > { %7462 = vmatprep.mubr.bf16.mxu1 %v9403_v39  ;;  %7491 = vmatpush3.bf16.msra.mxu1 %v8340_v30  ;;  %v9560_v30 = vpack.c.bf16 %v4364_v3, %v4363_v10  ;;  %v4395_v3 = vpack.c.bf16 %v9297_v29, %v9579_v52  ;;  %v4374_v10 = vld [vmem:[#allocation3 + $0xf9] sm:$0xff] }
 0x3fd   : > { %7492 = vmatprep.subr.bf16.mxu1 %v8341_v41  ;;  %v8351_v29 = vld [vmem:[%s9934_s4 + $0x188] sm:$0xff]  }
 0x400   : > { %7493 = vmatpush3.bf16.msra.mxu1 %v8341_v41  ;;  %v8346_v41 = vld [vmem:[%s9934_s4 + $0x160] sm:$0xff]  }
 0x401   : > { %7526 = vmatprep.subr.bf16.mxu1 %v8342_v48 }
 0x403   : > { %7463 = vmatmul.mubr.bf16.gmra.mrb[12].mxu1 %v9405_v42 }
 0x404   : > { %7466 = vmatprep.mubr.bf16.mxu1 %v9409_v54 }
 0x40b   : > { %7467 = vmatmul.mubr.bf16.gmra.mrb[16].mxu1 %v9411_v1 }
 0x40c   : > { %7470 = vmatprep.mubr.bf16.mxu1 %v9415_v7 }
 0x413   : > { %7471 = vmatmul.mubr.bf16.gmra.mrb[20].mxu1 %v9417_v32 }
 0x414   : > { %7474 = vmatprep.mubr.bf16.mxu1 %v9421_v63 }
 0x41b   : > { %7475 = vmatmul.mubr.bf16.gmra.mrb[24].mxu1 %v9540_v2 }
 0x41c   : > { %7494 = vmatprep.mubr.bf16.mxu1 %v4387_v44  ;;  %v8347_v44 = vld [vmem:[%s9934_s4 + $0x168] sm:$0xff]  }
 0x423   : > { %7495 = vmatmul.mubr.bf16.vlgmr.msra.gmra.mrb[28].mxu1 %v9543_v45 }
 0x424   : > { %7527 = vmatpush3.bf16.msra.mxu1 %v8342_v48  ;;  %7498 = vmatprep.mubr.bf16.mxu1 %v9548_v5  ;;  %v4366_v48 = vld [vmem:[#allocation3 + $0x99] sm:$0xff] }
 0x425   : > { %7528 = vmatprep.subr.bf16.mxu1 %v8343_v60  ;;  %v9567_v40 = vpack.c.bf16 %v4366_v48, %v4365_v28  ;;  %v5301_v48 = vld [vmem:[#allocation3 + $0x171] sm:$0xff]  ;;  %v5300_v28 = vld [vmem:[#allocation3 + $0x169] sm:$0xff] }
 0x428   : > { %7529 = vmatpush3.bf16.msra.mxu1 %v8343_v60  ;;  %v4369_v60 = vld [vmem:[#allocation3 + $0xc1] sm:$0xff] }
 0x429   : > { %7530 = vmatprep.subr.bf16.mxu1 %v8344_v26 }
 0x42b   : > { %7499 = vmatmul.mubr.bf16.gmra.mrb[0].mxu1 %v9555_v38 }
 0x42c   : > { %7502 = vmatprep.mubr.bf16.mxu1 %v9560_v30  ;;  %7531 = vmatpush3.bf16.msra.mxu1 %v8344_v26  ;;  %v9581_v26 = vpack.c.bf16 %v4370_v25, %v4369_v60  ;;  %v5581_v60 = vld [vmem:[#allocation3 + $0x3a] sm:$0xff] }
 0x42d   : > { %7532 = vmatprep.subr.bf16.mxu1 %v8345_v16 }
 0x430   : > { %7533 = vmatpush3.bf16.msra.mxu1 %v8345_v16  ;;  %v4373_v16 = vld [vmem:[#allocation3 + $0xf1] sm:$0xff] }
 0x431   : > { %7534 = vmatprep.subr.bf16.mxu1 %v8346_v41 }
 0x433   : > { %7503 = vmatmul.mubr.bf16.gmra.mrb[4].mxu1 %v9567_v40 }
 0x434   : > { %7506 = vmatprep.mubr.bf16.mxu1 %v9572_v17  ;;  %7535 = vmatpush3.bf16.msra.mxu1 %v8346_v41  ;;  %v9592_v41 = vpack.c.bf16 %v4374_v10, %v4373_v16  ;;  %v5585_v10 = vld [vmem:[#allocation3 + $0x6a] sm:$0xff] }
 0x435   : > { %7536 = vmatprep.subr.bf16.mxu1 %v8347_v44 }
 0x438   : > { %7537 = vmatpush3.bf16.msra.mxu1 %v8347_v44  ;;  %v5320_v44 = vpack.c.bf16 %v5303_v57, %v5302_v12 }
 0x439   : > { %7538 = vmatprep.subr.bf16.mxu1 %v8348_v34 }
 0x43b   : > { %7507 = vmatmul.mubr.bf16.gmra.mrb[8].mxu1 %v9581_v26 }
 0x43c   : > { %7510 = vmatprep.mubr.bf16.mxu1 %v4395_v3  ;;  %7539 = vmatpush3.bf16.msra.mxu1 %v8348_v34  ;;  %v5305_v34 = vld [vmem:[#allocation3 + $0x1a1] sm:$0xff]  ;;  %v5583_v3 = vld [vmem:[#allocation3 + $0x52] sm:$0xff] }
 0x43d   : > { %7540 = vmatprep.subr.bf16.mxu1 %v8349_v55 }
 0x440   : > { %7541 = vmatpush3.bf16.msra.mxu1 %v8349_v55  ;;  %v5582_v55 = vld [vmem:[#allocation3 + $0x4a] sm:$0xff] }
 0x441   : > { %7574 = vmatprep.subr.bf16.mxu1 %v8350_v9  ;;  %v5613_v16 = vpack.c.bf16 %v5583_v3, %v5582_v55 }
 0x443   : > { %7511 = vmatmul.mubr.bf16.gmra.mrb[12].mxu1 %v9592_v41 }
 0x444   : > { %7514 = vmatprep.mubr.bf16.mxu1 %v9321_v35  ;;  %v8353_v35 = vld [vmem:[%s9934_s4 + $0x198] sm:$0xff]  }
 0x44b   : > { %7515 = vmatmul.mubr.bf16.gmra.mrb[16].mxu1 %v9318_v15  ;;  %v8352_v15 = vld [vmem:[%s9934_s4 + $0x190] sm:$0xff]  }
 0x44c   : > { %7518 = vmatprep.mubr.bf16.mxu1 %v9336_v0  ;;  %v8355_v0 = vld [vmem:[%s9934_s4 + $0x1a8] sm:$0xff]  }
 0x453   : > { %7519 = vmatmul.mubr.bf16.gmra.mrb[20].mxu1 %v9333_v53  ;;  %v8354_v53 = vld [vmem:[%s9934_s4 + $0x1a0] sm:$0xff]  }
 0x454   : > { %7522 = vmatprep.mubr.bf16.mxu1 %v9351_v23  ;;  %v8357_v23 = vld [vmem:[%s9934_s4 + $0x1b8] sm:$0xff]  }
 0x45b   : > { %7523 = vmatmul.mubr.bf16.gmra.mrb[24].mxu1 %v9349_v19  ;;  %v8356_v19 = vld [vmem:[%s9934_s4 + $0x1b0] sm:$0xff]  }
 0x45c   : > { %7542 = vmatprep.mubr.bf16.mxu1 %v9424_v46  ;;  %v8358_v46 = vld [vmem:[%s9934_s4 + $0x1c0] sm:$0xff]  }
 0x463   : > { %7543 = vmatmul.mubr.bf16.vlgmr.msra.gmra.mrb[28].mxu1 %v9429_v59  ;;  %v4691_v59 = vld [vmem:[#allocation3 + $0x182] sm:$0xff] }
 0x464   : > { %7575 = vmatpush3.bf16.msra.mxu1 %v8350_v9  ;;  %7546 = vmatprep.mubr.bf16.mxu1 %v9436_v27  ;;  %v4692_v27 = vld [vmem:[#allocation3 + $0x18a] sm:$0xff]  ;;  %v5584_v9 = vld [vmem:[#allocation3 + $0x62] sm:$0xff] }
 0x465   : > { %7576 = vmatprep.subr.bf16.mxu1 %v8351_v29 }
 0x468   : > { %7577 = vmatpush3.bf16.msra.mxu1 %v8351_v29  ;;  %v5586_v29 = vld [vmem:[#allocation3 + $0x7a] sm:$0xff] }
 0x469   : > { %7578 = vmatprep.subr.bf16.mxu1 %v8352_v15 }
 0x46b   : > { %7547 = vmatmul.mubr.bf16.gmra.mrb[0].mxu1 %v9441_v56  ;;  %v9640_v56 = vpack.c.bf16 %v4692_v27, %v4691_v59  ;;  %v5592_v59 = vld [vmem:[#allocation3 + $0xc2] sm:$0xff]  ;;  %v5593_v27 = vld [vmem:[#allocation3 + $0xca] sm:$0xff] }
 0x46c   : > { %7550 = vmatprep.mubr.bf16.mxu1 %v9448_v21  ;;  %7579 = vmatpush3.bf16.msra.mxu1 %v8352_v15  ;;  %v8359_v21 = vld [vmem:[%s9934_s4 + $0x1c8] sm:$0xff]   ;;  %v5587_v15 = vld [vmem:[#allocation3 + $0x82] sm:$0xff] }
 0x46d   : > { %7580 = vmatprep.subr.bf16.mxu1 %v8353_v35 }
 0x470   : > { %7581 = vmatpush3.bf16.msra.mxu1 %v8353_v35  ;;  %v5588_v35 = vld [vmem:[#allocation3 + $0x92] sm:$0xff] }
 0x471   : > { %7582 = vmatprep.subr.bf16.mxu1 %v8354_v53 }
 0x473   : > { %7551 = vmatmul.mubr.bf16.gmra.mrb[4].mxu1 %v9453_v58  ;;  %v8360_v58 = vld [vmem:[%s9934_s4 + $0x1d0] sm:$0xff]  }
 0x474   : > { %7554 = vmatprep.mubr.bf16.mxu1 %v9460_v47  ;;  %7583 = vmatpush3.bf16.msra.mxu1 %v8354_v53  ;;  %v5589_v53 = vld [vmem:[#allocation3 + $0x9a] sm:$0xff] }
 0x475   : > { %7584 = vmatprep.subr.bf16.mxu1 %v8355_v0 }
 0x478   : > { %7585 = vmatpush3.bf16.msra.mxu1 %v8355_v0  ;;  %v5615_v0 = vpack.c.bf16 %v5587_v15, %v5586_v29 }
 0x479   : > { %7586 = vmatprep.subr.bf16.mxu1 %v8356_v19 }
 0x47b   : > { %7555 = vmatmul.mubr.bf16.gmra.mrb[8].mxu1 %v9465_v50  ;;  %v8373_v50 = vld [vmem:[%s9934_s4 + $0x238] sm:$0xff]  }
 0x47c   : > { %7558 = vmatprep.mubr.bf16.mxu1 %v9472_v37  ;;  %7587 = vmatpush3.bf16.msra.mxu1 %v8356_v19  ;;  %v5293_v37 = vld [vmem:[#allocation3 + $0x111] sm:$0xff]  ;;  %v5616_v19 = vpack.c.bf16 %v5589_v53, %v5588_v35 }
 0x47d   : > { %7588 = vmatprep.subr.bf16.mxu1 %v8357_v23 }
 0x480   : > { %7589 = vmatpush3.bf16.msra.mxu1 %v8357_v23  ;;  %v5590_v23 = vld [vmem:[#allocation3 + $0xaa] sm:$0xff] }
 0x481   : > { %7622 = vmatprep.subr.bf16.mxu1 %v8358_v46 }
 0x483   : > { %7559 = vmatmul.mubr.bf16.gmra.mrb[12].mxu1 %v9474_v43  ;;  %v5295_v43 = vld [vmem:[#allocation3 + $0x129] sm:$0xff] }
 0x484   : > { %7562 = vmatprep.mubr.bf16.mxu1 %v9478_v11  ;;  %v5292_v11 = vld [vmem:[#allocation3 + $0x109] sm:$0xff] }
 0x48b   : > { %7563 = vmatmul.mubr.bf16.gmra.mrb[16].mxu1 %v9480_v36  ;;  %v5315_v36 = vpack.c.bf16 %v5293_v37, %v5292_v11  ;;  %v5607_v11 = vld [vmem:[#allocation3 + $0x172] sm:$0xff] }
 0x48c   : > { %7566 = vmatprep.mubr.bf16.mxu1 %v9484_v13  ;;  %v5294_v13 = vld [vmem:[#allocation3 + $0x121] sm:$0xff] }
 0x493   : > { %7567 = vmatmul.mubr.bf16.gmra.mrb[20].mxu1 %v9486_v14  ;;  %v5316_v14 = vpack.c.bf16 %v5295_v43, %v5294_v13  ;;  %v5606_v43 = vld [vmem:[#allocation3 + $0x16a] sm:$0xff]  ;;  %v5610_v13 = vld [vmem:[#allocation3 + $0x19a] sm:$0xff] }
 0x494   : > { %7570 = vmatprep.mubr.bf16.mxu1 %v9490_v62  ;;  %v5297_v62 = vld [vmem:[#allocation3 + $0x141] sm:$0xff] }
 0x49b   : > { %7571 = vmatmul.mubr.bf16.gmra.mrb[24].mxu1 %v9640_v56 }
 0x49c   : > { %7590 = vmatprep.mubr.bf16.mxu1 %v9359_v51  ;;  %v8361_v51 = vld [vmem:[%s9934_s4 + $0x1d8] sm:$0xff]  }
 0x4a3   : > { %7591 = vmatmul.mubr.bf16.vlgmr.msra.gmra.mrb[28].mxu1 %v9367_v6  ;;  %v8362_v6 = vld [vmem:[%s9934_s4 + $0x1e0] sm:$0xff]  }
 0x4a4   : > { %7623 = vmatpush3.bf16.msra.mxu1 %v8358_v46  ;;  %7594 = vmatprep.mubr.bf16.mxu1 %v9372_v24  ;;  %v8363_v24 = vld [vmem:[%s9934_s4 + $0x1e8] sm:$0xff]  }
 0x4a5   : > { %7624 = vmatprep.subr.bf16.mxu1 %v8359_v21  ;;  %v5591_v46 = vld [vmem:[#allocation3 + $0xb2] sm:$0xff] }
 0x4a8   : > { %7625 = vmatpush3.bf16.msra.mxu1 %v8359_v21  ;;  %v5617_v21 = vpack.c.bf16 %v5591_v46, %v5590_v23 }
 0x4a9   : > { %7626 = vmatprep.subr.bf16.mxu1 %v8360_v58 }
 0x4ab   : > { %7595 = vmatmul.mubr.bf16.gmra.mrb[0].mxu1 %v9379_v61  ;;  %v8364_v61 = vld [vmem:[%s9934_s4 + $0x1f0] sm:$0xff]  }
 0x4ac   : > { %7598 = vmatprep.mubr.bf16.mxu1 %v9384_v4  ;;  %7627 = vmatpush3.bf16.msra.mxu1 %v8360_v58  ;;  %v8365_v4 = vld [vmem:[%s9934_s4 + $0x1f8] sm:$0xff]   ;;  %v5618_v58 = vpack.c.bf16 %v5593_v27, %v5592_v59 }
 0x4ad   : > { %7628 = vmatprep.subr.bf16.mxu1 %v8361_v51 }
 0x4b0   : > { %7629 = vmatpush3.bf16.msra.mxu1 %v8361_v51  ;;  %v5594_v51 = vld [vmem:[#allocation3 + $0xda] sm:$0xff] }
 0x4b1   : > { %7630 = vmatprep.subr.bf16.mxu1 %v8362_v6 }
 0x4b3   : > { %7599 = vmatmul.mubr.bf16.gmra.mrb[4].mxu1 %v9391_v49  ;;  %v8366_v49 = vld [vmem:[%s9934_s4 + $0x200] sm:$0xff]  }
 0x4b4   : > { %7602 = vmatprep.mubr.bf16.mxu1 %v9396_v8  ;;  %7631 = vmatpush3.bf16.msra.mxu1 %v8362_v6  ;;  %v4998_v8 = vld [vmem:[#allocation3 + $0x198] sm:$0xff]  ;;  %v5595_v6 = vld [vmem:[#allocation3 + $0xe2] sm:$0xff] }
 0x4b5   : > { %7632 = vmatprep.subr.bf16.mxu1 %v8363_v24 }
 0x4b8   : > { %7633 = vmatpush3.bf16.msra.mxu1 %v8363_v24  ;;  %v5596_v24 = vld [vmem:[#allocation3 + $0xf2] sm:$0xff] }
 0x4b9   : > { %7634 = vmatprep.subr.bf16.mxu1 %v8364_v61 }
 0x4bb   : > { %7603 = vmatmul.mubr.bf16.gmra.mrb[8].mxu1 %v9403_v39  ;;  %v5015_v39 = vpack.c.bf16 %v9346_v18, %v4998_v8  ;;  %v8369_v18 = vld [vmem:[%s9934_s4 + $0x218] sm:$0xff]  }
 0x4bc   : > { %7606 = vmatprep.mubr.bf16.mxu1 %v9405_v42  ;;  %7635 = vmatpush3.bf16.msra.mxu1 %v8364_v61  ;;  %v8367_v42 = vld [vmem:[%s9934_s4 + $0x208] sm:$0xff]   ;;  %v5598_v8 = vld [vmem:[#allocation3 + $0x10a] sm:$0xff] }
 0x4bd   : > { %7636 = vmatprep.subr.bf16.mxu1 %v8365_v4  ;;  %v5597_v61 = vld [vmem:[#allocation3 + $0xfa] sm:$0xff] }
 0x4c0   : > { %7637 = vmatpush3.bf16.msra.mxu1 %v8365_v4  ;;  %v5619_v4 = vpack.c.bf16 %v5595_v6, %v5594_v51 }
 0x4c1   : > { %7670 = vmatprep.subr.bf16.mxu1 %v8366_v49 }
 0x4c3   : > { %7607 = vmatmul.mubr.bf16.gmra.mrb[12].mxu1 %v9409_v54  ;;  %v8368_v54 = vld [vmem:[%s9934_s4 + $0x210] sm:$0xff]  }
 0x4c4   : > { %7610 = vmatprep.mubr.bf16.mxu1 %v9411_v1  ;;  %v8370_v1 = vld [vmem:[%s9934_s4 + $0x220] sm:$0xff]  }
 0x4cb   : > { %7611 = vmatmul.mubr.bf16.gmra.mrb[16].mxu1 %v9415_v7  ;;  %v8371_v7 = vld [vmem:[%s9934_s4 + $0x228] sm:$0xff]  }
 0x4cc   : > { %7614 = vmatprep.mubr.bf16.mxu1 %v9417_v32  ;;  %v8372_v32 = vld [vmem:[%s9934_s4 + $0x230] sm:$0xff]  }
 0x4d3   : > { %7615 = vmatmul.mubr.bf16.gmra.mrb[20].mxu1 %v9421_v63  ;;  %v5289_v63 = vld [vmem:[#allocation3 + $0xe1] sm:$0xff] }
 0x4d4   : > { %7618 = vmatprep.mubr.bf16.mxu1 %v9540_v2  ;;  %v5313_v47 = vpack.c.bf16 %v5289_v63, %v9579_v52  ;;  %v5299_v2 = vld [vmem:[#allocation3 + $0x159] sm:$0xff] }
 0x4d5   : > { %v5580_v52 = vld [vmem:[#allocation3 + $0x32] sm:$0xff] }
 0x4d6   : > { %v5604_v63 = vld [vmem:[#allocation3 + $0x152] sm:$0xff] }
 0x4db   : > { %7619 = vmatmul.mubr.bf16.gmra.mrb[24].mxu1 %v5015_v39  ;;  %v5599_v39 = vld [vmem:[#allocation3 + $0x112] sm:$0xff] }
 0x4dc   : > { %7638 = vmatprep.mubr.bf16.mxu1 %v9543_v45  ;;  %v5296_v45 = vld [vmem:[#allocation3 + $0x139] sm:$0xff] }
 0x4e3   : > { %7639 = vmatmul.mubr.bf16.vlgmr.msra.gmra.mrb[28].mxu1 %v9548_v5  ;;  %v5317_v5 = vpack.c.bf16 %v5297_v62, %v5296_v45  ;;  %v9720_v45 = vld [vmem:[%s9935_s5] ss:$0 sm:$0xff] }
 0x4e4   : > { %7671 = vmatpush3.bf16.msra.mxu1 %v8366_v49  ;;  %7642 = vmatprep.mubr.bf16.mxu1 %v9555_v38  ;;  %v5298_v38 = vld [vmem:[#allocation3 + $0x151] sm:$0xff]  ;;  %v5620_v49 = vpack.c.bf16 %v5597_v61, %v5596_v24 }
 0x4e5   : > { %7672 = vmatprep.subr.bf16.mxu1 %v8367_v42 }
 0x4e8   : > { %7673 = vmatpush3.bf16.msra.mxu1 %v8367_v42  ;;  %v5600_v42 = vld [vmem:[#allocation3 + $0x122] sm:$0xff] }
 0x4e9   : > { %7674 = vmatprep.subr.bf16.mxu1 %v8368_v54 }
 0x4eb   : > { %7643 = vmatmul.mubr.bf16.gmra.mrb[0].mxu1 %v9560_v30  ;;  %v5318_v30 = vpack.c.bf16 %v5299_v2, %v5298_v38 }
 0x4ec   : > { %7646 = vmatprep.mubr.bf16.mxu1 %v9567_v40  ;;  %7675 = vmatpush3.bf16.msra.mxu1 %v8368_v54  ;;  %v5319_v40 = vpack.c.bf16 %v5301_v48, %v5300_v28  ;;  %v5601_v54 = vld [vmem:[#allocation3 + $0x12a] sm:$0xff] }
 0x4ed   : > { %7676 = vmatprep.subr.bf16.mxu1 %v8369_v18 }
 0x4f0   : > { %7677 = vmatpush3.bf16.msra.mxu1 %v8369_v18  ;;  %v5621_v18 = vpack.c.bf16 %v5599_v39, %v5598_v8 }
 0x4f1   : > { %7678 = vmatprep.subr.bf16.mxu1 %v8370_v1 }
 0x4f3   : > { %7647 = vmatmul.mubr.bf16.gmra.mrb[4].mxu1 %v9572_v17  ;;  %v5304_v17 = vld [vmem:[#allocation3 + $0x199] sm:$0xff] }
 0x4f4   : > { %7650 = vmatprep.mubr.bf16.mxu1 %v9581_v26  ;;  %7679 = vmatpush3.bf16.msra.mxu1 %v8370_v1  ;;  %v5321_v25 = vpack.c.bf16 %v5305_v34, %v5304_v17  ;;  %v5612_v26 = vpack.c.bf16 %v5581_v60, %v5580_v52  ;;  %v5622_v1 = vpack.c.bf16 %v5601_v54, %v5600_v42 }
 0x4f5   : > { %7680 = vmatprep.subr.bf16.mxu1 %v8371_v7 }
 0x4f8   : > { %7681 = vmatpush3.bf16.msra.mxu1 %v8371_v7  ;;  %v5602_v7 = vld [vmem:[#allocation3 + $0x13a] sm:$0xff] }
 0x4f9   : > { %7682 = vmatprep.subr.bf16.mxu1 %v8372_v32 }
 0x4fb   : > { %7651 = vmatmul.mubr.bf16.gmra.mrb[8].mxu1 %v5313_v47  ;;  %v5605_v47 = vld [vmem:[#allocation3 + $0x15a] sm:$0xff] }
 0x4fc   : > { %7654 = vmatprep.mubr.bf16.mxu1 %v9592_v41  ;;  %7683 = vmatpush3.bf16.msra.mxu1 %v8372_v32  ;;  %v5614_v41 = vpack.c.bf16 %v5585_v10, %v5584_v9  ;;  %v5603_v32 = vld [vmem:[#allocation3 + $0x142] sm:$0xff]  ;;  %v5624_v37 = vpack.c.bf16 %v5605_v47, %v5604_v63 }
 0x4fd   : > { %7684 = vmatprep.subr.bf16.mxu1 %v8373_v50 }
 0x500   : > { %7685 = vmatpush3.bf16.msra.mxu1 %v8373_v50  ;;  %v5623_v50 = vpack.c.bf16 %v5603_v32, %v5602_v7 }
 0x503   : > { %7655 = vmatmul.mubr.bf16.gmra.mrb[12].mxu1 %v5315_v36  ;;  %v5625_v36 = vpack.c.bf16 %v5607_v11, %v5606_v43 }
 0x504   : > { %7658 = vmatprep.mubr.bf16.mxu1 %v5316_v14  ;;  %v5611_v14 = vld [vmem:[#allocation3 + $0x1a2] sm:$0xff] }
 0x505   : > { %v5627_v62 = vpack.c.bf16 %v5611_v14, %v5610_v13 }
 0x50b   : > { %7659 = vmatmul.mubr.bf16.gmra.mrb[16].mxu1 %v5317_v5 }
 0x50c   : > { %7662 = vmatprep.mubr.bf16.mxu1 %v5318_v30 }
 0x513   : > { %7663 = vmatmul.mubr.bf16.gmra.mrb[20].mxu1 %v5319_v40 }
 0x514   : > { %7666 = vmatprep.mubr.bf16.mxu1 %v5320_v44 }
 0x51b   : > { %7667 = vmatmul.mubr.bf16.gmra.mrb[24].mxu1 %v5321_v25 }
 0x51c   : > { %7686 = vmatprep.mubr.bf16.mxu1 %v5612_v26 }
 0x523   : > { %7687 = vmatmul.mubr.bf16.vlgmr.msra.gmra.mrb[28].mxu1 %v5613_v16 }
 0x524   : > { %7690 = vmatprep.mubr.bf16.mxu1 %v5614_v41 }
 0x52b   : > { %7691 = vmatmul.mubr.bf16.gmra.mrb[0].mxu1 %v5615_v0 }
 0x52c   : > { %7694 = vmatprep.mubr.bf16.mxu1 %v5616_v19 }
 0x533   : > { %7695 = vmatmul.mubr.bf16.gmra.mrb[4].mxu1 %v5617_v21 }
 0x534   : > { %7698 = vmatprep.mubr.bf16.mxu1 %v5618_v58 }
 0x53b   : > { %7699 = vmatmul.mubr.bf16.gmra.mrb[8].mxu1 %v5619_v4 }
 0x53c   : > { %7702 = vmatprep.mubr.bf16.mxu1 %v5620_v49 }
 0x543   : > { %7703 = vmatmul.mubr.bf16.gmra.mrb[12].mxu1 %v5621_v18 }
 0x544   : > { %7706 = vmatprep.mubr.bf16.mxu1 %v5622_v1 }
 0x54b   : > { %7707 = vmatmul.mubr.bf16.gmra.mrb[16].mxu1 %v5623_v50 }
 0x54c   : > { %7710 = vmatprep.mubr.bf16.mxu1 %v5624_v37 }
 0x553   : > { %7711 = vmatmul.mubr.bf16.gmra.mrb[20].mxu1 %v5625_v36 }
 0x554   : > { %7714 = vmatprep.mubr.bf16.mxu1 %v9640_v56  ;;  %v9726_v56 = vld [vmem:[%s9936_s6] ss:$0 sm:$0xff] }
 0x55b   : > { %7715 = vmatmul.mubr.bf16.gmra.mrb[24].mxu1 %v5627_v62 }
 0x5f6   : > { %v7688_v2 = vpop.f32.mrb[28].mxu1 }
 0x5f7   : > { %v7734_v5 = vadd.f32 %v7688_v2, %v9518_v20  ;;  %v5727_v38 = vpop.f32.mrb[29].mxu1 }
 0x5f8   : > { %v7735_v30 = vadd.f32 %v5727_v38, %v9520_v22  ;;  %v7689_v48 = vpop.f32.mrb[30].mxu1 }
 0x5f9   : > { %v5895_v57 = vmul.f32 %v7734_v5, %v9720_v45  ;;  %v7736_v28 = vadd.f32 %v7689_v48, %v9522_v31  ;;  %v5730_v40 = vpop.f32.mrb[31].mxu1 }
 0x5fa   : > { %v5893_v12 = vmul.f32 %v7735_v30, %v9720_v45  ;;  %v7737_v44 = vadd.f32 %v5730_v40, %v9524_v33 }
 0x5fb   : > { %v5934_v20 = vadd.f32 %v9726_v56, %v5895_v57  ;;  %v5896_v17 = vmul.f32 %v7736_v28, %v9720_v45 }
 0x5fc   : > { %v5932_v34 = vadd.f32 %v9726_v56, %v5893_v12  ;;  %v5894_v25 = vmul.f32 %v7737_v44, %v9720_v45 }
 0x5fd   : > { %v5966_v22 = vmax.f32 %v5934_v20, 0.0  ;;  %v5935_v52 = vadd.f32 %v9726_v56, %v5896_v17 }
 0x5fe   : > { %v5964_v60 = vmax.f32 %v5932_v34, 0.0  ;;  %v5933_v26 = vadd.f32 %v9726_v56, %v5894_v25  ;;  %v7692_v31 = vpop.f32.mrb[0].mxu1 }
 0x5ff   : > { %5998 = vst [vmem:[%s9740_s25 + $0x10] sm:$0xff] %v5966_v22  ;;  %v5967_v33 = vmax.f32 %v5935_v52, 0.0  ;;  %v5899_v55 = vmul.f32 %v7692_v31, %v9720_v45  ;;  %v5743_v3 = vpop.f32.mrb[1].mxu1 }
 0x600   : > { %5996 = vst [vmem:[%s9740_s25] sm:$0xff] %v5964_v60  ;;  %v6028_v9 = vmax.f32 %v5964_v60, %v5966_v22  ;;  %v5965_v10 = vmax.f32 %v5933_v26, 0.0  ;;  %v5897_v16 = vmul.f32 %v9720_v45, %v5743_v3  ;;  %v7693_v41 = vpop.f32.mrb[2].mxu1 }
 0x601   : > { %5999 = vst [vmem:[%s9740_s25 + $0x18] sm:$0xff] %v5967_v33  ;;  %v5938_v29 = vadd.f32 %v9726_v56, %v5899_v55  ;;  %v5900_v15 = vmul.f32 %v7693_v41, %v9720_v45  ;;  %v5746_v35 = vpop.f32.mrb[3].mxu1 }
 0x602   : > { %6044 = vst [vmem:[#allocation4] sm:$0xff] %v6028_v9  ;;  %5997 = vst [vmem:[%s9740_s25 + $0x8] sm:$0xff] %v5965_v10  ;;  %v6029_v53 = vmax.f32 %v5965_v10, %v5967_v33  ;;  %v5936_v0 = vadd.f32 %v9726_v56, %v5897_v16  ;;  %v5898_v19 = vmul.f32 %v9720_v45, %v5746_v35 }
 0x603   : > { %v5970_v23 = vmax.f32 %v5938_v29, 0.0  ;;  %v5939_v46 = vadd.f32 %v9726_v56, %v5900_v15 }
 0x604   : > { %6045 = vst [vmem:[#allocation4 + $0x8] sm:$0xff] %v6029_v53  ;;  %v5968_v59 = vmax.f32 %v5936_v0, 0.0  ;;  %v5937_v27 = vadd.f32 %v9726_v56, %v5898_v19 }
 0x605   : > { %6002 = vst [vmem:[%s9740_s25 + $0x30] sm:$0xff] %v5970_v23  ;;  %v5971_v21 = vmax.f32 %v5939_v46, 0.0 }
 0x606   : > { %6000 = vst [vmem:[%s9740_s25 + $0x20] sm:$0xff] %v5968_v59  ;;  %v6030_v58 = vmax.f32 %v5968_v59, %v5970_v23  ;;  %v5969_v51 = vmax.f32 %v5937_v27, 0.0  ;;  %v7696_v6 = vpop.f32.mrb[4].mxu1 }
 0x607   : > { %6003 = vst [vmem:[%s9740_s25 + $0x38] sm:$0xff] %v5971_v21  ;;  %v5903_v24 = vmul.f32 %v7696_v6, %v9720_v45  ;;  %v5759_v61 = vpop.f32.mrb[5].mxu1 }
 0x608   : > { %6046 = vst [vmem:[#allocation4 + $0x10] sm:$0xff] %v6030_v58  ;;  %6001 = vst [vmem:[%s9740_s25 + $0x28] sm:$0xff] %v5969_v51  ;;  %v6031_v4 = vmax.f32 %v5969_v51, %v5971_v21  ;;  %v5901_v49 = vmul.f32 %v9720_v45, %v5759_v61  ;;  %v7697_v8 = vpop.f32.mrb[6].mxu1 }
 0x609   : > { %v5942_v39 = vadd.f32 %v9726_v56, %v5903_v24  ;;  %v5904_v42 = vmul.f32 %v7697_v8, %v9720_v45  ;;  %v5762_v54 = vpop.f32.mrb[7].mxu1 }
 0x60a   : > { %6047 = vst [vmem:[#allocation4 + $0x18] sm:$0xff] %v6031_v4  ;;  %v5940_v18 = vadd.f32 %v9726_v56, %v5901_v49  ;;  %v5902_v1 = vmul.f32 %v9720_v45, %v5762_v54 }
 0x60b   : > { %v6060_v7 = vld [vmem:[#allocation4] ss:$2 sm:$0xff]  ;;  %v6076_v32 = vld [vmem:[#allocation4 + $0x1] ss:$2 sm:$0xff]  ;;  %v5974_v63 = vmax.f32 %v5942_v39, 0.0  ;;  %v5943_v47 = vadd.f32 %v9726_v56, %v5904_v42 }
 0x60c   : > { %v6091_v50 = vmax.f32 %v6060_v7, %v6076_v32  ;;  %v5972_v37 = vmax.f32 %v5940_v18, 0.0  ;;  %v5941_v43 = vadd.f32 %v9726_v56, %v5902_v1 }
 0x60d   : > { %6006 = vst [vmem:[%s9740_s25 + $0x50] sm:$0xff] %v5974_v63  ;;  %v5975_v11 = vmax.f32 %v5943_v47, 0.0 }
 0x60e   : > { %6099 = vst [vmem:[%s9768_s10] sm:$0xff] %v6091_v50  ;;  %6004 = vst [vmem:[%s9740_s25 + $0x40] sm:$0xff] %v5972_v37  ;;  %v6032_v36 = vmax.f32 %v5972_v37, %v5974_v63  ;;  %v5973_v13 = vmax.f32 %v5941_v43, 0.0  ;;  %v7700_v14 = vpop.f32.mrb[8].mxu1 }
 0x60f   : > { %6007 = vst [vmem:[%s9740_s25 + $0x58] sm:$0xff] %v5975_v11  ;;  %v5907_v62 = vmul.f32 %v7700_v14, %v9720_v45  ;;  %v5775_v2 = vpop.f32.mrb[9].mxu1 }
 0x610   : > { %6048 = vst [vmem:[#allocation4 + $0x20] sm:$0xff] %v6032_v36  ;;  %6005 = vst [vmem:[%s9740_s25 + $0x48] sm:$0xff] %v5973_v13  ;;  %v6033_v5 = vmax.f32 %v5973_v13, %v5975_v11  ;;  %v5905_v38 = vmul.f32 %v9720_v45, %v5775_v2  ;;  %v7701_v30 = vpop.f32.mrb[10].mxu1 }
 0x611   : > { %v6062_v48 = vld [vmem:[#allocation4 + $0x10] ss:$2 sm:$0xff]  ;;  %v6078_v57 = vld [vmem:[#allocation4 + $0x11] ss:$2 sm:$0xff]  ;;  %v5946_v28 = vadd.f32 %v9726_v56, %v5907_v62  ;;  %v5908_v40 = vmul.f32 %v7701_v30, %v9720_v45  ;;  %v5778_v12 = vpop.f32.mrb[11].mxu1 }
 0x612   : > { %v6092_v44 = vmax.f32 %v6062_v48, %v6078_v57  ;;  %6049 = vst [vmem:[#allocation4 + $0x28] sm:$0xff] %v6033_v5  ;;  %v5944_v20 = vadd.f32 %v9726_v56, %v5905_v38  ;;  %v5906_v17 = vmul.f32 %v9720_v45, %v5778_v12 }
 0x613   : > { %v5978_v34 = vmax.f32 %v5946_v28, 0.0  ;;  %v5947_v25 = vadd.f32 %v9726_v56, %v5908_v40 }
 0x614   : > { %6100 = vst [vmem:[%s9768_s10 + $0x8] sm:$0xff] %v6092_v44  ;;  %v5976_v22 = vmax.f32 %v5944_v20, 0.0  ;;  %v5945_v52 = vadd.f32 %v9726_v56, %v5906_v17 }
 0x615   : > { %6010 = vst [vmem:[%s9740_s25 + $0x70] sm:$0xff] %v5978_v34  ;;  %v5979_v60 = vmax.f32 %v5947_v25, 0.0 }
 0x616   : > { %6008 = vst [vmem:[%s9740_s25 + $0x60] sm:$0xff] %v5976_v22  ;;  %v6034_v26 = vmax.f32 %v5976_v22, %v5978_v34  ;;  %v5977_v31 = vmax.f32 %v5945_v52, 0.0  ;;  %v7704_v33 = vpop.f32.mrb[12].mxu1 }
 0x617   : > { %6011 = vst [vmem:[%s9740_s25 + $0x78] sm:$0xff] %v5979_v60  ;;  %v5911_v55 = vmul.f32 %v7704_v33, %v9720_v45  ;;  %v5791_v3 = vpop.f32.mrb[13].mxu1 }
 0x618   : > { %6050 = vst [vmem:[#allocation4 + $0x30] sm:$0xff] %v6034_v26  ;;  %6009 = vst [vmem:[%s9740_s25 + $0x68] sm:$0xff] %v5977_v31  ;;  %v6035_v9 = vmax.f32 %v5977_v31, %v5979_v60  ;;  %v5909_v10 = vmul.f32 %v9720_v45, %v5791_v3  ;;  %v7705_v16 = vpop.f32.mrb[14].mxu1 }
 0x619   : > { %v6064_v41 = vld [vmem:[#allocation4 + $0x20] ss:$2 sm:$0xff]  ;;  %v6080_v29 = vld [vmem:[#allocation4 + $0x21] ss:$2 sm:$0xff]  ;;  %v5950_v15 = vadd.f32 %v9726_v56, %v5911_v55  ;;  %v5912_v35 = vmul.f32 %v7705_v16, %v9720_v45  ;;  %v5794_v53 = vpop.f32.mrb[15].mxu1 }
 0x61a   : > { %v6093_v0 = vmax.f32 %v6064_v41, %v6080_v29  ;;  %6051 = vst [vmem:[#allocation4 + $0x38] sm:$0xff] %v6035_v9  ;;  %v5948_v19 = vadd.f32 %v9726_v56, %v5909_v10  ;;  %v5910_v23 = vmul.f32 %v9720_v45, %v5794_v53 }
 0x61b   : > { %v5982_v46 = vmax.f32 %v5950_v15, 0.0  ;;  %v5951_v59 = vadd.f32 %v9726_v56, %v5912_v35 }
 0x61c   : > { %6101 = vst [vmem:[%s9768_s10 + $0x10] sm:$0xff] %v6093_v0  ;;  %v5980_v27 = vmax.f32 %v5948_v19, 0.0  ;;  %v5949_v21 = vadd.f32 %v9726_v56, %v5910_v23 }
 0x61d   : > { %6014 = vst [vmem:[%s9740_s25 + $0x90] sm:$0xff] %v5982_v46  ;;  %v5983_v58 = vmax.f32 %v5951_v59, 0.0 }
 0x61e   : > { %6012 = vst [vmem:[%s9740_s25 + $0x80] sm:$0xff] %v5980_v27  ;;  %v6036_v51 = vmax.f32 %v5980_v27, %v5982_v46  ;;  %v5981_v6 = vmax.f32 %v5949_v21, 0.0  ;;  %v7708_v24 = vpop.f32.mrb[16].mxu1 }
 0x61f   : > { %6015 = vst [vmem:[%s9740_s25 + $0x98] sm:$0xff] %v5983_v58  ;;  %v5915_v61 = vmul.f32 %v7708_v24, %v9720_v45  ;;  %v5807_v4 = vpop.f32.mrb[17].mxu1 }
 0x620   : > { %6052 = vst [vmem:[#allocation4 + $0x40] sm:$0xff] %v6036_v51  ;;  %6013 = vst [vmem:[%s9740_s25 + $0x88] sm:$0xff] %v5981_v6  ;;  %v6037_v49 = vmax.f32 %v5981_v6, %v5983_v58  ;;  %v5913_v8 = vmul.f32 %v9720_v45, %v5807_v4  ;;  %v7709_v39 = vpop.f32.mrb[18].mxu1 }
 0x621   : > { %v6066_v42 = vld [vmem:[#allocation4 + $0x30] ss:$2 sm:$0xff]  ;;  %v6082_v54 = vld [vmem:[#allocation4 + $0x31] ss:$2 sm:$0xff]  ;;  %v5954_v18 = vadd.f32 %v9726_v56, %v5915_v61  ;;  %v5916_v1 = vmul.f32 %v7709_v39, %v9720_v45  ;;  %v5810_v7 = vpop.f32.mrb[19].mxu1 }
 0x622   : > { %v6094_v32 = vmax.f32 %v6066_v42, %v6082_v54  ;;  %6053 = vst [vmem:[#allocation4 + $0x48] sm:$0xff] %v6037_v49  ;;  %v5952_v63 = vadd.f32 %v9726_v56, %v5913_v8  ;;  %v5914_v47 = vmul.f32 %v9720_v45, %v5810_v7 }
 0x623   : > { %v5986_v50 = vmax.f32 %v5954_v18, 0.0  ;;  %v5955_v37 = vadd.f32 %v9726_v56, %v5916_v1 }
 0x624   : > { %6102 = vst [vmem:[%s9768_s10 + $0x18] sm:$0xff] %v6094_v32  ;;  %v5984_v43 = vmax.f32 %v5952_v63, 0.0  ;;  %v5953_v11 = vadd.f32 %v9726_v56, %v5914_v47 }
 0x625   : > { %6018 = vst [vmem:[%s9740_s25 + $0xb0] sm:$0xff] %v5986_v50  ;;  %v5987_v36 = vmax.f32 %v5955_v37, 0.0 }
 0x626   : > { %6016 = vst [vmem:[%s9740_s25 + $0xa0] sm:$0xff] %v5984_v43  ;;  %v6038_v13 = vmax.f32 %v5984_v43, %v5986_v50  ;;  %v5985_v14 = vmax.f32 %v5953_v11, 0.0  ;;  %v7712_v62 = vpop.f32.mrb[20].mxu1 }
 0x627   : > { %6019 = vst [vmem:[%s9740_s25 + $0xb8] sm:$0xff] %v5987_v36  ;;  %v5919_v2 = vmul.f32 %v7712_v62, %v9720_v45  ;;  %v5823_v5 = vpop.f32.mrb[21].mxu1 }
 0x628   : > { %6054 = vst [vmem:[#allocation4 + $0x50] sm:$0xff] %v6038_v13  ;;  %6017 = vst [vmem:[%s9740_s25 + $0xa8] sm:$0xff] %v5985_v14  ;;  %v6039_v38 = vmax.f32 %v5985_v14, %v5987_v36  ;;  %v5917_v30 = vmul.f32 %v9720_v45, %v5823_v5  ;;  %v7713_v48 = vpop.f32.mrb[22].mxu1 }
 0x629   : > { %v6068_v57 = vld [vmem:[#allocation4 + $0x40] ss:$2 sm:$0xff]  ;;  %v6084_v28 = vld [vmem:[#allocation4 + $0x41] ss:$2 sm:$0xff]  ;;  %v5958_v40 = vadd.f32 %v9726_v56, %v5919_v2  ;;  %v5920_v12 = vmul.f32 %v7713_v48, %v9720_v45  ;;  %v5826_v44 = vpop.f32.mrb[23].mxu1 }
 0x62a   : > { %v6095_v20 = vmax.f32 %v6068_v57, %v6084_v28  ;;  %6055 = vst [vmem:[#allocation4 + $0x58] sm:$0xff] %v6039_v38  ;;  %v5956_v17 = vadd.f32 %v9726_v56, %v5917_v30  ;;  %v5918_v34 = vmul.f32 %v9720_v45, %v5826_v44 }
 0x62b   : > { %v5990_v25 = vmax.f32 %v5958_v40, 0.0  ;;  %v5959_v22 = vadd.f32 %v9726_v56, %v5920_v12 }
 0x62c   : > { %6103 = vst [vmem:[%s9768_s10 + $0x20] sm:$0xff] %v6095_v20  ;;  %v5988_v52 = vmax.f32 %v5956_v17, 0.0  ;;  %v5957_v60 = vadd.f32 %v9726_v56, %v5918_v34 }
 0x62d   : > { %6022 = vst [vmem:[%s9740_s25 + $0xd0] sm:$0xff] %v5990_v25  ;;  %v5991_v26 = vmax.f32 %v5959_v22, 0.0 }
 0x62e   : > { %6020 = vst [vmem:[%s9740_s25 + $0xc0] sm:$0xff] %v5988_v52  ;;  %v6040_v31 = vmax.f32 %v5988_v52, %v5990_v25  ;;  %v5989_v33 = vmax.f32 %v5957_v60, 0.0  ;;  %v7716_v55 = vpop.f32.mrb[24].mxu1 }
 0x62f   : > { %6023 = vst [vmem:[%s9740_s25 + $0xd8] sm:$0xff] %v5991_v26  ;;  %v5923_v3 = vmul.f32 %v7716_v55, %v9720_v45  ;;  %v5839_v9 = vpop.f32.mrb[25].mxu1 }
 0x630   : > { %6056 = vst [vmem:[#allocation4 + $0x60] sm:$0xff] %v6040_v31  ;;  %6021 = vst [vmem:[%s9740_s25 + $0xc8] sm:$0xff] %v5989_v33  ;;  %v6041_v10 = vmax.f32 %v5989_v33, %v5991_v26  ;;  %v5921_v16 = vmul.f32 %v9720_v45, %v5839_v9  ;;  %v7717_v41 = vpop.f32.mrb[26].mxu1 }
 0x631   : > { %v6070_v29 = vld [vmem:[#allocation4 + $0x50] ss:$2 sm:$0xff]  ;;  %v6086_v15 = vld [vmem:[#allocation4 + $0x51] ss:$2 sm:$0xff]  ;;  %v5962_v35 = vadd.f32 %v9726_v56, %v5923_v3  ;;  %v5924_v53 = vmul.f32 %v7717_v41, %v9720_v45  ;;  %v5842_v0 = vpop.f32.mrb[27].mxu1 }
 0x632   : > { %v6096_v19 = vmax.f32 %v6070_v29, %v6086_v15  ;;  %6057 = vst [vmem:[#allocation4 + $0x68] sm:$0xff] %v6041_v10  ;;  %v5960_v23 = vadd.f32 %v9726_v56, %v5921_v16  ;;  %v5922_v46 = vmul.f32 %v9720_v45, %v5842_v0 }
 0x633   : > { %v5994_v59 = vmax.f32 %v5962_v35, 0.0  ;;  %v5963_v27 = vadd.f32 %v9726_v56, %v5924_v53 }
 0x634   : > { %6104 = vst [vmem:[%s9768_s10 + $0x28] sm:$0xff] %v6096_v19  ;;  %v5992_v21 = vmax.f32 %v5960_v23, 0.0  ;;  %v5961_v58 = vadd.f32 %v9726_v56, %v5922_v46 }
 0x635   : > { %6026 = vst [vmem:[%s9740_s25 + $0xf0] sm:$0xff] %v5994_v59  ;;  %v5995_v51 = vmax.f32 %v5963_v27, 0.0 }
 0x636   : > { %6024 = vst [vmem:[%s9740_s25 + $0xe0] sm:$0xff] %v5992_v21  ;;  %v6042_v6 = vmax.f32 %v5992_v21, %v5994_v59  ;;  %v5993_v24 = vmax.f32 %v5961_v58, 0.0 }
 0x637   : > { %6027 = vst [vmem:[%s9740_s25 + $0xf8] sm:$0xff] %v5995_v51 }
 0x638   : > { %6058 = vst [vmem:[#allocation4 + $0x70] sm:$0xff] %v6042_v6  ;;  %6025 = vst [vmem:[%s9740_s25 + $0xe8] sm:$0xff] %v5993_v24  ;;  %v6043_v45 = vmax.f32 %v5993_v24, %v5995_v51 }
 0x639   : > { %v6072_v56 = vld [vmem:[#allocation4 + $0x60] ss:$2 sm:$0xff]  ;;  %v6088_v61 = vld [vmem:[#allocation4 + $0x61] ss:$2 sm:$0xff] }
 0x63a   : > { %8388 = shalt.err (!%p8385_p3)
}
 0x63b   : > { %s8389_s25 = scalar_lea.hbm %s9842_s20, 4096  ;;  %s8393_s18 = scalar_lea.hbm %s9938_s8, 8192 }
 0x63c   : > { %p8390_p4 = scmp.ne.s32.totalorder %s9842_s20, %s8389_s25  ;;  %p8394_p9 = scmp.lt.u32.totalorder %s9842_s20, %s9938_s8 }
 0x63d   : > { %p8395_p10 = scmp.lt.u32.totalorder %s8393_s18, %s8389_s25  ;;  %p8397_p12 = scmp.lt.u32.totalorder %s8389_s25, %s9842_s20 }
 0x63e   : > { %p8391_p7 = pnand %p8390_p4, %p8559_p5 }
 0x63f   : > { %p8396_p11 = por %p8395_p10, %p8394_p9 }
 0x640   : > { %p8392_p8 = pneg %p8391_p7 }
 0x641   : > { %p8398_p13 = por %p8397_p12, %p8396_p11 }
 0x643   : > { %p8399_p0 = pnand %p8398_p13, %p8392_p8 }
 0x645   : > { %8402 = shalt.err (!%p8399_p0)
}
 0x646   : > { %s8473_s22 = smov 128   ;;  %s8474_s26 = smov 8   ;;  %v6097_v4 = vmax.f32 %v6072_v56, %v6088_v61  ;;  %6059 = vst [vmem:[#allocation4 + $0x78] sm:$0xff] %v6043_v45 }
 0x647   : > { %8256 = dma.vmem_to_hbm [thread:$0]  (%p8559_p5), %s9844_s13, 4096, %s9842_s20, %s6113_s21, %s8473_s22, %s8473_s22, %s8474_s26  }
 0x648   : > { %6105 = vst [vmem:[%s9768_s10 + $0x30] sm:$0xff] %v6097_v4  ;;  %s6609_s25 = sshll.u32 %s8542_s9, 10  ;;  %s6126_s12 = sshll.u32 %s9768_s10, 4  ;;  %s9883_s12 = int_to_ptr.vmem [resolvable:$true] %s6126_s12 }
 0x649   : > { %s9881_s23 = scalar_lea.hbm %s9937_s7, %s6609_s25  ;;  %s6108_s13 = scalar_lea.sflag [#allocation6], %s9715_s19 }
 0x64a   : > { %s8403_s20 = scalar_lea.vmem %s9883_s12, 1024  ;;  %s8475_s9 = smov [#allocation5]  }
 0x64b   : > { %p8404_p1 = scmp.ne.s32.totalorder %s9883_s12, %s8403_s20  ;;  %s8407_s21 = sshll.u32 %s8475_s9, 4  ;;  %s8408_s21 = int_to_ptr.vmem [resolvable:$false] %s8407_s21 }
 0x64c   : > { %s8409_s24 = scalar_lea.vmem %s8408_s21, 2048  ;;  %p8410_p4 = scmp.lt.s32.totalorder %s9883_s12, %s8408_s21 }
 0x64d   : > { %v6074_v49 = vld [vmem:[#allocation4 + $0x70] ss:$2 sm:$0xff]  ;;  %v6090_v8 = vld [vmem:[#allocation4 + $0x71] ss:$2 sm:$0xff]  ;;  %p8405_p2 = pnand %p8404_p1, %p8559_p5  ;;  %p8411_p7 = scmp.lt.s32.totalorder %s8409_s24, %s8403_s20 }
 0x64e   : > { %v6098_v39 = vmax.f32 %v6074_v49, %v6090_v8 }
 0x64f   : > { %p8406_p3 = pneg %p8405_p2  ;;  %p8412_p8 = por %p8411_p7, %p8410_p4 }
 0x650   : > { %6106 = vst [vmem:[%s9768_s10 + $0x38] sm:$0xff] %v6098_v39 }
 0x651   : > { %p8413_p9 = pnand %p8412_p8, %p8406_p3 }
 0x653   : > { %8416 = shalt.err (!%p8413_p9)
}
 0x654   : > { %s8417_s10 = scalar_lea.hbm %s9881_s23, 1024  ;;  %s8421_s18 = scalar_lea.hbm %s9937_s7, 2048 }
 0x655   : > { %p8418_p10 = scmp.ne.s32.totalorder %s9881_s23, %s8417_s10  ;;  %p8422_p13 = scmp.lt.u32.totalorder %s9881_s23, %s9937_s7 }
 0x656   : > { %p8423_p0 = scmp.lt.u32.totalorder %s8421_s18, %s8417_s10  ;;  %p8425_p2 = scmp.lt.u32.totalorder %s8417_s10, %s9881_s23 }
 0x657   : > { %p8419_p11 = pnand %p8418_p10, %p8559_p5 }
 0x658   : > { %p8424_p1 = por %p8423_p0, %p8422_p13 }
 0x659   : > { %p8420_p12 = pneg %p8419_p11 }
 0x65a   : > { %p8426_p3 = por %p8425_p2, %p8424_p1 }
 0x65c   : > { %p8427_p4 = pnand %p8426_p3, %p8420_p12 }
 0x65e   : > { %8430 = shalt.err (!%p8427_p4)
}
 0x65f   : > { %8255 = dma.vmem_to_hbm [thread:$0]  (%p8559_p5), %s9883_s12, 1024, %s9881_s23, %s6108_s13, %s8473_s22, %s8473_s22, %s8474_s26  }
 0x660 PF: > { %p8266_p7 = scmp.ge.s32.totalorder %s8469_s30, 2  ;;  %s6157_s20 = sand.u32 1, %s8457_s27  }
 0x661   : > { %s6158_s24 = scalar_lea.sflag [#allocation6], %s6157_s20 }
 0x662   : > { %p8260_p8 = pnand %p8266_p7, %p8563_p6 }
 0x664   : > { %8448 = dma.done.wait (!%p8260_p8), %s6158_s24, 1024  }
 0x665   : > { %8450 = vsyncadd (!%p8260_p8), %s6158_s24, 4294966272  ;;  %s6167_s15 = scalar_lea.sflag [#allocation8], %s6157_s20 }
 0x666   : > { %8452 = dma.done.wait (!%p8260_p8), %s6167_s15, 4096  }
 0x667   : > { %8454 = vsyncadd (!%p8260_p8), %s6167_s15, 4294963200  ;;  %p22_p5 = scmp.ge.s32.totalorder %s8546_s11, 4   ;;  %s9941_s27 = smov %s8461_s28 }
 0x668   : > { %s9942_s28 = smov %s8465_s29  ;;  %s9943_s29 = smov %s8557_s14 }
 0x669   : > { %s9944_s30 = smov %s8546_s11  ;;  %24 = sbr.rel (!%p22_p5) target bundleno = 5 (0x5), region = 137 }
 0x670   :  { %6172 = vsyncpa [#allocation6], 1 }
 0x671   :  { %6174 = vsyncpa [#allocation6 + $0x1], 1 }
 0x672   :  { %6175 = vsyncpa [#allocation8], 1 }
 0x673   :  { %6177 = vsyncpa [#allocation8 + $0x1], 1 }

</bundles_post_ra>
